<compile_context>
chip_gen: v7x
topology: tpu7x:2x2x1
jax: 0.10.0
libtpu: 0.0.40
codegen_flags: <defaults>
</compile_context>

<pallas_src>
import numpy as np
import jax
import jax.numpy as jnp
from jax.experimental import pallas as pl
from jax.experimental.pallas import tpu as pltpu


# ----------------------------- packing layout -------------------------------

LANE = 128                       # padded out_features (lane) width
W_ROWS = 128                     # padded in_features rows per layer block
B_ROWS = 8                       # padded bias rows per layer block
BLOCK_ROWS = W_ROWS + B_ROWS     # 136 rows per layer block (multiple of 8)
N_LAYERS = 4
# softplus(RHO_PAD) == 1  =>  log(sigma_pad) == 0, so padded elements add ~0 KL
RHO_PAD = float(np.log(np.e - 1.0))


# ----------------------------- Pallas kernel --------------------------------

def bayes_mlp_kernel(x_ref, mu_ref, rho_ref, eps_ref, y_ref, kl_ref):
    mu = mu_ref[...]                       # (4*136, 128)
    rho = rho_ref[...]
    eps = eps_ref[...]

    # Weight reparameterization sample over the whole packed slab.
    sigma = jnp.log1p(jnp.exp(rho))        # stable softplus == log(1+exp(rho))
    w = mu + sigma * eps

    # KL = sum(log_q - log_p), single element-wise pass + ONE reduction.
    # log_q: -0.5*((w-mu)/sigma)^2 - log(sigma) == -0.5*eps^2 - log(sigma)
    log_q = -0.5 * (eps * eps) - jnp.log(sigma)
    # Mixed prior (faithful to the reference, incl. narrow term / sigma_wide).
    wide = 0.5 * jnp.exp(-0.5 * (w * w))                      # / sigma_wide(=1)
    narrow = 0.5 * jnp.exp(-0.5 * (w * w) / (0.002 * 0.002))  # / sigma_wide(=1)
    log_p = jnp.log(wide + narrow)
    kl_ref[0] = jnp.sum(log_q - log_p)

    # MLP forward: x is (B, 128) zero-padded in the lanes; weights are stored
    # (in, out) so h @ W feeds the MXU directly (no transpose).  Padded lanes
    # of W and b are zero, so padded activation lanes stay exactly zero.
    h = x_ref[...]
    for li in range(N_LAYERS):
        off = li * BLOCK_ROWS
        w_l = w[off:off + W_ROWS, :]                        # (128, 128)
        b_l = w[off + W_ROWS:off + W_ROWS + 1, :]           # (1, 128)
        h = jnp.dot(h, w_l, preferred_element_type=jnp.float32) + b_l
        if li < N_LAYERS - 1:
            # F.leaky_relu, default negative_slope = 0.01
            h = jnp.where(h >= 0, h, 0.01 * h)
    y_ref[...] = h.astype(y_ref.dtype)


# ----------------------------- wrapper ---------------------------------------

def _pack_slabs(params, noise):
    """Pack per-layer (mu, rho, eps) into three (N_LAYERS*136, 128) slabs."""
    mu_blocks, rho_blocks, eps_blocks = [], [], []
    for (w_mu, w_rho, b_mu, b_rho), (w_eps, b_eps) in zip(params, noise):
        out_f, in_f = w_mu.shape

        def pad_w(a, fill):
            blk = jnp.full((W_ROWS, LANE), fill, jnp.float32)
            return blk.at[:in_f, :out_f].set(a.T.astype(jnp.float32))

        def pad_b(a, fill):
            blk = jnp.full((B_ROWS, LANE), fill, jnp.float32)
            return blk.at[0:1, :out_f].set(a.reshape(1, out_f).astype(jnp.float32))

        mu_blocks += [pad_w(w_mu, 0.0), pad_b(b_mu, 0.0)]
        rho_blocks += [pad_w(w_rho, RHO_PAD), pad_b(b_rho, RHO_PAD)]
        eps_blocks += [pad_w(w_eps, 0.0), pad_b(b_eps, 0.0)]

    return (jnp.concatenate(mu_blocks, axis=0),
            jnp.concatenate(rho_blocks, axis=0),
            jnp.concatenate(eps_blocks, axis=0))


def bayes_mlp_forward(x, params, noise):
    """x: (B, input_size); params[i] = (w_mu(out,in), w_rho, b_mu(1,out), b_rho);
    noise[i] = (w_eps(out,in), b_eps(1,out)).  Returns (y (B,out), kl scalar)."""
    B, in_f = x.shape
    out_f = params[-1][0].shape[0]

    mu_slab, rho_slab, eps_slab = _pack_slabs(params, noise)
    x_pad = jnp.zeros((B, LANE), jnp.float32).at[:, :in_f].set(x.astype(jnp.float32))

    y_pad, kl = pl.pallas_call(
        bayes_mlp_kernel,
        out_shape=(jax.ShapeDtypeStruct((B, LANE), jnp.float32),
                   jax.ShapeDtypeStruct((1,), jnp.float32)),
        in_specs=[pl.BlockSpec(memory_space=pltpu.MemorySpace.VMEM)] * 4,
        out_specs=(pl.BlockSpec(memory_space=pltpu.MemorySpace.VMEM),
                   pl.BlockSpec(memory_space=pltpu.MemorySpace.SMEM)),
    )(x_pad, mu_slab, rho_slab, eps_slab)

    return y_pad[:, :out_f], kl[0]


# ----------------------------- pure-JAX reference (for verification) --------

def bayes_mlp_reference(x, params, noise):
    h = x
    kl = jnp.float32(0.0)
    n = len(params)
    for li, ((w_mu, w_rho, b_mu, b_rho), (w_eps, b_eps)) in enumerate(zip(params, noise)):
        w_sigma = jnp.log1p(jnp.exp(w_rho))
        b_sigma = jnp.log1p(jnp.exp(b_rho))
        w = w_mu + w_sigma * w_eps
        b = b_mu + b_sigma * b_eps

        def log_post(v, mu, sigma):
            return -0.5 * jnp.square(v - mu) / jnp.square(sigma) - jnp.log(sigma)

        def log_prior(v, sigma_wide=1.0, sigma_narrow=0.002, frac=0.5):
            ew = frac * jnp.exp(-0.5 * jnp.square(v) / (sigma_wide ** 2)) / sigma_wide
            en = (1.0 - frac) * jnp.exp(-0.5 * jnp.square(v) / (sigma_narrow ** 2)) / sigma_wide
            return jnp.log(ew + en)

        log_q = jnp.sum(log_post(w, w_mu, w_sigma)) + jnp.sum(log_post(b, b_mu, b_sigma))
        log_p = jnp.sum(log_prior(w)) + jnp.sum(log_prior(b))
        kl = kl + (log_q - log_p)
        h = h @ w.T + b
        if li < n - 1:
            h = jnp.where(h >= 0, h, 0.01 * h)
    return h, kl


# ----------------------------- parameter / noise construction ---------------

def init_params(key, input_size, hidden_dim, output_size):
    layer_dims = [(hidden_dim, input_size),
                  (hidden_dim, hidden_dim),
                  (hidden_dim, hidden_dim),
                  (output_size, hidden_dim)]
    params, noise = [], []
    for (out_f, in_f) in layer_dims:
        key, k_w, k_b, k_we, k_be = jax.random.split(key, 5)
        stdv = 1.0 / np.sqrt(in_f)
        w_mu = jax.random.uniform(k_w, (out_f, in_f), jnp.float32, -stdv, stdv)
        w_rho = jnp.full((out_f, in_f), -3.0, jnp.float32)
        b_mu = jax.random.uniform(k_b, (1, out_f), jnp.float32, -stdv, stdv)
        b_rho = jnp.full((1, out_f), -3.0, jnp.float32)
        w_eps = jax.random.normal(k_we, (out_f, in_f), jnp.float32)
        b_eps = jax.random.normal(k_be, (1, out_f), jnp.float32)
        params.append((w_mu, w_rho, b_mu, b_rho))
        noise.append((w_eps, b_eps))
    return params, noise


# ----------------------------- main ------------------------------------------

if __name__ == "__main__":
    batch = 8
    input_size = 32
    hidden_dim = 32
    output_size = 16

    key = jax.random.PRNGKey(0)
    key, k_x, k_p = jax.random.split(key, 3)
    x = jax.random.normal(k_x, (batch, input_size), jnp.float32)
    params, noise = init_params(k_p, input_size, hidden_dim, output_size)

    y, kl = bayes_mlp_forward(x, params, noise)
    y = jax.block_until_ready(y)
    kl = jax.block_until_ready(kl)

    y_ref, kl_ref = bayes_mlp_reference(x, params, noise)
    assert y.shape == (batch, output_size)
    np.testing.assert_allclose(np.asarray(y), np.asarray(y_ref), rtol=1e-5, atol=1e-5)
    np.testing.assert_allclose(np.asarray(kl).reshape(()), np.asarray(kl_ref),
                               rtol=5e-4, atol=0.5)

    print("KERNEL_OK")
</pallas_src>

<mosaic_0001>
module attributes {stable_mosaic.version = 11 : i64} {
  func.func @bayes_mlp_kernel(%arg0: memref<8x128xf32, #tpu.memory_space<vmem>>, %arg1: memref<544x128xf32, #tpu.memory_space<vmem>>, %arg2: memref<544x128xf32, #tpu.memory_space<vmem>>, %arg3: memref<544x128xf32, #tpu.memory_space<vmem>>, %arg4: memref<8x128xf32, #tpu.memory_space<vmem>>, %arg5: memref<1xf32, #tpu.memory_space<smem>>) attributes {dimension_semantics = [], scalar_prefetch = 0 : i64, scratch_operands = 0 : i64, tpu.core_type = #tpu.core_type<tc>} {
    %c0 = arith.constant 0 : index
    %c0_0 = arith.constant 0 : index
    %0 = vector.load %arg1[%c0, %c0_0] : memref<544x128xf32, #tpu.memory_space<vmem>>, vector<544x128xf32>
    %c0_1 = arith.constant 0 : index
    %c0_2 = arith.constant 0 : index
    %1 = vector.load %arg2[%c0_1, %c0_2] : memref<544x128xf32, #tpu.memory_space<vmem>>, vector<544x128xf32>
    %c0_3 = arith.constant 0 : index
    %c0_4 = arith.constant 0 : index
    %2 = vector.load %arg3[%c0_3, %c0_4] : memref<544x128xf32, #tpu.memory_space<vmem>>, vector<544x128xf32>
    %3 = math.exp %1 : vector<544x128xf32>
    %4 = math.log1p %3 : vector<544x128xf32>
    %5 = arith.mulf %4, %2 : vector<544x128xf32>
    %6 = arith.addf %0, %5 : vector<544x128xf32>
    %7 = arith.mulf %2, %2 : vector<544x128xf32>
    %cst = arith.constant -5.000000e-01 : f32
    %8 = vector.broadcast %cst : f32 to vector<544x128xf32>
    %9 = arith.mulf %8, %7 : vector<544x128xf32>
    %10 = math.log %4 : vector<544x128xf32>
    %11 = arith.subf %9, %10 : vector<544x128xf32>
    %12 = arith.mulf %6, %6 : vector<544x128xf32>
    %cst_5 = arith.constant -5.000000e-01 : f32
    %13 = vector.broadcast %cst_5 : f32 to vector<544x128xf32>
    %14 = arith.mulf %13, %12 : vector<544x128xf32>
    %15 = math.exp %14 : vector<544x128xf32>
    %cst_6 = arith.constant 5.000000e-01 : f32
    %16 = vector.broadcast %cst_6 : f32 to vector<544x128xf32>
    %17 = arith.mulf %16, %15 : vector<544x128xf32>
    %18 = arith.mulf %6, %6 : vector<544x128xf32>
    %cst_7 = arith.constant -5.000000e-01 : f32
    %19 = vector.broadcast %cst_7 : f32 to vector<544x128xf32>
    %20 = arith.mulf %19, %18 : vector<544x128xf32>
    %cst_8 = arith.constant 4.000000e-06 : f32
    %21 = vector.broadcast %cst_8 : f32 to vector<544x128xf32>
    %22 = arith.divf %20, %21 : vector<544x128xf32>
    %23 = math.exp %22 : vector<544x128xf32>
    %cst_9 = arith.constant 5.000000e-01 : f32
    %24 = vector.broadcast %cst_9 : f32 to vector<544x128xf32>
    %25 = arith.mulf %24, %23 : vector<544x128xf32>
    %26 = arith.addf %17, %25 : vector<544x128xf32>
    %27 = math.log %26 : vector<544x128xf32>
    %28 = arith.subf %11, %27 : vector<544x128xf32>
    %29 = vector.shape_cast %28 : vector<544x128xf32> to vector<1x544x128xf32>
    %cst_10 = arith.constant dense<0.000000e+00> : vector<1xf32>
    %30 = vector.multi_reduction <add>, %29, %cst_10 [1, 2] : vector<1x544x128xf32> to vector<1xf32>
    %31 = vector.shape_cast %30 : vector<1xf32> to vector<1x1x1xf32>
    %32 = vector.extract %31[0, 0, 0] : f32 from vector<1x1x1xf32>
    %c0_11 = arith.constant 0 : index
    %33 = memref.load %arg5[%c0_11] : memref<1xf32, #tpu.memory_space<smem>>
    memref.store %32, %arg5[%c0_11] : memref<1xf32, #tpu.memory_space<smem>>
    %c0_12 = arith.constant 0 : index
    %c0_13 = arith.constant 0 : index
    %34 = vector.load %arg0[%c0_12, %c0_13] : memref<8x128xf32, #tpu.memory_space<vmem>>, vector<8x128xf32>
    %35 = vector.extract_strided_slice %6 {offsets = [0, 0], sizes = [128, 128], strides = [1, 1]} : vector<544x128xf32> to vector<128x128xf32>
    %36 = vector.extract_strided_slice %6 {offsets = [128, 0], sizes = [1, 128], strides = [1, 1]} : vector<544x128xf32> to vector<1x128xf32>
    %cst_14 = arith.constant dense<0.000000e+00> : vector<8x128xf32>
    %37 = tpu.matmul %34, %35, %cst_14 {dimension_numbers = #tpu.dot_dimension_numbers<[1], [0], [0], [1], [0, 0, 1, 1], [], []>} : vector<8x128xf32>, vector<128x128xf32>, vector<8x128xf32> -> vector<8x128xf32>
    %38 = vector.broadcast %36 : vector<1x128xf32> to vector<8x128xf32>
    %39 = arith.addf %37, %38 : vector<8x128xf32>
    %cst_15 = arith.constant 0.000000e+00 : f32
    %40 = vector.broadcast %cst_15 : f32 to vector<8x128xf32>
    %41 = arith.cmpf oge, %39, %40 : vector<8x128xf32>
    %cst_16 = arith.constant 0.00999999977 : f32
    %42 = vector.broadcast %cst_16 : f32 to vector<8x128xf32>
    %43 = arith.mulf %42, %39 : vector<8x128xf32>
    %44 = arith.select %41, %39, %43 : vector<8x128xi1>, vector<8x128xf32>
    %45 = vector.extract_strided_slice %6 {offsets = [136, 0], sizes = [128, 128], strides = [1, 1]} : vector<544x128xf32> to vector<128x128xf32>
    %46 = vector.extract_strided_slice %6 {offsets = [264, 0], sizes = [1, 128], strides = [1, 1]} : vector<544x128xf32> to vector<1x128xf32>
    %cst_17 = arith.constant dense<0.000000e+00> : vector<8x128xf32>
    %47 = tpu.matmul %44, %45, %cst_17 {dimension_numbers = #tpu.dot_dimension_numbers<[1], [0], [0], [1], [0, 0, 1, 1], [], []>} : vector<8x128xf32>, vector<128x128xf32>, vector<8x128xf32> -> vector<8x128xf32>
    %48 = vector.broadcast %46 : vector<1x128xf32> to vector<8x128xf32>
    %49 = arith.addf %47, %48 : vector<8x128xf32>
    %cst_18 = arith.constant 0.000000e+00 : f32
    %50 = vector.broadcast %cst_18 : f32 to vector<8x128xf32>
    %51 = arith.cmpf oge, %49, %50 : vector<8x128xf32>
    %cst_19 = arith.constant 0.00999999977 : f32
    %52 = vector.broadcast %cst_19 : f32 to vector<8x128xf32>
    %53 = arith.mulf %52, %49 : vector<8x128xf32>
    %54 = arith.select %51, %49, %53 : vector<8x128xi1>, vector<8x128xf32>
    %55 = vector.extract_strided_slice %6 {offsets = [272, 0], sizes = [128, 128], strides = [1, 1]} : vector<544x128xf32> to vector<128x128xf32>
    %56 = vector.extract_strided_slice %6 {offsets = [400, 0], sizes = [1, 128], strides = [1, 1]} : vector<544x128xf32> to vector<1x128xf32>
    %cst_20 = arith.constant dense<0.000000e+00> : vector<8x128xf32>
    %57 = tpu.matmul %54, %55, %cst_20 {dimension_numbers = #tpu.dot_dimension_numbers<[1], [0], [0], [1], [0, 0, 1, 1], [], []>} : vector<8x128xf32>, vector<128x128xf32>, vector<8x128xf32> -> vector<8x128xf32>
    %58 = vector.broadcast %56 : vector<1x128xf32> to vector<8x128xf32>
    %59 = arith.addf %57, %58 : vector<8x128xf32>
    %cst_21 = arith.constant 0.000000e+00 : f32
    %60 = vector.broadcast %cst_21 : f32 to vector<8x128xf32>
    %61 = arith.cmpf oge, %59, %60 : vector<8x128xf32>
    %cst_22 = arith.constant 0.00999999977 : f32
    %62 = vector.broadcast %cst_22 : f32 to vector<8x128xf32>
    %63 = arith.mulf %62, %59 : vector<8x128xf32>
    %64 = arith.select %61, %59, %63 : vector<8x128xi1>, vector<8x128xf32>
    %65 = vector.extract_strided_slice %6 {offsets = [408, 0], sizes = [128, 128], strides = [1, 1]} : vector<544x128xf32> to vector<128x128xf32>
    %66 = vector.extract_strided_slice %6 {offsets = [536, 0], sizes = [1, 128], strides = [1, 1]} : vector<544x128xf32> to vector<1x128xf32>
    %cst_23 = arith.constant dense<0.000000e+00> : vector<8x128xf32>
    %67 = tpu.matmul %64, %65, %cst_23 {dimension_numbers = #tpu.dot_dimension_numbers<[1], [0], [0], [1], [0, 0, 1, 1], [], []>} : vector<8x128xf32>, vector<128x128xf32>, vector<8x128xf32> -> vector<8x128xf32>
    %68 = vector.broadcast %66 : vector<1x128xf32> to vector<8x128xf32>
    %69 = arith.addf %67, %68 : vector<8x128xf32>
    %c0_24 = arith.constant 0 : index
    %c0_25 = arith.constant 0 : index
    %70 = vector.load %arg4[%c0_24, %c0_25] : memref<8x128xf32, #tpu.memory_space<vmem>>, vector<8x128xf32>
    tpu.vector_store %arg4[%c0_24, %c0_25], %69 {strides = array<i32>} : memref<8x128xf32, #tpu.memory_space<vmem>>, vector<8x128xf32>,
    return
  }
}

</mosaic_0001>

<bundles_post_ra>
// kernel: tpu_custom_call.1
= control target key start
LH: loop header
LB: loop body
LE: loop exit
PB: predicated region body
PF: predicated region fallthrough
CT: control target
= control target key end

     0   :  { %11 = vsyncpa [#allocation3], 0  ;;  %s5758_s0 = inlined_call_operand.hbm [shape: f32[8,128], index: 0, kind: input, shape index: {}]   ;;  %s5759_s1 = inlined_call_operand.hbm [shape: f32[544,128], index: 1, kind: input, shape index: {}]   ;;  %s5760_s2 = inlined_call_operand.hbm [shape: f32[544,128], index: 2, kind: input, shape index: {}]   ;;  %s5761_s3 = inlined_call_operand.hbm [shape: f32[544,128], index: 3, kind: input, shape index: {}]   ;;  %s5762_s4 = inlined_call_operand.hbm [shape: f32[8,128], index: 4, kind: output, shape index: {0}]   ;;  %s5763_s5 = inlined_call_operand.hbm [shape: f32[1], index: 5, kind: output, shape index: {1}]  }
   0x1   :  { %12 = vsyncpa [#allocation7], 0 }
   0x2   :  { %13 = vsyncpa [#allocation10], 0 }
   0x3   :  { %14 = vsyncpa [#allocation4], 0 }
   0x4   :  { %15 = vsyncpa [#allocation5], 0  ;;  %s4065_s18 = smov [#allocation6]   ;;  %s3935_s22 = scalar_lea.hbm %s5759_s1, 8704 }
   0x5   :  { %s31_s19 = sshll.u32 %s4065_s18, 4  ;;  %p3936_p0 = scmp.ne.s32.totalorder %s5759_s1, %s3935_s22  ;;  %s32_s19 = int_to_ptr.vmem [resolvable:$true] %s31_s19 }
   0x6   :  { %p3939_p1 = scmp.lt.u32.totalorder %s3935_s22, %s5759_s1 }
   0x8   :  { %p3941_p2 = pnand %p3939_p1, %p3936_p0 }
   0xa   :  { %3944 = shalt.err (!%p3941_p2)
}
   0xb   :  { %s3945_s27 = scalar_lea.vmem %s32_s19, 8704  ;;  %p3950_p4 = scmp.lt.s32.totalorder %s32_s19, %s32_s19 }
   0xc   :  { %p3946_p3 = scmp.ne.s32.totalorder %s32_s19, %s3945_s27  ;;  %p3951_p5 = scmp.lt.s32.totalorder %s3945_s27, %s3945_s27 }
   0xe   :  { %p3952_p6 = por %p3951_p5, %p3950_p4 }
  0x10   :  { %p3953_p7 = pnand %p3952_p6, %p3946_p3 }
  0x12   :  { %3956 = shalt.err (!%p3953_p7)
}
  0x13   :  { %s4066_s28 = smov 128   ;;  %s4067_s29 = smov 8  }
  0x14   :  { %37 = dma.hbm_to_vmem [thread:$0]  %s5759_s1, 8704, %s32_s19, [#allocation7], %s4066_s28, %s4066_s28, %s4067_s29  }
  0x15   :  { %s4068_s7 = smov [#allocation2]   ;;  %s4069_s9 = smov [#allocation8]  }
  0x16   :  { %s22_s8 = sshll.u32 %s4068_s7, 4  ;;  %s43_s10 = sshll.u32 %s4069_s9, 4  ;;  %s23_s8 = int_to_ptr.vmem [resolvable:$true] %s22_s8  ;;  %s44_s10 = int_to_ptr.vmem [resolvable:$true] %s43_s10 }
  0x17   :  { %s3957_s13 = scalar_lea.hbm %s5758_s0, 128 }
  0x18   :  { %p3958_p8 = scmp.ne.s32.totalorder %s5758_s0, %s3957_s13  ;;  %p3961_p9 = scmp.lt.u32.totalorder %s3957_s13, %s5758_s0 }
  0x1a   :  { %p3963_p10 = pnand %p3961_p9, %p3958_p8 }
  0x1c   :  { %3966 = shalt.err (!%p3963_p10)
}
  0x1d   :  { %s3967_s1 = scalar_lea.vmem %s23_s8, 128  ;;  %p3972_p12 = scmp.lt.s32.totalorder %s23_s8, %s23_s8 }
  0x1e   :  { %p3968_p11 = scmp.ne.s32.totalorder %s23_s8, %s3967_s1  ;;  %p3973_p13 = scmp.lt.s32.totalorder %s3967_s1, %s3967_s1 }
  0x20   :  { %p3974_p0 = por %p3973_p13, %p3972_p12 }
  0x22   :  { %p3975_p1 = pnand %p3974_p0, %p3968_p11 }
  0x24   :  { %3978 = shalt.err (!%p3975_p1)
}
  0x25   :  { %25 = dma.hbm_to_vmem [thread:$0]  %s5758_s0, 128, %s23_s8, [#allocation3]  }
  0x26   :  { %s3979_s22 = scalar_lea.hbm %s5760_s2, 8704 }
  0x27   :  { %p3980_p2 = scmp.ne.s32.totalorder %s5760_s2, %s3979_s22  ;;  %p3983_p3 = scmp.lt.u32.totalorder %s3979_s22, %s5760_s2 }
  0x29   :  { %p3985_p4 = pnand %p3983_p3, %p3980_p2 }
  0x2b   :  { %3988 = shalt.err (!%p3985_p4)
}
  0x2c   :  { %s3989_s27 = scalar_lea.vmem %s44_s10, 8704  ;;  %p3994_p6 = scmp.lt.s32.totalorder %s44_s10, %s44_s10 }
  0x2d   :  { %p3990_p5 = scmp.ne.s32.totalorder %s44_s10, %s3989_s27  ;;  %p3995_p7 = scmp.lt.s32.totalorder %s3989_s27, %s3989_s27 }
  0x2f   :  { %p3996_p8 = por %p3995_p7, %p3994_p6 }
  0x31   :  { %p3997_p9 = pnand %p3996_p8, %p3990_p5 }
  0x33   :  { %4000 = shalt.err (!%p3997_p9)
}
  0x34   :  { %49 = dma.hbm_to_vmem [thread:$0]  %s5760_s2, 8704, %s44_s10, [#allocation7], %s4066_s28, %s4066_s28, %s4067_s29  }
  0x35   :  { %s4070_s6 = smov [#allocation9]   ;;  %s4001_s11 = scalar_lea.hbm %s5761_s3, 8704 }
  0x36   :  { %s55_s7 = sshll.u32 %s4070_s6, 4  ;;  %p4002_p10 = scmp.ne.s32.totalorder %s5761_s3, %s4001_s11  ;;  %s56_s7 = int_to_ptr.vmem [resolvable:$true] %s55_s7 }
  0x37   :  { %p4005_p11 = scmp.lt.u32.totalorder %s4001_s11, %s5761_s3 }
  0x39   :  { %p4007_p12 = pnand %p4005_p11, %p4002_p10 }
  0x3b   :  { %4010 = shalt.err (!%p4007_p12)
}
  0x3c   :  { %s4011_s16 = scalar_lea.vmem %s56_s7, 8704  ;;  %p4016_p0 = scmp.lt.s32.totalorder %s56_s7, %s56_s7 }
  0x3d   :  { %p4012_p13 = scmp.ne.s32.totalorder %s56_s7, %s4011_s16  ;;  %p4017_p1 = scmp.lt.s32.totalorder %s4011_s16, %s4011_s16 }
  0x3f   :  { %p4018_p2 = por %p4017_p1, %p4016_p0 }
  0x41   :  { %p4019_p3 = pnand %p4018_p2, %p4012_p13 }
  0x43   :  { %4022 = shalt.err (!%p4019_p3)
}
  0x44   :  { %61 = dma.hbm_to_vmem [thread:$0]  %s5761_s3, 8704, %s56_s7, [#allocation10], %s4066_s28, %s4066_s28, %s4067_s29  }
  0x45   :  { %4055 = dma.done.wait [#allocation3], 128  }
  0x46   :  { %4056 = vsyncadd [#allocation3], 4294967168 }
  0x47   :  { %4057 = dma.done.wait [#allocation7], 17408  }
  0x48   :  { %4058 = vsyncadd [#allocation7], 4294949888 }
  0x49   :  { %4059 = dma.done.wait [#allocation10], 8704  }
  0x4a   :  { %4060 = vsyncadd [#allocation10], 4294958592  ;;  %v4071_v0 = vmov 0.0|0.0   ;;  %v142_v1 = vld [vmem:[#allocation8] sm:$0xff]  ;;  %v143_v2 = vld [vmem:[#allocation8 + $0x8] sm:$0xff]  ;;  %vm4072_vm14 = vmmov 0  }
  0x4b   :  { %3010 = vmatprep.subr.bf16.mxu0 %v4071_v0  ;;  %3034 = vmatprep.subr.bf16.mxu1 %v4071_v0  ;;  %v278_v3 = vmul.f32 1.442695, %v142_v1  ;;  %v280_v4 = vmul.f32 1.442695, %v143_v2  ;;  %v144_v5 = vld [vmem:[#allocation8 + $0x10] sm:$0xff]  ;;  %v145_v6 = vld [vmem:[#allocation8 + $0x18] sm:$0xff] }
  0x4c   :  { %v282_v7 = vmul.f32 1.442695, %v144_v5  ;;  %v4165_v8 = vld [vmem:[#allocation9] sm:$0xff]  ;;  %v4167_v9 = vld [vmem:[#allocation9 + $0x8] sm:$0xff]  ;;  %v284_v10 = vmul.f32 1.442695, %v145_v6 }
  0x4d   :  { %3119 = vpow2.f32 %v278_v3  ;;  %v4169_v11 = vld [vmem:[#allocation9 + $0x10] sm:$0xff]  ;;  %v146_v12 = vld [vmem:[#allocation8 + $0x20] sm:$0xff]  ;;  %v147_v13 = vld [vmem:[#allocation8 + $0x28] sm:$0xff]  ;;  %v1162_v14 = vmul.f32 %v4165_v8, %v4165_v8  ;;  %v1163_v19 = vmul.f32 %v4167_v9, %v4167_v9  ;;  %s4023_s17 = scalar_lea.hbm %s5763_s5, 16 }
  0x4e   :  { %3121 = vpow2.f32 %v280_v4  ;;  %v4173_v15 = vld [vmem:[#allocation9 + $0x18] sm:$0xff]  ;;  %v4175_v16 = vld [vmem:[#allocation9 + $0x20] sm:$0xff]  ;;  %v286_v17 = vmul.f32 1.442695, %v146_v12  ;;  %v288_v18 = vmul.f32 1.442695, %v147_v13  ;;  %v1164_v20 = vmul.f32 %v4169_v11, %v4169_v11  ;;  %p4024_p4 = scmp.ne.s32.totalorder %s5763_s5, %s4023_s17  ;;  %p4027_p5 = scmp.lt.u32.totalorder %s4023_s17, %s5763_s5 }
  0x4f   :  { %3123 = vpow2.f32 %v282_v7  ;;  %v1165_v21 = vmul.f32 %v4173_v15, %v4173_v15  ;;  %v4183_v22 = vld [vmem:[#allocation9 + $0x28] sm:$0xff]  ;;  %v148_v23 = vld [vmem:[#allocation8 + $0x30] sm:$0xff]  ;;  %v149_v24 = vld [vmem:[#allocation8 + $0x38] sm:$0xff]  ;;  %v1166_v25 = vmul.f32 %v4175_v16, %v4175_v16  ;;  %v4193_v33 = vmul.f32 -0.5, %v1162_v14 }
  0x50   :  { %3125 = vpow2.f32 %v284_v10  ;;  %v1167_v26 = vmul.f32 %v4183_v22, %v4183_v22  ;;  %v4189_v27 = vld [vmem:[#allocation9 + $0x30] sm:$0xff]  ;;  %v290_v28 = vmul.f32 1.442695, %v148_v23  ;;  %v292_v29 = vmul.f32 1.442695, %v149_v24  ;;  %v150_v31 = vld [vmem:[#allocation8 + $0x40] sm:$0xff]  ;;  %p4029_p6 = pnand %p4027_p5, %p4024_p4 }
  0x51   :  { %3127 = vpow2.f32 %v286_v17  ;;  %v1168_v30 = vmul.f32 %v4189_v27, %v4189_v27  ;;  %v151_v32 = vld [vmem:[#allocation8 + $0x48] sm:$0xff]  ;;  %v294_v34 = vmul.f32 1.442695, %v150_v31  ;;  %v4195_v36 = vmul.f32 -0.5, %v1163_v19  ;;  %v152_v39 = vld [vmem:[#allocation8 + $0x50] sm:$0xff]  ;;  %v4205_v42 = vld [vmem:[#allocation9 + $0x38] sm:$0xff] }
  0x52   :  { %3129 = vpow2.f32 %v288_v18  ;;  %v296_v35 = vmul.f32 1.442695, %v151_v32  ;;  %v4197_v37 = vmul.f32 -0.5, %v1164_v20  ;;  %v4199_v38 = vmul.f32 -0.5, %v1165_v21  ;;  %v153_v43 = vld [vmem:[#allocation8 + $0x58] sm:$0xff]  ;;  %v4211_v57 = vld [vmem:[#allocation9 + $0x40] sm:$0xff] }
  0x53   :  { %3131 = vpow2.f32 %v290_v28  ;;  %v4201_v40 = vmul.f32 -0.5, %v1166_v25  ;;  %v4203_v41 = vmul.f32 -0.5, %v1167_v26  ;;  %v298_v44 = vmul.f32 1.442695, %v152_v39  ;;  %v76_v3 = vld [vmem:[#allocation6 + $0x10] sm:$0xff] }
  0x54   :  { %3133 = vpow2.f32 %v292_v29  ;;  %v1169_v46 = vmul.f32 %v4205_v42, %v4205_v42  ;;  %v4209_v47 = vmul.f32 -0.5, %v1168_v30  ;;  %v300_v48 = vmul.f32 1.442695, %v153_v43 }
  0x55   :  { %3135 = vpow2.f32 %v294_v34  ;;  %v4215_v61 = vmul.f32 %v4211_v57, %v4211_v57 }
  0x56   :  { %3137 = vpow2.f32 %v296_v35  ;;  %v4217_v1 = vmul.f32 -0.5, %v1169_v46 }
  0x57   :  { %v3120_v45 = vpop.eup %3119  ;;  %3139 = vpow2.f32 %v298_v44 }
  0x58   :  { %v3122_v49 = vpop.eup %3121  ;;  %v414_v50 = vadd.f32 1.0, %v3120_v45  ;;  %v417_v51 = vmul.f32 -0.5, %v3120_v45  ;;  %v420_v52 = vand.u32 2147483647, %v3120_v45  ;;  %3141 = vpow2.f32 %v300_v48 }
  0x59   :  { %v3124_v53 = vpop.eup %3123  ;;  %v423_v54 = vadd.f32 1.0, %v3122_v49  ;;  %v426_v55 = vmul.f32 -0.5, %v3122_v49  ;;  %v429_v56 = vand.u32 2147483647, %v3122_v49 }
  0x5a   :  { %v3126_v58 = vpop.eup %3125  ;;  %3143 = vlog2.f32 %v414_v50  ;;  %v418_v59 = vadd.f32 1.0, %v417_v51  ;;  %v432_v60 = vadd.f32 1.0, %v3124_v53  ;;  %v435_v63 = vmul.f32 -0.5, %v3124_v53 }
  0x5b   :  { %3145 = vlog2.f32 %v423_v54  ;;  %v427_v62 = vadd.f32 1.0, %v426_v55  ;;  %v3128_v2 = vpop.eup %3127  ;;  %vm4219_vm0 = vcmp.lt.f32.partialorder %v420_v52, 0.0004427343  ;;  %v438_v4 = vand.u32 2147483647, %v3124_v53 }
  0x5c   :  { %3147 = vlog2.f32 %v432_v60  ;;  %v441_v5 = vadd.f32 1.0, %v3126_v58  ;;  %v3130_v6 = vpop.eup %3129  ;;  %vm4223_vm1 = vcmp.lt.f32.partialorder %v429_v56, 0.0004427343  ;;  %v436_v10 = vadd.f32 1.0, %v435_v63 }
  0x5d   :  { %v444_v12 = vmul.f32 -0.5, %v3126_v58  ;;  %v447_v13 = vand.u32 2147483647, %v3126_v58  ;;  %v4227_v14 = vpop.eup %3131  ;;  %v419_v17 = vmul.f32 %v3120_v45, %v418_v59  ;;  %v450_v18 = vadd.f32 1.0, %v3128_v2 }
  0x5e   :  { %3149 = vlog2.f32 %v441_v5  ;;  %v453_v19 = vmul.f32 -0.5, %v3128_v2  ;;  %v4229_v20 = vpop.eup %3133  ;;  %v428_v21 = vmul.f32 %v3122_v49, %v427_v62  ;;  %vm4231_vm2 = vcmp.lt.f32.partialorder %v438_v4, 0.0004427343 }
  0x5f   :  { %v445_v24 = vadd.f32 1.0, %v444_v12  ;;  %v456_v25 = vand.u32 2147483647, %v3128_v2  ;;  %v4235_v26 = vpop.eup %3135  ;;  %3151 = vlog2.f32 %v450_v18  ;;  %v459_v29 = vadd.f32 1.0, %v3130_v6  ;;  %v74_v12 = vld [vmem:[#allocation6] sm:$0xff] }
  0x60   :  { %v454_v28 = vadd.f32 1.0, %v453_v19  ;;  %v462_v30 = vmul.f32 -0.5, %v3130_v6  ;;  %v4237_v31 = vpop.eup %3137  ;;  %v437_v32 = vmul.f32 %v3124_v53, %v436_v10  ;;  %vm4239_vm3 = vcmp.lt.f32.partialorder %v447_v13, 0.0004427343  ;;  %v78_v53 = vld [vmem:[#allocation6 + $0x20] sm:$0xff] }
  0x61   :  { %v465_v35 = vand.u32 2147483647, %v3130_v6  ;;  %v468_v39 = vadd.f32 1.0, %v4227_v14  ;;  %v4244_v43 = vpop.eup %3139  ;;  %v446_v44 = vmul.f32 %v3126_v58, %v445_v24  ;;  %3153 = vlog2.f32 %v459_v29  ;;  %v75_v24 = vld [vmem:[#allocation6 + $0x8] sm:$0xff] }
  0x62   :  { %v463_v45 = vadd.f32 1.0, %v462_v30  ;;  %v471_v46 = vmul.f32 -0.5, %v4227_v14  ;;  %v4247_v48 = vpop.eup %3141  ;;  %v455_v49 = vmul.f32 %v3128_v2, %v454_v28  ;;  %vm4249_vm4 = vcmp.lt.f32.partialorder %v456_v25, 0.0004427343 }
  0x63   :  { %3155 = vlog2.f32 %v468_v39  ;;  %v477_v51 = vadd.f32 1.0, %v4229_v20  ;;  %vm4254_vm5 = vcmp.lt.f32.partialorder %v465_v35, 0.0004427343  ;;  %v474_v55 = vand.u32 2147483647, %v4227_v14 }
  0x64   :  { %v3144_v52 = vpop.eup %3143  ;;  %v472_v54 = vadd.f32 1.0, %v471_v46  ;;  %v480_v56 = vmul.f32 -0.5, %v4229_v20  ;;  %v464_v60 = vmul.f32 %v3130_v6, %v463_v45  ;;  %v483_v62 = vand.u32 2147483647, %v4229_v20 }
  0x65   :  { %v3146_v58 = vpop.eup %3145  ;;  %v416_v59 = vmul.f32 0.6931472, %v3144_v52  ;;  %v486_v63 = vadd.f32 1.0, %v4235_v26  ;;  %3157 = vlog2.f32 %v477_v51  ;;  %v489_v19 = vmul.f32 -0.5, %v4235_v26 }
  0x66   :  { %v3148_v2 = vpop.eup %3147  ;;  %v425_v4 = vmul.f32 0.6931472, %v3146_v58  ;;  %v4263_v5 = vmul.f32 %v4227_v14, %v472_v54  ;;  %v481_v10 = vadd.f32 1.0, %v480_v56  ;;  %vm4286_vm6 = vcmp.lt.f32.partialorder %v474_v55, 0.0004427343 }
  0x67   :  { %v422_v13 = vsel %vm4219_vm0, %v419_v17, %v416_v59  ;;  %v434_v18 = vmul.f32 0.6931472, %v3148_v2  ;;  %3159 = vlog2.f32 %v486_v63  ;;  %v4278_v7 = vadd.f32 1.0, %v489_v19 }
  0x68   :  { %v3150_v6 = vpop.eup %3149  ;;  %v431_v25 = vsel %vm4223_vm1, %v428_v21, %v425_v4  ;;  %v1026_v28 = vmul.f32 %v422_v13, %v4165_v8  ;;  %3161 = vlog2.f32 %v422_v13  ;;  %v4272_v14 = vmul.f32 %v4229_v20, %v481_v10  ;;  %v77_v21 = vld [vmem:[#allocation6 + $0x18] sm:$0xff] }
  0x69   :  { %v1027_v29 = vmul.f32 %v431_v25, %v4167_v9  ;;  %3163 = vlog2.f32 %v431_v25  ;;  %v440_v17 = vsel %vm4231_vm2, %v437_v32, %v434_v18  ;;  %v443_v30 = vmul.f32 0.6931472, %v3150_v6  ;;  %v3152_v35 = vpop.eup %3151 }
  0x6a   :  { %v1094_v39 = vadd.f32 %v1026_v28, %v74_v12  ;;  %v1028_v45 = vmul.f32 %v440_v17, %v4169_v11  ;;  %3165 = vlog2.f32 %v440_v17  ;;  %v452_v46 = vmul.f32 0.6931472, %v3152_v35  ;;  %v79_v17 = vld [vmem:[#allocation6 + $0x28] sm:$0xff] }
  0x6b   :  { %v1095_v8 = vadd.f32 %v1027_v29, %v75_v24  ;;  %v449_v20 = vsel %vm4239_vm3, %v446_v44, %v443_v30  ;;  %v492_v9 = vand.u32 2147483647, %v4235_v26  ;;  %v3154_v51 = vpop.eup %3153  ;;  %vm4293_vm7 = vcmp.lt.f32.partialorder %v483_v62, 0.0004427343 }
  0x6c   :  { %v1502_v52 = vmul.f32 %v1094_v39, %v1094_v39  ;;  %v1029_v23 = vmul.f32 %v449_v20, %v4173_v15  ;;  %v1096_v32 = vadd.f32 %v1028_v45, %v76_v3  ;;  %3167 = vlog2.f32 %v449_v20 }
  0x6d   :  { %v3156_v54 = vpop.eup %3155  ;;  %v1503_v56 = vmul.f32 %v1095_v8, %v1095_v8  ;;  %v3011_v11 = vpack.c.bf16 %v1095_v8, %v1094_v39  ;;  %v458_v58 = vsel %vm4249_vm4, %v455_v49, %v452_v46  ;;  %v461_v59 = vmul.f32 0.6931472, %v3154_v51 }
  0x6e   :  { %v1570_v34 = vmul.f32 -0.5, %v1502_v52  ;;  %v1097_v44 = vadd.f32 %v1029_v23, %v77_v21  ;;  %v1504_v2 = vmul.f32 %v1096_v32, %v1096_v32  ;;  %v1030_v4 = vmul.f32 %v458_v58, %v4175_v16 }
  0x6f   :  { %v1571_v10 = vmul.f32 -0.5, %v1503_v56  ;;  %3012 = vmatpush3.bf16.msra.mxu0 %v3011_v11  ;;  %v467_v15 = vsel %vm4254_vm5, %v464_v60, %v461_v59  ;;  %3169 = vlog2.f32 %v458_v58  ;;  %v470_v12 = vmul.f32 0.6931472, %v3156_v54  ;;  %v3158_v49 = vpop.eup %3157 }
  0x70   :  { %v1638_v55 = vmul.f32 1.442695, %v1570_v34  ;;  %v1843_v13 = vmul.f32 250000.0, %v1570_v34  ;;  %3013 = vmatprep.subr.bf16.mxu0 %v4071_v0  ;;  %v1505_v18 = vmul.f32 %v1097_v44, %v1097_v44  ;;  %v1572_v19 = vmul.f32 -0.5, %v1504_v2 }
  0x71   :  { %v4298_v6 = vpop.eup %3159  ;;  %v1640_v16 = vmul.f32 1.442695, %v1571_v10  ;;  %v1844_v24 = vmul.f32 250000.0, %v1571_v10  ;;  %v3014_v25 = vpack.c.bf16 %v1097_v44, %v1096_v32  ;;  %v1031_v60 = vmul.f32 %v467_v15, %v4183_v22 }
  0x72   :  { %v3162_v28 = vpop.eup %3161  ;;  %3171 = vpow2.f32 %v1638_v55  ;;  %v1911_v62 = vmul.f32 1.442695, %v1843_v13  ;;  %v1573_v29 = vmul.f32 -0.5, %v1505_v18  ;;  %v1642_v3 = vmul.f32 1.442695, %v1572_v19 }
  0x73   :  { %v3164_v30 = vpop.eup %3163  ;;  %v4301_v35 = vmul.f32 0.6931472, %v3162_v28  ;;  %3173 = vpow2.f32 %v1640_v16  ;;  %v1913_v39 = vmul.f32 1.442695, %v1844_v24  ;;  %v1845_v45 = vmul.f32 250000.0, %v1572_v19  ;;  %3015 = vmatpush3.bf16.msra.mxu0 %v3014_v25 }
  0x74   :  { %v3166_v8 = vpop.eup %3165  ;;  %v4303_v21 = vmul.f32 0.6931472, %v3164_v30  ;;  %3175 = vpow2.f32 %v1911_v62  ;;  %v1644_v20 = vmul.f32 1.442695, %v1573_v29  ;;  %v1846_v46 = vmul.f32 250000.0, %v1573_v29  ;;  %3016 = vmatprep.subr.bf16.mxu0 %v4071_v0 }
  0x75   :  { %v1434_v22 = vsub.f32 %v4193_v33, %v4301_v35  ;;  %3177 = vpow2.f32 %v1913_v39  ;;  %v4308_v51 = vmul.f32 0.6931472, %v3166_v8  ;;  %v1915_v52 = vmul.f32 1.442695, %v1845_v45  ;;  %v80_v16 = vld [vmem:[#allocation6 + $0x30] sm:$0xff] }
  0x76   :  { %v3168_v23 = vpop.eup %3167  ;;  %v1435_v32 = vsub.f32 %v4195_v36, %v4303_v21  ;;  %3179 = vpow2.f32 %v1642_v3  ;;  %v1917_v54 = vmul.f32 1.442695, %v1846_v46  ;;  %v1098_v56 = vadd.f32 %v1030_v4, %v78_v53 }
  0x77   :  { %v4312_v11 = vmul.f32 0.6931472, %v3168_v23  ;;  %v1436_v58 = vsub.f32 %v4197_v37, %v4308_v51  ;;  %3181 = vpow2.f32 %v1644_v20  ;;  %v1099_v59 = vadd.f32 %v1031_v60, %v79_v17 }
  0x78   :  { %3183 = vpow2.f32 %v1915_v52  ;;  %v1506_v34 = vmul.f32 %v1098_v56, %v1098_v56  ;;  %v476_v44 = vsel %vm4286_vm6, %v4263_v5, %v470_v12  ;;  %v479_v2 = vmul.f32 0.6931472, %v3158_v49  ;;  %v81_v5 = vld [vmem:[#allocation6 + $0x38] sm:$0xff] }
  0x79   :  { %v3170_v10 = vpop.eup %3169  ;;  %v1437_v55 = vsub.f32 %v4199_v38, %v4312_v11  ;;  %3185 = vpow2.f32 %v1917_v54  ;;  %v1507_v4 = vmul.f32 %v1099_v59, %v1099_v59  ;;  %v3017_v13 = vpack.c.bf16 %v1099_v59, %v1098_v56  ;;  %v83_v11 = vld [vmem:[#allocation6 + $0x48] sm:$0xff] }
  0x7a   :  { %v4321_v18 = vmul.f32 0.6931472, %v3170_v10  ;;  %3187 = vlog2.f32 %v467_v15  ;;  %v1574_v19 = vmul.f32 -0.5, %v1506_v34  ;;  %v485_v24 = vsel %vm4293_vm7, %v4272_v14, %v479_v2 }
  0x7b   :  { %v1575_v25 = vmul.f32 -0.5, %v1507_v4  ;;  %3018 = vmatpush3.bf16.msra.mxu0 %v3017_v13  ;;  %v1032_v63 = vmul.f32 %v476_v44, %v4189_v27  ;;  %v1033_v12 = vmul.f32 %v485_v24, %v4205_v42  ;;  %3189 = vlog2.f32 %v476_v44 }
  0x7c   :  { %v3172_v49 = vpop.eup %3171  ;;  %v1438_v53 = vsub.f32 %v4201_v40, %v4321_v18  ;;  %v1646_v60 = vmul.f32 1.442695, %v1574_v19  ;;  %v1847_v15 = vmul.f32 250000.0, %v1574_v19  ;;  %3019 = vmatprep.subr.bf16.mxu0 %v4071_v0  ;;  %3191 = vlog2.f32 %v485_v24 }
  0x7d   :  { %v3174_v28 = vpop.eup %3173  ;;  %v1774_v50 = vmul.f32 0.5, %v3172_v49  ;;  %v1648_v14 = vmul.f32 1.442695, %v1575_v25  ;;  %v1848_v62 = vmul.f32 250000.0, %v1575_v25  ;;  %v1100_v29 = vadd.f32 %v1032_v63, %v80_v16 }
  0x7e   :  { %v3176_v3 = vpop.eup %3175  ;;  %v1775_v17 = vmul.f32 0.5, %v3174_v28  ;;  %3193 = vpow2.f32 %v1646_v60  ;;  %v1919_v27 = vmul.f32 1.442695, %v1847_v15  ;;  %v1101_v42 = vadd.f32 %v1033_v12, %v81_v5 }
  0x7f   :  { %v3178_v30 = vpop.eup %3177  ;;  %v2047_v39 = vmul.f32 0.5, %v3176_v3  ;;  %3195 = vpow2.f32 %v1648_v14  ;;  %v1921_v45 = vmul.f32 1.442695, %v1848_v62  ;;  %v1508_v8 = vmul.f32 %v1100_v29, %v1100_v29 }
  0x80   :  { %v3180_v20 = vpop.eup %3179  ;;  %v2048_v46 = vmul.f32 0.5, %v3178_v30  ;;  %3197 = vpow2.f32 %v1919_v27  ;;  %v1509_v52 = vmul.f32 %v1101_v42, %v1101_v42  ;;  %v3020_v23 = vpack.c.bf16 %v1101_v42, %v1100_v29 }
  0x81   :  { %v3182_v54 = vpop.eup %3181  ;;  %v2115_v56 = vadd.f32 %v2047_v39, %v1774_v50  ;;  %v1776_v59 = vmul.f32 0.5, %v3180_v20  ;;  %3199 = vpow2.f32 %v1921_v45  ;;  %v1576_v34 = vmul.f32 -0.5, %v1508_v8 }
  0x82   :  { %v3184_v44 = vpop.eup %3183  ;;  %v2116_v2 = vadd.f32 %v2048_v46, %v1775_v17  ;;  %v1777_v10 = vmul.f32 0.5, %v3182_v54  ;;  %v1577_v4 = vmul.f32 -0.5, %v1509_v52  ;;  %3021 = vmatpush3.bf16.msra.mxu0 %v3020_v23  ;;  %v488_v13 = vmul.f32 0.6931472, %v4298_v6 }
  0x83   :  { %v3186_v19 = vpop.eup %3185  ;;  %3201 = vlog2.f32 %v2115_v56  ;;  %v2049_v16 = vmul.f32 0.5, %v3184_v44  ;;  %v1650_v24 = vmul.f32 1.442695, %v1576_v34  ;;  %v1849_v25 = vmul.f32 250000.0, %v1576_v34  ;;  %3022 = vmatprep.subr.bf16.mxu0 %v4071_v0 }
  0x84   :  { %v3188_v5 = vpop.eup %3187  ;;  %3203 = vlog2.f32 %v2116_v2  ;;  %v2050_v63 = vmul.f32 0.5, %v3186_v19  ;;  %v1652_v12 = vmul.f32 1.442695, %v1577_v4  ;;  %v1850_v49 = vmul.f32 250000.0, %v1577_v4 }
  0x85   :  { %v3190_v60 = vpop.eup %3189  ;;  %v2117_v15 = vadd.f32 %v2049_v16, %v1776_v59  ;;  %v4333_v28 = vmul.f32 0.6931472, %v3188_v5  ;;  %3205 = vpow2.f32 %v1650_v24  ;;  %v1923_v50 = vmul.f32 1.442695, %v1849_v25 }
  0x86   :  { %v3192_v14 = vpop.eup %3191  ;;  %v2118_v6 = vadd.f32 %v2050_v63, %v1777_v10  ;;  %v4335_v62 = vmul.f32 0.6931472, %v3190_v60  ;;  %3207 = vpow2.f32 %v1652_v12  ;;  %v1925_v29 = vmul.f32 1.442695, %v1850_v49 }
  0x87   :  { %3209 = vlog2.f32 %v2117_v15  ;;  %v1439_v3 = vsub.f32 %v4203_v41, %v4333_v28  ;;  %v4339_v17 = vmul.f32 0.6931472, %v3192_v14  ;;  %v491_v27 = vmul.f32 %v4235_v26, %v4278_v7  ;;  %v82_v7 = vld [vmem:[#allocation6 + $0x40] sm:$0xff] }
  0x88   :  { %v3194_v42 = vpop.eup %3193  ;;  %3211 = vlog2.f32 %v2118_v6  ;;  %v1440_v30 = vsub.f32 %v4209_v47, %v4335_v62  ;;  %vm493_vm8 = vcmp.lt.f32.partialorder %v492_v9, 0.0004427343  ;;  %v495_v39 = vadd.f32 1.0, %v4237_v31  ;;  %v157_v62 = vld [vmem:[#allocation8 + $0x78] sm:$0xff] }
  0x89   :  { %v3196_v45 = vpop.eup %3195  ;;  %v1778_v8 = vmul.f32 0.5, %v3194_v42  ;;  %v1441_v20 = vsub.f32 %v4217_v1, %v4339_v17  ;;  %3213 = vpow2.f32 %v1923_v50  ;;  %v494_v46 = vsel %vm493_vm8, %v491_v27, %v488_v13 }
  0x8a   :  { %v3198_v52 = vpop.eup %3197  ;;  %v1779_v23 = vmul.f32 0.5, %v3196_v45  ;;  %3215 = vpow2.f32 %v1925_v29  ;;  %v498_v54 = vmul.f32 -0.5, %v4237_v31  ;;  %v501_v56 = vand.u32 2147483647, %v4237_v31 }
  0x8b   :  { %v3200_v59 = vpop.eup %3199  ;;  %v2051_v26 = vmul.f32 0.5, %v3198_v52  ;;  %3217 = vlog2.f32 %v495_v39  ;;  %v1034_v9 = vmul.f32 %v494_v46, %v4211_v57  ;;  %v504_v34 = vadd.f32 1.0, %v4244_v43 }
  0x8c   :  { %v2052_v44 = vmul.f32 0.5, %v3200_v59  ;;  %v499_v2 = vadd.f32 1.0, %v498_v54  ;;  %3219 = vlog2.f32 %v494_v46  ;;  %v507_v19 = vmul.f32 -0.5, %v4244_v43 }
  0x8d   :  { %v3202_v10 = vpop.eup %3201  ;;  %v2119_v4 = vadd.f32 %v2051_v26, %v1778_v8  ;;  %v4354_v13 = vadd.f32 %v1034_v9, %v82_v7  ;;  %3221 = vlog2.f32 %v504_v34  ;;  %vm4357_vm9 = vcmp.lt.f32.partialorder %v501_v56, 0.0004427343 }
  0x8e   :  { %v3204_v16 = vpop.eup %3203  ;;  %v2184_v24 = vmul.f32 0.6931472, %v3202_v10  ;;  %v2120_v25 = vadd.f32 %v2052_v44, %v1779_v23  ;;  %v4362_v57 = vmul.f32 -0.5, %v4215_v61  ;;  %v508_v60 = vadd.f32 1.0, %v507_v19 }
  0x8f   :  { %v3206_v63 = vpop.eup %3205  ;;  %v2186_v12 = vmul.f32 0.6931472, %v3204_v16  ;;  %3223 = vlog2.f32 %v2119_v4  ;;  %v1510_v49 = vmul.f32 %v4354_v13, %v4354_v13  ;;  %v500_v14 = vmul.f32 %v4237_v31, %v499_v2  ;;  %v219_v2 = vld [vmem:[#allocation9 + $0x48] sm:$0xff]  ;;  %v220_v16 = vld [vmem:[#allocation9 + $0x50] sm:$0xff] }
  0x90   :  { %v3208_v15 = vpop.eup %3207  ;;  %v2319_v50 = vsub.f32 %v1434_v22, %v2184_v24  ;;  %3225 = vlog2.f32 %v2120_v25  ;;  %v510_v6 = vand.u32 2147483647, %v4244_v43  ;;  %v1780_v27 = vmul.f32 0.5, %v3206_v63 }
  0x91   :  { %v3210_v29 = vpop.eup %3209  ;;  %v2320_v61 = vsub.f32 %v1435_v32, %v2186_v12  ;;  %v1781_v42 = vmul.f32 0.5, %v3208_v15  ;;  %v1578_v39 = vmul.f32 -0.5, %v1510_v49  ;;  %v509_v46 = vmul.f32 %v4244_v43, %v508_v60  ;;  %v154_v60 = vld [vmem:[#allocation8 + $0x60] sm:$0xff] }
  0x92   :  { %v3212_v45 = vpop.eup %3211  ;;  %v2188_v8 = vmul.f32 0.6931472, %v3210_v29  ;;  %v513_v33 = vadd.f32 1.0, %v4247_v48  ;;  %v516_v35 = vmul.f32 -0.5, %v4247_v48  ;;  %v519_v32 = vand.u32 2147483647, %v4247_v48 }
  0x93   :  { %v3214_v22 = vpop.eup %3213  ;;  %v2387_v31 = vadd.f32 %v2320_v61, %v2319_v50  ;;  %v2190_v52 = vmul.f32 0.6931472, %v3212_v45  ;;  %v1654_v23 = vmul.f32 1.442695, %v1578_v39  ;;  %v1851_v7 = vmul.f32 250000.0, %v1578_v39 }
  0x94   :  { %v3216_v54 = vpop.eup %3215  ;;  %v2321_v36 = vsub.f32 %v1436_v58, %v2188_v8  ;;  %v2053_v21 = vmul.f32 0.5, %v3214_v22  ;;  %3227 = vlog2.f32 %v513_v33  ;;  %v517_v4 = vadd.f32 1.0, %v516_v35  ;;  %v155_v39 = vld [vmem:[#allocation8 + $0x68] sm:$0xff]  ;;  %v221_v22 = vld [vmem:[#allocation9 + $0x58] sm:$0xff] }
  0x95   :  { %v3218_v56 = vpop.eup %3217  ;;  %v2322_v43 = vsub.f32 %v1437_v55, %v2190_v52  ;;  %v2054_v59 = vmul.f32 0.5, %v3216_v54  ;;  %3229 = vpow2.f32 %v1654_v23  ;;  %v1927_v26 = vmul.f32 1.442695, %v1851_v7 }
  0x96   :  { %v3220_v9 = vpop.eup %3219  ;;  %v2388_v34 = vadd.f32 %v2387_v31, %v2321_v36  ;;  %v2121_v44 = vadd.f32 %v2053_v21, %v1780_v27  ;;  %v497_v10 = vmul.f32 0.6931472, %v3218_v56  ;;  %vm4386_vm10 = vcmp.lt.f32.partialorder %v510_v6, 0.0004427343  ;;  %v84_v6 = vld [vmem:[#allocation6 + $0x50] sm:$0xff] }
  0x97   :  { %v3222_v37 = vpop.eup %3221  ;;  %v2122_v51 = vadd.f32 %v2054_v59, %v1781_v42  ;;  %v4384_v58 = vmul.f32 0.6931472, %v3220_v9  ;;  %3231 = vpow2.f32 %v1927_v26  ;;  %v1171_v12 = vmul.f32 %v219_v2, %v219_v2 }
  0x98   :  { %v2389_v38 = vadd.f32 %v2388_v34, %v2322_v43  ;;  %3233 = vlog2.f32 %v2121_v44  ;;  %v503_v55 = vsel %vm4357_vm9, %v500_v14, %v497_v10  ;;  %v506_v24 = vmul.f32 0.6931472, %v3222_v37  ;;  %v85_v43 = vld [vmem:[#allocation6 + $0x58] sm:$0xff]  ;;  %v156_v10 = vld [vmem:[#allocation8 + $0x70] sm:$0xff] }
  0x99   :  { %v3224_v25 = vpop.eup %3223  ;;  %3235 = vlog2.f32 %v2122_v51  ;;  %v1035_v63 = vmul.f32 %v503_v55, %v219_v2  ;;  %v1442_v49 = vsub.f32 %v4362_v57, %v4384_v58  ;;  %v518_v61 = vmul.f32 %v4247_v48, %v517_v4  ;;  %v4487_v57 = vld [vmem:[#allocation9 + $0x90] sm:$0xff] }
  0x9a   :  { %v3226_v15 = vpop.eup %3225  ;;  %v2192_v50 = vmul.f32 0.6931472, %v3224_v25  ;;  %v512_v29 = vsel %vm4386_vm10, %v509_v46, %v506_v24  ;;  %vm4397_vm11 = vcmp.lt.f32.partialorder %v519_v32, 0.0004427343  ;;  %3237 = vlog2.f32 %v503_v55  ;;  %v4421_v24 = vld [vmem:[#allocation9 + $0x60] sm:$0xff] }
  0x9b   :  { %v2194_v14 = vmul.f32 0.6931472, %v3226_v15  ;;  %v1103_v27 = vadd.f32 %v1035_v63, %v83_v11  ;;  %v1036_v42 = vmul.f32 %v512_v29, %v220_v16  ;;  %v1172_v8 = vmul.f32 %v220_v16, %v220_v16 }
  0x9c   :  { %v2323_v45 = vsub.f32 %v1438_v53, %v2192_v50  ;;  %3239 = vlog2.f32 %v512_v29  ;;  %v302_v33 = vmul.f32 1.442695, %v154_v60  ;;  %v1173_v7 = vmul.f32 %v221_v22, %v221_v22 }
  0x9d   :  { %v2324_v48 = vsub.f32 %v1439_v3, %v2194_v14  ;;  %v1511_v46 = vmul.f32 %v1103_v27, %v1103_v27  ;;  %v3023_v35 = vpack.c.bf16 %v1103_v27, %v4354_v13  ;;  %v4408_v31 = vadd.f32 %v1036_v42, %v84_v6 }
  0x9e   :  { %v3228_v52 = vpop.eup %3227  ;;  %v2390_v23 = vadd.f32 %v2389_v38, %v2323_v45  ;;  %3241 = vpow2.f32 %v302_v33  ;;  %v304_v54 = vmul.f32 1.442695, %v155_v39  ;;  %v4410_v18 = vmul.f32 -0.5, %v1171_v12 }
  0x9f   :  { %v3230_v40 = vpop.eup %3229  ;;  %v1579_v53 = vmul.f32 -0.5, %v1511_v46  ;;  %3024 = vmatpush3.bf16.msra.mxu0 %v3023_v35  ;;  %v515_v36 = vmul.f32 0.6931472, %v3228_v52  ;;  %v1512_v41 = vmul.f32 %v4408_v31, %v4408_v31  ;;  %v4415_v13 = vmul.f32 -0.5, %v1172_v8 }
  0xa0   :  { %v2391_v28 = vadd.f32 %v2390_v23, %v2324_v48  ;;  %v1782_v3 = vmul.f32 0.5, %v3230_v40  ;;  %3025 = vmatprep.subr.bf16.mxu0 %v4071_v0  ;;  %3243 = vpow2.f32 %v304_v54  ;;  %v4419_v2 = vmul.f32 -0.5, %v1173_v7 }
  0xa1   :  { %v3232_v21 = vpop.eup %3231  ;;  %v1656_v32 = vmul.f32 1.442695, %v1579_v53  ;;  %v1852_v56 = vmul.f32 250000.0, %v1579_v53  ;;  %v521_v59 = vsel %vm4397_vm11, %v518_v61, %v515_v36  ;;  %v1580_v26 = vmul.f32 -0.5, %v1512_v41  ;;  %v4431_v61 = vld [vmem:[#allocation9 + $0x68] sm:$0xff] }
  0xa2   :  { %v3234_v9 = vpop.eup %3233  ;;  %v2055_v34 = vmul.f32 0.5, %v3232_v21  ;;  %v1037_v44 = vmul.f32 %v521_v59, %v221_v22  ;;  %3245 = vlog2.f32 %v521_v59  ;;  %v1174_v12 = vmul.f32 %v4421_v24, %v4421_v24  ;;  %v159_v41 = vld [vmem:[#allocation8 + $0x88] sm:$0xff] }
  0xa3   :  { %v3236_v4 = vpop.eup %3235  ;;  %v2196_v37 = vmul.f32 0.6931472, %v3234_v9  ;;  %3247 = vpow2.f32 %v1656_v32  ;;  %v1929_v51 = vmul.f32 1.442695, %v1852_v56  ;;  %v1658_v19 = vmul.f32 1.442695, %v1580_v26 }
  0xa4   :  { %v2198_v38 = vmul.f32 0.6931472, %v3236_v4  ;;  %v2123_v11 = vadd.f32 %v2055_v34, %v1782_v3  ;;  %v1105_v55 = vadd.f32 %v1037_v44, %v85_v43  ;;  %v1853_v16 = vmul.f32 250000.0, %v1580_v26  ;;  %v3238_v25 = vpop.eup %3237  ;;  %v160_v32 = vld [vmem:[#allocation8 + $0x90] sm:$0xff] }
  0xa5   :  { %v2325_v63 = vsub.f32 %v1440_v30, %v2196_v37  ;;  %3249 = vpow2.f32 %v1929_v51  ;;  %v306_v60 = vmul.f32 1.442695, %v156_v10  ;;  %v1175_v47 = vmul.f32 %v4431_v61, %v4431_v61  ;;  %v4459_v9 = vld [vmem:[#allocation9 + $0x70] sm:$0xff]  ;;  %v4461_v10 = vld [vmem:[#allocation9 + $0x78] sm:$0xff] }
  0xa6   :  { %v3240_v15 = vpop.eup %3239  ;;  %v2326_v50 = vsub.f32 %v1441_v20, %v2198_v38  ;;  %3251 = vlog2.f32 %v2123_v11  ;;  %v1513_v6 = vmul.f32 %v1105_v55, %v1105_v55  ;;  %v1931_v29 = vmul.f32 1.442695, %v1853_v16  ;;  %v161_v51 = vld [vmem:[#allocation8 + $0x98] sm:$0xff] }
  0xa7   :  { %v2392_v5 = vadd.f32 %v2391_v28, %v2325_v63  ;;  %v4433_v14 = vmul.f32 0.6931472, %v3240_v15  ;;  %3253 = vpow2.f32 %v1658_v19  ;;  %v4437_v27 = vmul.f32 0.6931472, %v3238_v25 }
  0xa8   :  { %v3242_v30 = vpop.eup %3241  ;;  %v1581_v42 = vmul.f32 -0.5, %v1513_v6  ;;  %3255 = vpow2.f32 %v1931_v29  ;;  %v3026_v1 = vpack.c.bf16 %v1105_v55, %v4408_v31  ;;  %v308_v46 = vmul.f32 1.442695, %v157_v62 }
  0xa9   :  { %v4440_v17 = vadd.f32 %v2392_v5, %v2326_v50  ;;  %v1444_v20 = vsub.f32 %v4415_v13, %v4433_v14  ;;  %v522_v39 = vadd.f32 1.0, %v3242_v30  ;;  %v525_v45 = vmul.f32 -0.5, %v3242_v30  ;;  %v4475_v50 = vld [vmem:[#allocation9 + $0x88] sm:$0xff]  ;;  %v88_v14 = vld [vmem:[#allocation6 + $0x70] sm:$0xff] }
  0xaa   :  { %v3244_v8 = vpop.eup %3243  ;;  %v1660_v33 = vmul.f32 1.442695, %v1581_v42  ;;  %v1854_v48 = vmul.f32 250000.0, %v1581_v42  ;;  %3027 = vmatpush3.bf16.msra.mxu0 %v3026_v1  ;;  %3257 = vpow2.f32 %v306_v60  ;;  %v528_v35 = vand.u32 2147483647, %v3242_v30 }
  0xab   :  { %3028 = vmatprep.subr.bf16.mxu0 %v4071_v0  ;;  %3259 = vlog2.f32 %v522_v39  ;;  %v531_v22 = vadd.f32 1.0, %v3244_v8  ;;  %v534_v52 = vmul.f32 -0.5, %v3244_v8  ;;  %v4445_v7 = vmul.f32 -0.5, %v1174_v12 }
  0xac   :  { %v3246_v31 = vpop.eup %3245  ;;  %3261 = vpow2.f32 %v1660_v33  ;;  %v1933_v23 = vmul.f32 1.442695, %v1854_v48  ;;  %v526_v53 = vadd.f32 1.0, %v525_v45  ;;  %v537_v36 = vand.u32 2147483647, %v3244_v8 }
  0xad   :  { %v3248_v54 = vpop.eup %3247  ;;  %v4447_v40 = vmul.f32 0.6931472, %v3246_v31  ;;  %3263 = vlog2.f32 %v531_v22  ;;  %v1443_v28 = vsub.f32 %v4410_v18, %v4437_v27  ;;  %v4451_v21 = vmul.f32 -0.5, %v1175_v47 }
  0xae   :  { %v1783_v3 = vmul.f32 0.5, %v3248_v54  ;;  %3265 = vpow2.f32 %v1933_v23  ;;  %vm4455_vm12 = vcmp.lt.f32.partialorder %v528_v35, 0.0004427343  ;;  %v535_v26 = vadd.f32 1.0, %v534_v52  ;;  %v86_v54 = vld [vmem:[#allocation6 + $0x60] sm:$0xff] }
  0xaf   :  { %v3250_v56 = vpop.eup %3249  ;;  %v1445_v43 = vsub.f32 %v4419_v2, %v4447_v40  ;;  %3267 = vpow2.f32 %v308_v46  ;;  %v1176_v4 = vmul.f32 %v4459_v9, %v4459_v9  ;;  %v312_v37 = vmul.f32 1.442695, %v159_v41 }
  0xb0   :  { %v3252_v34 = vpop.eup %3251  ;;  %v2056_v44 = vmul.f32 0.5, %v3250_v56  ;;  %v527_v11 = vmul.f32 %v3242_v30, %v526_v53  ;;  %vm4465_vm13 = vcmp.lt.f32.partialorder %v537_v36, 0.0004427343  ;;  %v4073_v16 = vmov 0.0  }
  0xb1   :  { %v3254_v19 = vpop.eup %3253  ;;  %v2200_v38 = vmul.f32 0.6931472, %v3252_v34  ;;  %2902 = vmatprep.mubr.msk.f32.mxu0 %vm4072_vm14, %v4073_v16  ;;  %v314_v25 = vmul.f32 1.442695, %v160_v32  ;;  %2937 = vmatprep.mubr.msk.f32.mxu1 %vm4072_vm14, %v4073_v16  ;;  %v1177_v15 = vmul.f32 %v4461_v10, %v4461_v10  ;;  %3269 = vpow2.f32 %v312_v37  ;;  %v87_v34 = vld [vmem:[#allocation6 + $0x68] sm:$0xff] }
  0xb2   :  { %v3256_v63 = vpop.eup %3255  ;;  %v2124_v12 = vadd.f32 %v2056_v44, %v1783_v3  ;;  %v1784_v60 = vmul.f32 0.5, %v3254_v19  ;;  %v1179_v5 = vmul.f32 %v4475_v50, %v4475_v50  ;;  %v536_v62 = vmul.f32 %v3244_v8, %v535_v26  ;;  %v162_v8 = vld [vmem:[#allocation8 + $0xa0] sm:$0xff] }
  0xb3   :  { %v2327_v6 = vsub.f32 %v1442_v49, %v2200_v38  ;;  %v2057_v29 = vmul.f32 0.5, %v3256_v63  ;;  %3271 = vpow2.f32 %v314_v25  ;;  %v4482_v30 = vmul.f32 -0.5, %v1176_v4 }
  0xb4   :  { %v3258_v47 = vpop.eup %3257  ;;  %3273 = vlog2.f32 %v2124_v12  ;;  %v316_v42 = vmul.f32 1.442695, %v161_v51  ;;  %v4489_v46 = vmul.f32 -0.5, %v1177_v15  ;;  %v4493_v35 = vmul.f32 %v4487_v57, %v4487_v57 }
  0xb5   :  { %v3260_v1 = vpop.eup %3259  ;;  %v4485_v39 = vadd.f32 %v4440_v17, %v2327_v6  ;;  %v2125_v45 = vadd.f32 %v2057_v29, %v1784_v60  ;;  %v540_v33 = vadd.f32 1.0, %v3258_v47  ;;  %v543_v48 = vmul.f32 -0.5, %v3258_v47 }
  0xb6   :  { %v3262_v58 = vpop.eup %3261  ;;  %v524_v49 = vmul.f32 0.6931472, %v3260_v1  ;;  %3275 = vpow2.f32 %v316_v42  ;;  %v546_v17 = vand.u32 2147483647, %v3258_v47  ;;  %v4495_v31 = vmul.f32 -0.5, %v1179_v5 }
  0xb7   :  { %v3264_v22 = vpop.eup %3263  ;;  %v1785_v52 = vmul.f32 0.5, %v3262_v58  ;;  %3277 = vlog2.f32 %v2125_v45  ;;  %v544_v41 = vadd.f32 1.0, %v543_v48  ;;  %v4500_v26 = vmul.f32 1.442695, %v162_v8 }
  0xb8   :  { %v3266_v23 = vpop.eup %3265  ;;  %v530_v53 = vsel %vm4455_vm12, %v527_v11, %v524_v49  ;;  %v533_v36 = vmul.f32 0.6931472, %v3264_v22  ;;  %3279 = vlog2.f32 %v540_v33  ;;  %vm4505_vm15 = vcmp.lt.f32.partialorder %v546_v17, 0.0004427343 }
  0xb9   :  { %v3268_v3 = vpop.eup %3267  ;;  %v2058_v32 = vmul.f32 0.5, %v3266_v23  ;;  %v1038_v56 = vmul.f32 %v530_v53, %v4421_v24  ;;  %3281 = vlog2.f32 %v530_v53  ;;  %v545_v25 = vmul.f32 %v3258_v47, %v544_v41 }
  0xba   :  { %v539_v44 = vsel %vm4465_vm13, %v536_v62, %v533_v36  ;;  %v549_v4 = vadd.f32 1.0, %v3268_v3  ;;  %v552_v37 = vmul.f32 -0.5, %v3268_v3  ;;  %v555_v51 = vand.u32 2147483647, %v3268_v3 }
  0xbb   :  { %v2126_v19 = vadd.f32 %v2058_v32, %v1785_v52  ;;  %v1039_v59 = vmul.f32 %v539_v44, %v4431_v61  ;;  %v1106_v38 = vadd.f32 %v1038_v56, %v86_v54  ;;  %3283 = vlog2.f32 %v539_v44  ;;  %v3270_v11 = vpop.eup %3269 }
  0xbc   :  { %3285 = vlog2.f32 %v549_v4  ;;  %v553_v24 = vadd.f32 1.0, %v552_v37  ;;  %v567_v15 = vadd.f32 1.0, %v3270_v11  ;;  %vm4511_vm0 = vcmp.lt.f32.partialorder %v555_v51, 0.0004427343 }
  0xbd   :  { %v4509_v12 = vpop.eup %3271  ;;  %3287 = vlog2.f32 %v2126_v19  ;;  %v1107_v55 = vadd.f32 %v1039_v59, %v87_v34  ;;  %v1514_v60 = vmul.f32 %v1106_v38, %v1106_v38  ;;  %v570_v61 = vmul.f32 -0.5, %v3270_v11 }
  0xbe   :  { %v3274_v6 = vpop.eup %3273  ;;  %v573_v5 = vand.u32 2147483647, %v3270_v11  ;;  %v576_v47 = vadd.f32 1.0, %v4509_v12  ;;  %v554_v48 = vmul.f32 %v3268_v3, %v553_v24  ;;  %3289 = vlog2.f32 %v567_v15 }
  0xbf   :  { %v2202_v62 = vmul.f32 0.6931472, %v3274_v6  ;;  %v1515_v42 = vmul.f32 %v1107_v55, %v1107_v55  ;;  %v1582_v1 = vmul.f32 -0.5, %v1514_v60  ;;  %v3029_v45 = vpack.c.bf16 %v1107_v55, %v1106_v38 }
  0xc0   :  { %v4516_v33 = vpop.eup %3275  ;;  %v571_v58 = vadd.f32 1.0, %v570_v61  ;;  %v579_v49 = vmul.f32 -0.5, %v4509_v12  ;;  %vm4523_vm1 = vcmp.lt.f32.partialorder %v573_v5, 0.0004427343  ;;  %3291 = vlog2.f32 %v576_v47  ;;  %v89_v61 = vld [vmem:[#allocation6 + $0x78] sm:$0xff] }
  0xc1   :  { %v3278_v8 = vpop.eup %3277  ;;  %v2328_v22 = vsub.f32 %v1443_v28, %v2202_v62  ;;  %v1583_v52 = vmul.f32 -0.5, %v1515_v42  ;;  %v1662_v17 = vmul.f32 1.442695, %v1582_v1  ;;  %v1855_v23 = vmul.f32 250000.0, %v1582_v1  ;;  %3030 = vmatpush3.bf16.msra.mxu0 %v3029_v45 }
  0xc2   :  { %v3280_v54 = vpop.eup %3279  ;;  %v2204_v53 = vmul.f32 0.6931472, %v3278_v8  ;;  %3031 = vmatprep.subr.bf16.mxu0 %v4071_v0  ;;  %v580_v41 = vadd.f32 1.0, %v579_v49  ;;  %v572_v51 = vmul.f32 %v3270_v11, %v571_v58  ;;  %v582_v60 = vand.u32 2147483647, %v4509_v12 }
  0xc3   :  { %v3282_v3 = vpop.eup %3281  ;;  %v2395_v32 = vadd.f32 %v4485_v39, %v2328_v22  ;;  %3293 = vpow2.f32 %v1662_v17  ;;  %v1664_v18 = vmul.f32 1.442695, %v1583_v52  ;;  %v1856_v27 = vmul.f32 250000.0, %v1583_v52  ;;  %v91_v17 = vld [vmem:[#allocation6 + $0x88] sm:$0xff] }
  0xc4   :  { %v2329_v28 = vsub.f32 %v1444_v20, %v2204_v53  ;;  %v4531_v56 = vmul.f32 0.6931472, %v3282_v3  ;;  %v1935_v34 = vmul.f32 1.442695, %v1855_v23  ;;  %v542_v44 = vmul.f32 0.6931472, %v3280_v54 }
  0xc5   :  { %v3284_v4 = vpop.eup %3283  ;;  %3295 = vpow2.f32 %v1664_v18  ;;  %v1937_v37 = vmul.f32 1.442695, %v1856_v27  ;;  %v581_v19 = vmul.f32 %v4509_v12, %v580_v41  ;;  %v585_v47 = vadd.f32 1.0, %v4516_v33  ;;  %v2465_v41 = vld [vmem:[#allocation2] sm:$0xff]  ;;  %v92_v3 = vld [vmem:[#allocation6 + $0x90] sm:$0xff] }
  0xc6   :  { %v3286_v59 = vpop.eup %3285  ;;  %v2396_v38 = vadd.f32 %v2395_v32, %v2329_v28  ;;  %v4534_v39 = vmul.f32 0.6931472, %v3284_v4  ;;  %v1446_v24 = vsub.f32 %v4445_v7, %v4531_v56  ;;  %3297 = vpow2.f32 %v1935_v34 }
  0xc7   :  { %v3288_v13 = vpop.eup %3287  ;;  %3299 = vpow2.f32 %v1937_v37  ;;  %v548_v20 = vsel %vm4505_vm15, %v545_v25, %v542_v44  ;;  %v551_v55 = vmul.f32 0.6931472, %v3286_v59  ;;  %v588_v25 = vmul.f32 -0.5, %v4516_v33 }
  0xc8   :  { %v2206_v11 = vmul.f32 0.6931472, %v3288_v13  ;;  %v1447_v15 = vsub.f32 %v4451_v21, %v4534_v39  ;;  %v1040_v6 = vmul.f32 %v548_v20, %v4459_v9  ;;  %3301 = vlog2.f32 %v548_v20  ;;  %v3290_v63 = vpop.eup %3289  ;;  %v94_v39 = vld [vmem:[#allocation6 + $0xa0] sm:$0xff] }
  0xc9   :  { %v557_v5 = vsel %vm4511_vm0, %v554_v48, %v551_v55  ;;  %3303 = vpow2.f32 %v4500_v26  ;;  %v569_v9 = vmul.f32 0.6931472, %v3290_v63  ;;  %v589_v1 = vadd.f32 1.0, %v588_v25 }
  0xca   :  { %v2330_v12 = vsub.f32 %v1445_v43, %v2206_v11  ;;  %v1041_v62 = vmul.f32 %v557_v5, %v4461_v10  ;;  %v1108_v42 = vadd.f32 %v1040_v6, %v88_v14  ;;  %3305 = vlog2.f32 %v557_v5  ;;  %v3292_v45 = vpop.eup %3291 }
  0xcb   :  { %3307 = vlog2.f32 %v585_v47  ;;  %v591_v29 = vand.u32 2147483647, %v4516_v33  ;;  %vm583_vm2 = vcmp.lt.f32.partialorder %v582_v60, 0.0004427343  ;;  %v575_v2 = vsel %vm4523_vm1, %v572_v51, %v569_v9 }
  0xcc   :  { %v4554_v26 = vadd.f32 %v2396_v38, %v2330_v12  ;;  %v1109_v48 = vadd.f32 %v1041_v62, %v89_v61  ;;  %v1516_v58 = vmul.f32 %v1108_v42, %v1108_v42  ;;  %v578_v40 = vmul.f32 0.6931472, %v3292_v45 }
  0xcd   :  { %v3294_v49 = vpop.eup %3293  ;;  %v4559_v43 = vmul.f32 -0.5, %v4493_v35  ;;  %v590_v10 = vmul.f32 %v4516_v33, %v589_v1  ;;  %vm4562_vm3 = vcmp.lt.f32.partialorder %v591_v29, 0.0004427343  ;;  %v1043_v32 = vmul.f32 %v575_v2, %v4475_v50  ;;  %v163_v29 = vld [vmem:[#allocation8 + $0xa8] sm:$0xff] }
  0xce   :  { %v1517_v8 = vmul.f32 %v1109_v48, %v1109_v48  ;;  %v1584_v22 = vmul.f32 -0.5, %v1516_v58  ;;  %v3032_v52 = vpack.c.bf16 %v1109_v48, %v1108_v42  ;;  %v1786_v53 = vmul.f32 0.5, %v3294_v49  ;;  %v229_v58 = vld [vmem:[#allocation9 + $0x98] sm:$0xff] }
  0xcf   :  { %v3296_v54 = vpop.eup %3295  ;;  %v584_v36 = vsel %vm583_vm2, %v581_v19, %v578_v40  ;;  %3309 = vlog2.f32 %v575_v2  ;;  %v1111_v37 = vadd.f32 %v1043_v32, %v91_v17 }
  0xd0   :  { %v3298_v35 = vpop.eup %3297  ;;  %v1787_v18 = vmul.f32 0.5, %v3296_v54  ;;  %v1585_v27 = vmul.f32 -0.5, %v1517_v8  ;;  %v1666_v33 = vmul.f32 1.442695, %v1584_v22  ;;  %v1857_v28 = vmul.f32 250000.0, %v1584_v22  ;;  %3033 = vmatpush3.bf16.msra.mxu0 %v3032_v52 }
  0xd1   :  { %v3300_v34 = vpop.eup %3299  ;;  %v2059_v44 = vmul.f32 0.5, %v3298_v35  ;;  %v1044_v4 = vmul.f32 %v584_v36, %v4487_v57  ;;  %3311 = vlog2.f32 %v584_v36  ;;  %3058 = vmatprep.subr.bf16.mxu0 %v4071_v0  ;;  %v1519_v6 = vmul.f32 %v1111_v37, %v1111_v37  ;;  %v93_v22 = vld [vmem:[#allocation6 + $0x98] sm:$0xff]  ;;  %v164_v36 = vld [vmem:[#allocation8 + $0xb0] sm:$0xff] }
  0xd2   :  { %v3302_v51 = vpop.eup %3301  ;;  %v2060_v59 = vmul.f32 0.5, %v3300_v34  ;;  %3313 = vpow2.f32 %v1666_v33  ;;  %v1668_v19 = vmul.f32 1.442695, %v1585_v27  ;;  %v1858_v50 = vmul.f32 250000.0, %v1585_v27  ;;  %v230_v33 = vld [vmem:[#allocation9 + $0xa0] sm:$0xff] }
  0xd3   :  { %v4569_v38 = vpop.eup %3303  ;;  %v2127_v13 = vadd.f32 %v2059_v44, %v1786_v53  ;;  %v4571_v14 = vmul.f32 0.6931472, %v3302_v51  ;;  %v1939_v20 = vmul.f32 1.442695, %v1857_v28  ;;  %2903 = vmatmul.mubr.f32.vlgmr.msra.gmra.mrb[0].mxu0 %v2465_v41  ;;  %v1112_v55 = vadd.f32 %v1044_v4, %v92_v3  ;;  %v165_v44 = vld [vmem:[#allocation8 + $0xb8] sm:$0xff] }
  0xd4   :  { %v3306_v60 = vpop.eup %3305  ;;  %v2128_v11 = vadd.f32 %v2060_v59, %v1787_v18  ;;  %3315 = vpow2.f32 %v1668_v19  ;;  %v1941_v57 = vmul.f32 1.442695, %v1858_v50  ;;  %2972 = vmatprep.mubr.msk.f32.mxu0 %vm4072_vm14, %v4073_v16  ;;  %v1587_v63 = vmul.f32 -0.5, %v1519_v6  ;;  %v166_v19 = vld [vmem:[#allocation8 + $0xc0] sm:$0xff]  ;;  %v4606_v6 = vld [vmem:[#allocation9 + $0xa8] sm:$0xff] }
  0xd5   :  { %v3308_v61 = vpop.eup %3307  ;;  %3317 = vlog2.f32 %v2127_v13  ;;  %v4575_v5 = vmul.f32 0.6931472, %v3306_v60  ;;  %v1448_v47 = vsub.f32 %v4482_v30, %v4571_v14  ;;  %v1520_v25 = vmul.f32 %v1112_v55, %v1112_v55 }
  0xd6   :  { %3319 = vlog2.f32 %v2128_v11  ;;  %v3035_v12 = vpack.c.bf16 %v1112_v55, %v1111_v37  ;;  %v587_v62 = vmul.f32 0.6931472, %v3308_v61  ;;  %v594_v1 = vadd.f32 1.0, %v4569_v38 }
  0xd7   :  { %v1449_v42 = vsub.f32 %v4489_v46, %v4575_v5  ;;  %3321 = vpow2.f32 %v1939_v20  ;;  %v1588_v9 = vmul.f32 -0.5, %v1520_v25  ;;  %v1672_v45 = vmul.f32 1.442695, %v1587_v63 }
  0xd8   :  { %3323 = vpow2.f32 %v1941_v57  ;;  %v1860_v48 = vmul.f32 250000.0, %v1587_v63  ;;  %3036 = vmatpush3.bf16.msra.mxu1 %v3035_v12  ;;  %v593_v49 = vsel %vm4562_vm3, %v590_v10, %v587_v62  ;;  %v597_v52 = vmul.f32 -0.5, %v4569_v38 }
  0xd9   :  { %v3310_v2 = vpop.eup %3309  ;;  %v1674_v40 = vmul.f32 1.442695, %v1588_v9  ;;  %v1861_v8 = vmul.f32 250000.0, %v1588_v9  ;;  %3037 = vmatprep.subr.bf16.mxu1 %v4071_v0  ;;  %3325 = vlog2.f32 %v594_v1  ;;  %v320_v53 = vmul.f32 1.442695, %v163_v29 }
  0xda   :  { %v4586_v17 = vmul.f32 0.6931472, %v3310_v2  ;;  %3327 = vpow2.f32 %v1672_v45  ;;  %v1945_v54 = vmul.f32 1.442695, %v1860_v48  ;;  %v600_v23 = vand.u32 2147483647, %v4569_v38 }
  0xdb   :  { %v3312_v41 = vpop.eup %3311  ;;  %3329 = vpow2.f32 %v1674_v40  ;;  %v1947_v3 = vmul.f32 1.442695, %v1861_v8  ;;  %v1045_v10 = vmul.f32 %v593_v49, %v229_v58  ;;  %v598_v27 = vadd.f32 1.0, %v597_v52 }
  0xdc   :  { %v3314_v32 = vpop.eup %3313  ;;  %v4589_v35 = vmul.f32 0.6931472, %v3312_v41  ;;  %v1451_v18 = vsub.f32 %v4495_v31, %v4586_v17  ;;  %3331 = vpow2.f32 %v1945_v54  ;;  %v1181_v34 = vmul.f32 %v229_v58, %v229_v58  ;;  %v95_v31 = vld [vmem:[#allocation6 + $0xa8] sm:$0xff] }
  0xdd   :  { %3333 = vpow2.f32 %v1947_v3  ;;  %v4593_v28 = vadd.f32 %v1045_v10, %v93_v22  ;;  %v4597_v51 = vmul.f32 %v230_v33, %v230_v33  ;;  %v322_v59 = vmul.f32 1.442695, %v164_v36 }
  0xde   :  { %v3316_v4 = vpop.eup %3315  ;;  %v1452_v37 = vsub.f32 %v4559_v43, %v4589_v35  ;;  %3335 = vlog2.f32 %v593_v49  ;;  %v1788_v13 = vmul.f32 0.5, %v3314_v32  ;;  %vm4599_vm4 = vcmp.lt.f32.partialorder %v600_v23, 0.0004427343  ;;  %v4623_v32 = vld [vmem:[#allocation9 + $0xb0] sm:$0xff] }
  0xdf   :  { %v3318_v50 = vpop.eup %3317  ;;  %v1521_v55 = vmul.f32 %v4593_v28, %v4593_v28  ;;  %3337 = vpow2.f32 %v320_v53  ;;  %v599_v57 = vmul.f32 %v4569_v38, %v598_v27  ;;  %v324_v61 = vmul.f32 1.442695, %v165_v44 }
  0xe0   :  { %v3320_v60 = vpop.eup %3319  ;;  %v2208_v11 = vmul.f32 0.6931472, %v3318_v50  ;;  %3339 = vpow2.f32 %v322_v59  ;;  %v1789_v12 = vmul.f32 0.5, %v3316_v4  ;;  %v326_v9 = vmul.f32 1.442695, %v166_v19 }
  0xe1   :  { %v3322_v25 = vpop.eup %3321  ;;  %v2210_v63 = vmul.f32 0.6931472, %v3320_v60  ;;  %v1589_v62 = vmul.f32 -0.5, %v1521_v55  ;;  %v1183_v48 = vmul.f32 %v4606_v6, %v4606_v6  ;;  %3341 = vpow2.f32 %v324_v61 }
  0xe2   :  { %v3324_v1 = vpop.eup %3323  ;;  %v2331_v29 = vsub.f32 %v1446_v24, %v2208_v11  ;;  %v2061_v45 = vmul.f32 0.5, %v3322_v25  ;;  %3343 = vpow2.f32 %v326_v9  ;;  %v4621_v36 = vmul.f32 -0.5, %v1181_v34  ;;  %v167_v25 = vld [vmem:[#allocation8 + $0xc8] sm:$0xff] }
  0xe3   :  { %v3326_v38 = vpop.eup %3325  ;;  %v2332_v58 = vsub.f32 %v1447_v15, %v2210_v63  ;;  %v2062_v49 = vmul.f32 0.5, %v3324_v1  ;;  %v1676_v2 = vmul.f32 1.442695, %v1589_v62  ;;  %v1862_v40 = vmul.f32 250000.0, %v1589_v62 }
  0xe4   :  { %v3328_v8 = vpop.eup %3327  ;;  %v2398_v22 = vadd.f32 %v4554_v26, %v2331_v29  ;;  %v2129_v52 = vadd.f32 %v2061_v45, %v1788_v13  ;;  %v596_v54 = vmul.f32 0.6931472, %v3326_v38  ;;  %v1184_v4 = vmul.f32 %v4623_v32, %v4623_v32 }
  0xe5   :  { %v3330_v7 = vpop.eup %3329  ;;  %v2130_v56 = vadd.f32 %v2062_v49, %v1789_v12  ;;  %v1791_v24 = vmul.f32 0.5, %v3328_v8  ;;  %3345 = vpow2.f32 %v1676_v2  ;;  %v1949_v53 = vmul.f32 1.442695, %v1862_v40 }
  0xe6   :  { %v3332_v41 = vpop.eup %3331  ;;  %v4617_v3 = vadd.f32 %v2398_v22, %v2332_v58  ;;  %3347 = vlog2.f32 %v2129_v52  ;;  %v1792_v21 = vmul.f32 0.5, %v3330_v7  ;;  %v602_v15 = vsel %vm4599_vm4, %v599_v57, %v596_v54 }
  0xe7   :  { %v3334_v23 = vpop.eup %3333  ;;  %3349 = vlog2.f32 %v2130_v56  ;;  %v2064_v26 = vmul.f32 0.5, %v3332_v41  ;;  %v1046_v10 = vmul.f32 %v602_v15, %v230_v33  ;;  %v4632_v33 = vmul.f32 -0.5, %v4597_v51 }
  0xe8   :  { %v3336_v27 = vpop.eup %3335  ;;  %v2065_v44 = vmul.f32 0.5, %v3334_v23  ;;  %3351 = vlog2.f32 %v602_v15  ;;  %v4634_v60 = vmul.f32 -0.5, %v1183_v48  ;;  %v4643_v29 = vmul.f32 -0.5, %v1184_v4 }
  0xe9   :  { %v3338_v59 = vpop.eup %3337  ;;  %v2132_v19 = vadd.f32 %v2064_v26, %v1791_v24  ;;  %v1114_v50 = vadd.f32 %v1046_v10, %v94_v39  ;;  %v4627_v13 = vmul.f32 0.6931472, %v3336_v27  ;;  %3353 = vpow2.f32 %v1949_v53 }
  0xea   :  { %v4629_v20 = vpop.eup %3339  ;;  %v2133_v55 = vadd.f32 %v2065_v44, %v1792_v21  ;;  %v603_v34 = vadd.f32 1.0, %v3338_v59  ;;  %v606_v12 = vmul.f32 -0.5, %v3338_v59  ;;  %v609_v62 = vand.u32 2147483647, %v3338_v59 }
  0xeb   :  { %3355 = vlog2.f32 %v2132_v19  ;;  %v1453_v11 = vsub.f32 %v4621_v36, %v4627_v13  ;;  %v1522_v57 = vmul.f32 %v1114_v50, %v1114_v50  ;;  %v3038_v61 = vpack.c.bf16 %v1114_v50, %v4593_v28  ;;  %v4639_v63 = vpop.eup %3341  ;;  %v4648_v28 = vld [vmem:[#allocation9 + $0xb8] sm:$0xff] }
  0xec   :  { %3357 = vlog2.f32 %v2133_v55  ;;  %v612_v9 = vadd.f32 1.0, %v4629_v20  ;;  %v615_v1 = vmul.f32 -0.5, %v4629_v20  ;;  %v4645_v45 = vpop.eup %3343  ;;  %v621_v48 = vadd.f32 1.0, %v4639_v63 }
  0xed   :  { %v1590_v51 = vmul.f32 -0.5, %v1522_v57  ;;  %3039 = vmatpush3.bf16.msra.mxu1 %v3038_v61  ;;  %3359 = vlog2.f32 %v603_v34  ;;  %v624_v38 = vmul.f32 -0.5, %v4639_v63  ;;  %v328_v58 = vmul.f32 1.442695, %v167_v25  ;;  %v168_v57 = vld [vmem:[#allocation8 + $0xd0] sm:$0xff] }
  0xee   :  { %3040 = vmatprep.subr.bf16.mxu1 %v4071_v0  ;;  %3361 = vlog2.f32 %v612_v9  ;;  %v630_v8 = vadd.f32 1.0, %v4645_v45  ;;  %v4655_v22 = vmul.f32 %v4648_v28, %v4648_v28  ;;  %v607_v54 = vadd.f32 1.0, %v606_v12 }
  0xef   :  { %v3346_v49 = vpop.eup %3345  ;;  %v1678_v2 = vmul.f32 1.442695, %v1590_v51  ;;  %v1863_v40 = vmul.f32 250000.0, %v1590_v51  ;;  %vm4657_vm5 = vcmp.lt.f32.partialorder %v609_v62, 0.0004427343  ;;  %3363 = vlog2.f32 %v621_v48 }
  0xf0   :  { %v3348_v52 = vpop.eup %3347  ;;  %v618_v56 = vand.u32 2147483647, %v4629_v20  ;;  %v616_v21 = vadd.f32 1.0, %v615_v1  ;;  %v1793_v23 = vmul.f32 0.5, %v3346_v49  ;;  %v625_v26 = vadd.f32 1.0, %v624_v38  ;;  %v170_v48 = vld [vmem:[#allocation8 + $0xe0] sm:$0xff] }
  0xf1   :  { %v3350_v24 = vpop.eup %3349  ;;  %v2212_v53 = vmul.f32 0.6931472, %v3348_v52  ;;  %3365 = vpow2.f32 %v1678_v2  ;;  %v1951_v41 = vmul.f32 1.442695, %v1863_v40  ;;  %v633_v4 = vmul.f32 -0.5, %v4645_v45 }
  0xf2   :  { %v3352_v39 = vpop.eup %3351  ;;  %v2214_v15 = vmul.f32 0.6931472, %v3350_v24  ;;  %3367 = vlog2.f32 %v630_v8  ;;  %v608_v55 = vmul.f32 %v3338_v59, %v607_v54  ;;  %vm4671_vm6 = vcmp.lt.f32.partialorder %v618_v56, 0.0004427343  ;;  %v96_v24 = vld [vmem:[#allocation6 + $0xb0] sm:$0xff] }
  0xf3   :  { %v3354_v10 = vpop.eup %3353  ;;  %v2333_v27 = vsub.f32 %v1448_v47, %v2212_v53  ;;  %v4665_v44 = vmul.f32 0.6931472, %v3352_v39  ;;  %3369 = vpow2.f32 %v1951_v41  ;;  %v627_v47 = vand.u32 2147483647, %v4639_v63  ;;  %v234_v39 = vld [vmem:[#allocation9 + $0xc0] sm:$0xff] }
  0xf4   :  { %v2334_v19 = vsub.f32 %v1449_v42, %v2214_v15  ;;  %v2066_v50 = vmul.f32 0.5, %v3354_v10  ;;  %v634_v25 = vadd.f32 1.0, %v633_v4  ;;  %v617_v5 = vmul.f32 %v4629_v20, %v616_v21 }
  0xf5   :  { %v3356_v61 = vpop.eup %3355  ;;  %v2400_v30 = vadd.f32 %v4617_v3, %v2333_v27  ;;  %v1454_v14 = vsub.f32 %v4632_v33, %v4665_v44  ;;  %3371 = vpow2.f32 %v328_v58  ;;  %v626_v51 = vmul.f32 %v4639_v63, %v625_v26  ;;  %v169_v3 = vld [vmem:[#allocation8 + $0xd8] sm:$0xff] }
  0xf6   :  { %v3358_v12 = vpop.eup %3357  ;;  %v2218_v62 = vmul.f32 0.6931472, %v3356_v61  ;;  %v2134_v46 = vadd.f32 %v2066_v50, %v1793_v23  ;;  %v330_v1 = vmul.f32 1.442695, %v168_v57  ;;  %v636_v20 = vand.u32 2147483647, %v4645_v45 }
  0xf7   :  { %v3360_v42 = vpop.eup %3359  ;;  %v4680_v59 = vadd.f32 %v2400_v30, %v2334_v19  ;;  %v2220_v9 = vmul.f32 0.6931472, %v3358_v12  ;;  %vm4694_vm7 = vcmp.lt.f32.partialorder %v627_v47, 0.0004427343  ;;  %v635_v8 = vmul.f32 %v4645_v45, %v634_v25  ;;  %v97_v27 = vld [vmem:[#allocation6 + $0xb8] sm:$0xff]  ;;  %v98_v19 = vld [vmem:[#allocation6 + $0xc0] sm:$0xff] }
  0xf8   :  { %v3362_v38 = vpop.eup %3361  ;;  %v4686_v49 = vsub.f32 %v1451_v18, %v2218_v62  ;;  %3373 = vlog2.f32 %v2134_v46  ;;  %v605_v2 = vmul.f32 0.6931472, %v3360_v42  ;;  %v332_v18 = vmul.f32 1.442695, %v169_v3 }
  0xf9   :  { %v4692_v58 = vsub.f32 %v1452_v37, %v2220_v9  ;;  %v614_v40 = vmul.f32 0.6931472, %v3362_v38  ;;  %v3364_v52 = vpop.eup %3363  ;;  %3375 = vpow2.f32 %v330_v1  ;;  %v334_v54 = vmul.f32 1.442695, %v170_v48 }
  0xfa   :  { %v611_v17 = vsel %vm4657_vm5, %v608_v55, %v605_v2  ;;  %v623_v37 = vmul.f32 0.6931472, %v3364_v52  ;;  %vm637_vm8 = vcmp.lt.f32.partialorder %v636_v20, 0.0004427343  ;;  %v4711_v12 = vmul.f32 -0.5, %v4655_v22 }
  0xfb   :  { %v3366_v56 = vpop.eup %3365  ;;  %v620_v43 = vsel %vm4671_vm6, %v617_v5, %v614_v40  ;;  %v1047_v35 = vmul.f32 %v611_v17, %v4606_v6  ;;  %3377 = vlog2.f32 %v611_v17 }
  0xfc   :  { %v3368_v53 = vpop.eup %3367  ;;  %v1794_v41 = vmul.f32 0.5, %v3366_v56  ;;  %v1048_v45 = vmul.f32 %v620_v43, %v4623_v32  ;;  %3379 = vlog2.f32 %v620_v43  ;;  %v629_v15 = vsel %vm4694_vm7, %v626_v51, %v623_v37 }
  0xfd   :  { %v3370_v7 = vpop.eup %3369  ;;  %v1115_v21 = vadd.f32 %v1047_v35, %v95_v31  ;;  %v632_v23 = vmul.f32 0.6931472, %v3368_v53  ;;  %3381 = vpow2.f32 %v332_v18  ;;  %v1049_v6 = vmul.f32 %v629_v15, %v4648_v28 }
  0xfe   :  { %v2067_v26 = vmul.f32 0.5, %v3370_v7  ;;  %v1116_v10 = vadd.f32 %v1048_v45, %v96_v24  ;;  %3383 = vlog2.f32 %v629_v15  ;;  %v1186_v32 = vmul.f32 %v234_v39, %v234_v39  ;;  %v4737_v7 = vld [vmem:[#allocation9 + $0xc8] sm:$0xff] }
  0xff   :  { %v1523_v4 = vmul.f32 %v1115_v21, %v1115_v21  ;;  %v638_v50 = vsel %vm637_vm8, %v635_v8, %v632_v23  ;;  %3385 = vpow2.f32 %v334_v54  ;;  %v4708_v55 = vpop.eup %3371  ;;  %v1117_v25 = vadd.f32 %v1049_v6, %v97_v27 }
 0x100   :  { %v2135_v34 = vadd.f32 %v2067_v26, %v1794_v41  ;;  %v1524_v57 = vmul.f32 %v1116_v10, %v1116_v10  ;;  %v3041_v61 = vpack.c.bf16 %v1116_v10, %v1115_v21  ;;  %v1050_v30 = vmul.f32 %v638_v50, %v234_v39 }
 0x101   :  { %v1591_v47 = vmul.f32 -0.5, %v1523_v4  ;;  %3387 = vlog2.f32 %v638_v50  ;;  %v639_v5 = vadd.f32 1.0, %v4708_v55  ;;  %v1525_v1 = vmul.f32 %v1117_v25, %v1117_v25 }
 0x102   :  { %v3374_v62 = vpop.eup %3373  ;;  %3389 = vlog2.f32 %v2135_v34  ;;  %v1592_v28 = vmul.f32 -0.5, %v1524_v57  ;;  %3042 = vmatpush3.bf16.msra.mxu1 %v3041_v61  ;;  %v1118_v46 = vadd.f32 %v1050_v30, %v98_v19  ;;  %v4739_v21 = vmul.f32 -0.5, %v1186_v32  ;;  %v4749_v19 = vld [vmem:[#allocation9 + $0xd0] sm:$0xff] }
 0x103   :  { %v2222_v42 = vmul.f32 0.6931472, %v3374_v62  ;;  %v1680_v9 = vmul.f32 1.442695, %v1591_v47  ;;  %v1864_v51 = vmul.f32 250000.0, %v1591_v47  ;;  %3043 = vmatprep.subr.bf16.mxu1 %v4071_v0  ;;  %v4715_v3 = vpop.eup %3375  ;;  %v1187_v15 = vmul.f32 %v4737_v7, %v4737_v7 }
 0x104   :  { %v1682_v48 = vmul.f32 1.442695, %v1592_v28  ;;  %v1865_v38 = vmul.f32 250000.0, %v1592_v28  ;;  %v1526_v22 = vmul.f32 %v1118_v46, %v1118_v46  ;;  %v3044_v2 = vpack.c.bf16 %v1118_v46, %v1117_v25 }
 0x105   :  { %v3378_v20 = vpop.eup %3377  ;;  %v4720_v40 = vsub.f32 %v1453_v11, %v2222_v42  ;;  %3391 = vpow2.f32 %v1680_v9  ;;  %v1953_v63 = vmul.f32 1.442695, %v1864_v51  ;;  %v1593_v8 = vmul.f32 -0.5, %v1525_v1  ;;  %v4765_v42 = vld [vmem:[#allocation9 + $0xd8] sm:$0xff] }
 0x106   :  { %v3380_v52 = vpop.eup %3379  ;;  %v4722_v31 = vmul.f32 0.6931472, %v3378_v20  ;;  %3393 = vpow2.f32 %v1682_v48  ;;  %v1955_v17 = vmul.f32 1.442695, %v1865_v38  ;;  %v1594_v18 = vmul.f32 -0.5, %v1526_v22  ;;  %3045 = vmatpush3.bf16.msra.mxu1 %v3044_v2 }
 0x107   :  { %v4724_v54 = vpop.eup %3381  ;;  %v4726_v56 = vmul.f32 0.6931472, %v3380_v52  ;;  %3395 = vpow2.f32 %v1953_v63  ;;  %v1684_v24 = vmul.f32 1.442695, %v1593_v8  ;;  %v1866_v43 = vmul.f32 250000.0, %v1593_v8  ;;  %3046 = vmatprep.subr.bf16.mxu1 %v4071_v0 }
 0x108   :  { %v3384_v36 = vpop.eup %3383  ;;  %v1455_v13 = vsub.f32 %v4634_v60, %v4722_v31  ;;  %3397 = vpow2.f32 %v1955_v17  ;;  %v1686_v11 = vmul.f32 1.442695, %v1594_v18  ;;  %v1867_v35 = vmul.f32 250000.0, %v1594_v18  ;;  %v172_v8 = vld [vmem:[#allocation8 + $0xf0] sm:$0xff] }
 0x109   :  { %v4731_v37 = vpop.eup %3385  ;;  %v1456_v53 = vsub.f32 %v4643_v29, %v4726_v56  ;;  %v4735_v41 = vmul.f32 0.6931472, %v3384_v36  ;;  %3399 = vpow2.f32 %v1684_v24  ;;  %v1957_v45 = vmul.f32 1.442695, %v1866_v43 }
 0x10a   :  { %3401 = vpow2.f32 %v1686_v11  ;;  %v1959_v39 = vmul.f32 1.442695, %v1867_v35  ;;  %v642_v10 = vmul.f32 -0.5, %v4708_v55  ;;  %v648_v27 = vadd.f32 1.0, %v4715_v3 }
 0x10b   :  { %v3388_v23 = vpop.eup %3387  ;;  %v1457_v26 = vsub.f32 %v4711_v12, %v4735_v41  ;;  %3403 = vpow2.f32 %v1957_v45  ;;  %v651_v32 = vmul.f32 -0.5, %v4715_v3  ;;  %v1188_v34 = vmul.f32 %v4749_v19, %v4749_v19 }
 0x10c   :  { %v3390_v6 = vpop.eup %3389  ;;  %v4747_v4 = vmul.f32 0.6931472, %v3388_v23  ;;  %3405 = vpow2.f32 %v1959_v39  ;;  %v657_v61 = vadd.f32 1.0, %v4724_v54  ;;  %v643_v25 = vadd.f32 1.0, %v642_v10 }
 0x10d   :  { %v2224_v50 = vmul.f32 0.6931472, %v3390_v6  ;;  %3407 = vlog2.f32 %v639_v5  ;;  %v645_v62 = vand.u32 2147483647, %v4708_v55  ;;  %v4763_v28 = vmul.f32 -0.5, %v1187_v15 }
 0x10e   :  { %v1458_v57 = vsub.f32 %v4739_v21, %v4747_v4  ;;  %3409 = vlog2.f32 %v648_v27  ;;  %v660_v9 = vmul.f32 -0.5, %v4724_v54  ;;  %v666_v51 = vadd.f32 1.0, %v4731_v37 }
 0x10f   :  { %v3392_v30 = vpop.eup %3391  ;;  %v4760_v47 = vsub.f32 %v1454_v14, %v2224_v50  ;;  %3411 = vlog2.f32 %v657_v61  ;;  %v652_v38 = vadd.f32 1.0, %v651_v32  ;;  %v4769_v33 = vmul.f32 -0.5, %v1188_v34  ;;  %v171_v14 = vld [vmem:[#allocation8 + $0xe8] sm:$0xff] }
 0x110   :  { %v3394_v46 = vpop.eup %3393  ;;  %v1795_v5 = vmul.f32 0.5, %v3392_v30  ;;  %v1189_v44 = vmul.f32 %v4765_v42, %v4765_v42  ;;  %v654_v20 = vand.u32 2147483647, %v4715_v3  ;;  %3413 = vlog2.f32 %v666_v51  ;;  %v238_v51 = vld [vmem:[#allocation9 + $0xe0] sm:$0xff] }
 0x111   :  { %v3396_v1 = vpop.eup %3395  ;;  %v1796_v48 = vmul.f32 0.5, %v3394_v46  ;;  %v669_v63 = vmul.f32 -0.5, %v4731_v37  ;;  %v644_v18 = vmul.f32 %v4708_v55, %v643_v25  ;;  %vm4776_vm9 = vcmp.lt.f32.partialorder %v645_v62, 0.0004427343  ;;  %v158_v46 = vld [vmem:[#allocation8 + $0x80] sm:$0xff] }
 0x112   :  { %v3398_v22 = vpop.eup %3397  ;;  %v2068_v2 = vmul.f32 0.5, %v3396_v1  ;;  %v663_v43 = vand.u32 2147483647, %v4724_v54  ;;  %v661_v45 = vadd.f32 1.0, %v660_v9  ;;  %v336_v39 = vmul.f32 1.442695, %v171_v14 }
 0x113   :  { %v3400_v52 = vpop.eup %3399  ;;  %v2069_v17 = vmul.f32 0.5, %v3398_v22  ;;  %v653_v27 = vmul.f32 %v4715_v3, %v652_v38  ;;  %v338_v6 = vmul.f32 1.442695, %v172_v8  ;;  %vm4782_vm10 = vcmp.lt.f32.partialorder %v654_v20, 0.0004427343 }
 0x114   :  { %v3402_v36 = vpop.eup %3401  ;;  %v2136_v11 = vadd.f32 %v2068_v2, %v1795_v5  ;;  %v1797_v35 = vmul.f32 0.5, %v3400_v52  ;;  %v670_v34 = vadd.f32 1.0, %v669_v63  ;;  %vm4786_vm11 = vcmp.lt.f32.partialorder %v663_v43, 0.0004427343  ;;  %v99_v2 = vld [vmem:[#allocation6 + $0xc8] sm:$0xff]  ;;  %v100_v52 = vld [vmem:[#allocation6 + $0xd0] sm:$0xff] }
 0x115   :  { %v3404_v15 = vpop.eup %3403  ;;  %v2137_v23 = vadd.f32 %v2069_v17, %v1796_v48  ;;  %v1798_v10 = vmul.f32 0.5, %v3402_v36  ;;  %v672_v62 = vand.u32 2147483647, %v4731_v37  ;;  %v662_v1 = vmul.f32 %v4724_v54, %v661_v45 }
 0x116   :  { %v3406_v50 = vpop.eup %3405  ;;  %3415 = vlog2.f32 %v2136_v11  ;;  %v2070_v55 = vmul.f32 0.5, %v3404_v15  ;;  %v1190_v14 = vmul.f32 %v238_v51, %v238_v51  ;;  %v671_v63 = vmul.f32 %v4731_v37, %v670_v34 }
 0x117   :  { %v3408_v61 = vpop.eup %3407  ;;  %3417 = vlog2.f32 %v2137_v23  ;;  %v2071_v30 = vmul.f32 0.5, %v3406_v50  ;;  %v310_v8 = vmul.f32 1.442695, %v158_v46  ;;  %vm673_vm12 = vcmp.lt.f32.partialorder %v672_v62, 0.0004427343 }
 0x118   :  { %v3410_v3 = vpop.eup %3409  ;;  %v2138_v5 = vadd.f32 %v2070_v55, %v1797_v35  ;;  %v641_v9 = vmul.f32 0.6931472, %v3408_v61  ;;  %3419 = vpow2.f32 %v336_v39  ;;  %v4799_v35 = vmul.f32 -0.5, %v1189_v44 }
 0x119   :  { %v2139_v48 = vadd.f32 %v2071_v30, %v1798_v10  ;;  %v650_v38 = vmul.f32 0.6931472, %v3410_v3  ;;  %3421 = vpow2.f32 %v338_v6  ;;  %v3412_v22 = vpop.eup %3411  ;;  %v4804_v23 = vmul.f32 -0.5, %v1190_v14 }
 0x11a   :  { %3423 = vlog2.f32 %v2138_v5  ;;  %v647_v20 = vsel %vm4776_vm9, %v644_v18, %v641_v9  ;;  %v659_v43 = vmul.f32 0.6931472, %v3412_v22  ;;  %v3414_v36 = vpop.eup %3413  ;;  %v101_v18 = vld [vmem:[#allocation6 + $0xd8] sm:$0xff] }
 0x11b   :  { %3425 = vlog2.f32 %v2139_v48  ;;  %v656_v17 = vsel %vm4782_vm10, %v653_v27, %v650_v38  ;;  %v1051_v54 = vmul.f32 %v647_v20, %v4737_v7  ;;  %v668_v45 = vmul.f32 0.6931472, %v3414_v36  ;;  %v4806_v7 = vld [vmem:[#allocation9 + $0xe8] sm:$0xff]  ;;  %v102_v27 = vld [vmem:[#allocation6 + $0xe0] sm:$0xff] }
 0x11c   :  { %v1052_v11 = vmul.f32 %v656_v17, %v4749_v19  ;;  %3427 = vlog2.f32 %v647_v20  ;;  %v665_v37 = vsel %vm4786_vm11, %v662_v1, %v659_v43  ;;  %v173_v19 = vld [vmem:[#allocation8 + $0xf8] sm:$0xff]  ;;  %v4810_v6 = vmul.f32 %v4806_v7, %v4806_v7 }
 0x11d   :  { %v1119_v24 = vadd.f32 %v1051_v54, %v99_v2  ;;  %3429 = vlog2.f32 %v656_v17  ;;  %v1053_v15 = vmul.f32 %v665_v37, %v4765_v42  ;;  %v674_v44 = vsel %vm673_vm12, %v671_v63, %v668_v45 }
 0x11e   :  { %v1120_v39 = vadd.f32 %v1052_v11, %v100_v52  ;;  %3431 = vlog2.f32 %v665_v37  ;;  %v1054_v34 = vmul.f32 %v674_v44, %v238_v51  ;;  %v340_v62 = vmul.f32 1.442695, %v173_v19 }
 0x11f   :  { %v1527_v10 = vmul.f32 %v1119_v24, %v1119_v24  ;;  %3433 = vpow2.f32 %v310_v8  ;;  %v1121_v61 = vadd.f32 %v1053_v15, %v101_v18 }
 0x120   :  { %v3416_v50 = vpop.eup %3415  ;;  %v1528_v55 = vmul.f32 %v1120_v39, %v1120_v39  ;;  %v3047_v32 = vpack.c.bf16 %v1120_v39, %v1119_v24  ;;  %3435 = vlog2.f32 %v674_v44  ;;  %v1122_v9 = vadd.f32 %v1054_v34, %v102_v27  ;;  %v4852_v44 = vld [vmem:[#allocation9 + $0xf0] sm:$0xff] }
 0x121   :  { %v3418_v42 = vpop.eup %3417  ;;  %v2226_v30 = vmul.f32 0.6931472, %v3416_v50  ;;  %v1595_v25 = vmul.f32 -0.5, %v1527_v10  ;;  %v1529_v1 = vmul.f32 %v1121_v61, %v1121_v61 }
 0x122   :  { %v4812_v46 = vpop.eup %3419  ;;  %v2228_v3 = vmul.f32 0.6931472, %v3418_v42  ;;  %v1596_v5 = vmul.f32 -0.5, %v1528_v55  ;;  %3048 = vmatpush3.bf16.msra.mxu1 %v3047_v32  ;;  %v1530_v52 = vmul.f32 %v1122_v9, %v1122_v9  ;;  %v3050_v4 = vpack.c.bf16 %v1122_v9, %v1121_v61  ;;  %v174_v55 = vld [vmem:[#allocation8 + $0x100] sm:$0xff] }
 0x123   :  { %v4814_v48 = vpop.eup %3421  ;;  %v4819_v38 = vsub.f32 %v1455_v13, %v2226_v30  ;;  %v1688_v51 = vmul.f32 1.442695, %v1595_v25  ;;  %v1868_v14 = vmul.f32 250000.0, %v1595_v25  ;;  %3049 = vmatprep.subr.bf16.mxu1 %v4071_v0  ;;  %v675_v22 = vadd.f32 1.0, %v4812_v46  ;;  %v4859_v30 = vld [vmem:[#allocation9 + $0x80] sm:$0xff] }
 0x124   :  { %v3424_v2 = vpop.eup %3423  ;;  %v4826_v20 = vsub.f32 %v1456_v53, %v2228_v3  ;;  %v1690_v63 = vmul.f32 1.442695, %v1596_v5  ;;  %v1869_v8 = vmul.f32 250000.0, %v1596_v5  ;;  %v1597_v31 = vmul.f32 -0.5, %v1529_v1 }
 0x125   :  { %v3426_v17 = vpop.eup %3425  ;;  %v2230_v54 = vmul.f32 0.6931472, %v3424_v2  ;;  %3437 = vpow2.f32 %v1688_v51  ;;  %v1961_v60 = vmul.f32 1.442695, %v1868_v14  ;;  %v1598_v11 = vmul.f32 -0.5, %v1530_v52 }
 0x126   :  { %v3428_v13 = vpop.eup %3427  ;;  %v2232_v43 = vmul.f32 0.6931472, %v3426_v17  ;;  %3439 = vpow2.f32 %v1690_v63  ;;  %v1963_v36 = vmul.f32 1.442695, %v1869_v8  ;;  %v1692_v53 = vmul.f32 1.442695, %v1597_v31  ;;  %3051 = vmatpush3.bf16.msra.mxu1 %v3050_v4 }
 0x127   :  { %v3430_v24 = vpop.eup %3429  ;;  %v4831_v29 = vsub.f32 %v1457_v26, %v2230_v54  ;;  %v4833_v56 = vmul.f32 0.6931472, %v3428_v13  ;;  %3441 = vpow2.f32 %v1961_v60  ;;  %v1694_v39 = vmul.f32 1.442695, %v1598_v11  ;;  %3052 = vmatprep.subr.bf16.mxu1 %v4071_v0  ;;  %v176_v54 = vld [vmem:[#allocation8 + $0x110] sm:$0xff] }
 0x128   :  { %v3432_v18 = vpop.eup %3431  ;;  %v4838_v37 = vsub.f32 %v1458_v57, %v2232_v43  ;;  %v4840_v45 = vmul.f32 0.6931472, %v3430_v24  ;;  %3443 = vpow2.f32 %v1963_v36  ;;  %v1870_v26 = vmul.f32 250000.0, %v1597_v31 }
 0x129   :  { %v4842_v15 = vpop.eup %3433  ;;  %v1459_v12 = vsub.f32 %v4763_v28, %v4833_v56  ;;  %v4846_v41 = vmul.f32 0.6931472, %v3432_v18  ;;  %3445 = vpow2.f32 %v1692_v53  ;;  %v1871_v21 = vmul.f32 250000.0, %v1598_v11 }
 0x12a   :  { %v1460_v19 = vsub.f32 %v4769_v33, %v4840_v45  ;;  %3447 = vpow2.f32 %v1694_v39  ;;  %v3436_v57 = vpop.eup %3435  ;;  %v1965_v27 = vmul.f32 1.442695, %v1870_v26  ;;  %v678_v50 = vmul.f32 -0.5, %v4812_v46 }
 0x12b   :  { %v1461_v10 = vsub.f32 %v4799_v35, %v4846_v41  ;;  %3449 = vlog2.f32 %v675_v22  ;;  %v4855_v32 = vmul.f32 0.6931472, %v3436_v57  ;;  %v1967_v34 = vmul.f32 1.442695, %v1871_v21  ;;  %v4885_v21 = vld [vmem:[#allocation9 + $0xf8] sm:$0xff] }
 0x12c   :  { %v1192_v42 = vmul.f32 %v4852_v44, %v4852_v44  ;;  %3451 = vpow2.f32 %v340_v62  ;;  %v684_v61 = vadd.f32 1.0, %v4814_v48  ;;  %v687_v25 = vmul.f32 -0.5, %v4814_v48 }
 0x12d   :  { %3453 = vpow2.f32 %v1965_v27  ;;  %v1178_v3 = vmul.f32 %v4859_v30, %v4859_v30  ;;  %v1462_v5 = vsub.f32 %v4804_v23, %v4855_v32  ;;  %v4869_v9 = vmul.f32 -0.5, %v4810_v6  ;;  %v106_v32 = vld [vmem:[#allocation6 + $0x100] sm:$0xff] }
 0x12e   :  { %3455 = vpow2.f32 %v1967_v34  ;;  %v342_v1 = vmul.f32 1.442695, %v174_v55  ;;  %v679_v62 = vadd.f32 1.0, %v678_v50  ;;  %v681_v14 = vand.u32 2147483647, %v4812_v46 }
 0x12f   :  { %v3438_v51 = vpop.eup %3437  ;;  %3457 = vlog2.f32 %v684_v61  ;;  %v558_v22 = vadd.f32 1.0, %v4842_v15  ;;  %v688_v8 = vadd.f32 1.0, %v687_v25  ;;  %v690_v52 = vand.u32 2147483647, %v4814_v48 }
 0x130   :  { %v3440_v2 = vpop.eup %3439  ;;  %v1799_v63 = vmul.f32 0.5, %v3438_v51  ;;  %v4874_v17 = vmul.f32 -0.5, %v1192_v42  ;;  %v561_v6 = vmul.f32 -0.5, %v4842_v15  ;;  %v564_v13 = vand.u32 2147483647, %v4842_v15  ;;  %v177_v42 = vld [vmem:[#allocation8 + $0x118] sm:$0xff] }
 0x131   :  { %v3442_v60 = vpop.eup %3441  ;;  %v1800_v31 = vmul.f32 0.5, %v3440_v2  ;;  %3459 = vlog2.f32 %v558_v22  ;;  %v4878_v11 = vmul.f32 -0.5, %v1178_v3  ;;  %v2466_v24 = vlaneseq }
 0x132   :  { %v3444_v43 = vpop.eup %3443  ;;  %v2072_v36 = vmul.f32 0.5, %v3442_v60  ;;  %3461 = vpow2.f32 %v342_v1  ;;  %v680_v39 = vmul.f32 %v4812_v46, %v679_v62  ;;  %vm4881_vm13 = vcmp.lt.f32.partialorder %v681_v14, 0.0004427343  ;;  %v4898_v1 = vld [vmem:[#allocation9 + $0x100] sm:$0xff]  ;;  %v103_v60 = vld [vmem:[#allocation6 + $0xe8] sm:$0xff] }
 0x133   :  { %v3446_v53 = vpop.eup %3445  ;;  %v2073_v18 = vmul.f32 0.5, %v3444_v43  ;;  %v346_v4 = vmul.f32 1.442695, %v176_v54  ;;  %v689_v50 = vmul.f32 %v4814_v48, %v688_v8  ;;  %vm4888_vm15 = vcmp.lt.f32.partialorder %v690_v52, 0.0004427343 }
 0x134   :  { %v3448_v57 = vpop.eup %3447  ;;  %v2140_v27 = vadd.f32 %v2072_v36, %v1799_v63  ;;  %v1193_v34 = vmul.f32 %v4885_v21, %v4885_v21  ;;  %v562_v25 = vadd.f32 1.0, %v561_v6  ;;  %vm4894_vm0 = vcmp.lt.f32.partialorder %v564_v13, 0.0004427343 }
 0x135   :  { %v3450_v46 = vpop.eup %3449  ;;  %v2141_v61 = vadd.f32 %v2073_v18, %v1800_v31  ;;  %3463 = vpow2.f32 %v346_v4  ;;  %v1801_v48 = vmul.f32 0.5, %v3446_v53  ;;  %v1194_v14 = vmul.f32 %v4898_v1, %v4898_v1 }
 0x136   :  { %v3452_v51 = vpop.eup %3451  ;;  %3465 = vlog2.f32 %v2140_v27  ;;  %v677_v62 = vmul.f32 0.6931472, %v3450_v46  ;;  %v1802_v2 = vmul.f32 0.5, %v3448_v57  ;;  %v348_v8 = vmul.f32 1.442695, %v177_v42 }
 0x137   :  { %v3454_v22 = vpop.eup %3453  ;;  %3467 = vlog2.f32 %v2141_v61  ;;  %v693_v63 = vadd.f32 1.0, %v3452_v51  ;;  %v696_v6 = vmul.f32 -0.5, %v3452_v51  ;;  %v4904_v13 = vmul.f32 -0.5, %v1193_v34  ;;  %v104_v34 = vld [vmem:[#allocation6 + $0xf0] sm:$0xff] }
 0x138   :  { %v3456_v52 = vpop.eup %3455  ;;  %v2074_v54 = vmul.f32 0.5, %v3454_v22  ;;  %v683_v31 = vsel %vm4881_vm13, %v680_v39, %v677_v62  ;;  %v563_v18 = vmul.f32 %v4842_v15, %v562_v25  ;;  %v4908_v27 = vmul.f32 -0.5, %v1194_v14 }
 0x139   :  { %v3458_v43 = vpop.eup %3457  ;;  %v2075_v36 = vmul.f32 0.5, %v3456_v52  ;;  %v1055_v53 = vmul.f32 %v683_v31, %v4806_v7  ;;  %3469 = vlog2.f32 %v683_v31  ;;  %v699_v26 = vand.u32 2147483647, %v3452_v51 }
 0x13a   :  { %v2142_v4 = vadd.f32 %v2074_v54, %v1801_v48  ;;  %v686_v57 = vmul.f32 0.6931472, %v3458_v43  ;;  %3471 = vlog2.f32 %v693_v63  ;;  %v697_v22 = vadd.f32 1.0, %v696_v6 }
 0x13b   :  { %v3460_v42 = vpop.eup %3459  ;;  %v2143_v46 = vadd.f32 %v2075_v36, %v1802_v2  ;;  %v1123_v61 = vadd.f32 %v1055_v53, %v103_v60  ;;  %3473 = vpow2.f32 %v348_v8  ;;  %v90_v60 = vld [vmem:[#allocation6 + $0x80] sm:$0xff]  ;;  %vm4918_vm1 = vcmp.lt.f32.partialorder %v699_v26, 0.0004427343 }
 0x13c   :  { %v3462_v39 = vpop.eup %3461  ;;  %3475 = vlog2.f32 %v2142_v4  ;;  %v692_v62 = vsel %vm4888_vm15, %v689_v50, %v686_v57  ;;  %v560_v7 = vmul.f32 0.6931472, %v3460_v42  ;;  %v698_v31 = vmul.f32 %v3452_v51, %v697_v22 }
 0x13d   :  { %3477 = vlog2.f32 %v2143_v46  ;;  %v1056_v15 = vmul.f32 %v692_v62, %v4852_v44  ;;  %v1531_v25 = vmul.f32 %v1123_v61, %v1123_v61  ;;  %v702_v48 = vadd.f32 1.0, %v3462_v39 }
 0x13e   :  { %3479 = vlog2.f32 %v692_v62  ;;  %v566_v14 = vsel %vm4894_vm0, %v563_v18, %v560_v7  ;;  %v705_v2 = vmul.f32 -0.5, %v3462_v39  ;;  %v708_v63 = vand.u32 2147483647, %v3462_v39 }
 0x13f   :  { %v4915_v8 = vpop.eup %3463  ;;  %v1124_v52 = vadd.f32 %v1056_v15, %v104_v34  ;;  %v1599_v54 = vmul.f32 -0.5, %v1531_v25  ;;  %v1042_v50 = vmul.f32 %v566_v14, %v4859_v30  ;;  %3481 = vlog2.f32 %v566_v14 }
 0x140   :  { %v3466_v55 = vpop.eup %3465  ;;  %3483 = vlog2.f32 %v702_v48  ;;  %v706_v6 = vadd.f32 1.0, %v705_v2  ;;  %vm4924_vm2 = vcmp.lt.f32.partialorder %v708_v63, 0.0004427343  ;;  %v720_v51 = vadd.f32 1.0, %v4915_v8 }
 0x141   :  { %v3468_v3 = vpop.eup %3467  ;;  %v2234_v43 = vmul.f32 0.6931472, %v3466_v55  ;;  %v1532_v36 = vmul.f32 %v1124_v52, %v1124_v52  ;;  %v1696_v53 = vmul.f32 1.442695, %v1599_v54  ;;  %v1872_v18 = vmul.f32 250000.0, %v1599_v54 }
 0x142   :  { %v2236_v4 = vmul.f32 0.6931472, %v3468_v3  ;;  %v3053_v57 = vpack.c.bf16 %v1124_v52, %v1123_v61  ;;  %v4922_v42 = vadd.f32 %v1042_v50, %v90_v60  ;;  %v707_v25 = vmul.f32 %v3462_v39, %v706_v6  ;;  %v105_v52 = vld [vmem:[#allocation6 + $0xf8] sm:$0xff] }
 0x143   :  { %v3470_v46 = vpop.eup %3469  ;;  %v4932_v26 = vsub.f32 %v1459_v12, %v2234_v43  ;;  %v1600_v34 = vmul.f32 -0.5, %v1532_v36  ;;  %3485 = vpow2.f32 %v1696_v53  ;;  %v1969_v62 = vmul.f32 1.442695, %v1872_v18 }
 0x144   :  { %v3472_v7 = vpop.eup %3471  ;;  %v4937_v61 = vsub.f32 %v1460_v19, %v2236_v4  ;;  %v4939_v22 = vmul.f32 0.6931472, %v3470_v46  ;;  %3054 = vmatpush3.bf16.msra.mxu1 %v3053_v57  ;;  %v1518_v15 = vmul.f32 %v4922_v42, %v4922_v42  ;;  %v723_v19 = vmul.f32 -0.5, %v4915_v8  ;;  %v178_v4 = vld [vmem:[#allocation8 + $0x120] sm:$0xff] }
 0x145   :  { %v4943_v48 = vpop.eup %3473  ;;  %v1698_v28 = vmul.f32 1.442695, %v1600_v34  ;;  %v1873_v56 = vmul.f32 250000.0, %v1600_v34  ;;  %3487 = vpow2.f32 %v1969_v62  ;;  %3055 = vmatprep.subr.bf16.mxu1 %v4071_v0  ;;  %v695_v12 = vmul.f32 0.6931472, %v3472_v7 }
 0x146   :  { %v3476_v14 = vpop.eup %3475  ;;  %v1463_v33 = vsub.f32 %v4869_v9, %v4939_v22  ;;  %v1586_v45 = vmul.f32 -0.5, %v1518_v15  ;;  %3489 = vlog2.f32 %v720_v51  ;;  %v724_v18 = vadd.f32 1.0, %v723_v19  ;;  %v244_v7 = vld [vmem:[#allocation9 + $0x110] sm:$0xff] }
 0x147   :  { %v3478_v2 = vpop.eup %3477  ;;  %v2238_v63 = vmul.f32 0.6931472, %v3476_v14  ;;  %3491 = vpow2.f32 %v1698_v28  ;;  %v1971_v39 = vmul.f32 1.442695, %v1873_v56  ;;  %v701_v54 = vsel %vm4918_vm1, %v698_v31, %v695_v12 }
 0x148   :  { %v3480_v60 = vpop.eup %3479  ;;  %v2240_v50 = vmul.f32 0.6931472, %v3478_v2  ;;  %v1670_v55 = vmul.f32 1.442695, %v1586_v45  ;;  %v1859_v6 = vmul.f32 250000.0, %v1586_v45  ;;  %v1057_v3 = vmul.f32 %v701_v54, %v4885_v21 }
 0x149   :  { %v3482_v43 = vpop.eup %3481  ;;  %v4955_v36 = vsub.f32 %v1461_v10, %v2238_v63  ;;  %v4957_v53 = vmul.f32 0.6931472, %v3480_v60  ;;  %3493 = vpow2.f32 %v1971_v39  ;;  %v726_v46 = vand.u32 2147483647, %v4915_v8 }
 0x14a   :  { %v3484_v57 = vpop.eup %3483  ;;  %v4962_v31 = vsub.f32 %v1462_v5, %v2240_v50  ;;  %v4964_v44 = vmul.f32 0.6931472, %v3482_v43  ;;  %3495 = vpow2.f32 %v1670_v55  ;;  %v1943_v21 = vmul.f32 1.442695, %v1859_v6 }
 0x14b   :  { %v1464_v35 = vsub.f32 %v4874_v17, %v4957_v53  ;;  %v704_v41 = vmul.f32 0.6931472, %v3484_v57  ;;  %v1125_v10 = vadd.f32 %v1057_v3, %v105_v52  ;;  %3497 = vlog2.f32 %v701_v54  ;;  %v4981_v52 = vld [vmem:[#allocation9 + $0x118] sm:$0xff] }
 0x14c   :  { %v1450_v51 = vsub.f32 %v4878_v11, %v4964_v44  ;;  %3499 = vpow2.f32 %v1943_v21  ;;  %v350_v34 = vmul.f32 1.442695, %v178_v4  ;;  %v729_v15 = vadd.f32 1.0, %v4943_v48  ;;  %v179_v4 = vld [vmem:[#allocation8 + $0x128] sm:$0xff] }
 0x14d   :  { %v3486_v23 = vpop.eup %3485  ;;  %v710_v5 = vsel %vm4924_vm2, %v707_v25, %v704_v41  ;;  %v1533_v62 = vmul.f32 %v1125_v10, %v1125_v10  ;;  %v732_v28 = vmul.f32 -0.5, %v4943_v48  ;;  %v1196_v14 = vmul.f32 %v244_v7, %v244_v7  ;;  %v183_v11 = vld [vmem:[#allocation8 + $0x148] sm:$0xff] }
 0x14e   :  { %v1803_v56 = vmul.f32 0.5, %v3486_v23  ;;  %v1058_v12 = vmul.f32 %v710_v5, %v4898_v1  ;;  %3501 = vlog2.f32 %v710_v5  ;;  %v725_v2 = vmul.f32 %v4915_v8, %v724_v18  ;;  %v108_v5 = vld [vmem:[#allocation6 + $0x110] sm:$0xff] }
 0x14f   :  { %v3488_v45 = vpop.eup %3487  ;;  %v1601_v19 = vmul.f32 -0.5, %v1533_v62  ;;  %vm4977_vm3 = vcmp.lt.f32.partialorder %v726_v46, 0.0004427343  ;;  %3503 = vlog2.f32 %v729_v15  ;;  %v733_v54 = vadd.f32 1.0, %v732_v28 }
 0x150   :  { %v3490_v30 = vpop.eup %3489  ;;  %v2076_v25 = vmul.f32 0.5, %v3488_v45  ;;  %v1126_v39 = vadd.f32 %v1058_v12, %v106_v32  ;;  %3505 = vpow2.f32 %v350_v34  ;;  %v1197_v6 = vmul.f32 %v4981_v52, %v4981_v52 }
 0x151   :  { %v3492_v60 = vpop.eup %3491  ;;  %v1700_v1 = vmul.f32 1.442695, %v1601_v19  ;;  %v1874_v50 = vmul.f32 250000.0, %v1601_v19  ;;  %v722_v55 = vmul.f32 0.6931472, %v3490_v30 }
 0x152   :  { %v1804_v8 = vmul.f32 0.5, %v3492_v60  ;;  %v2144_v3 = vadd.f32 %v2076_v25, %v1803_v56  ;;  %v1534_v43 = vmul.f32 %v1126_v39, %v1126_v39  ;;  %v3056_v18 = vpack.c.bf16 %v1126_v39, %v1125_v10 }
 0x153   :  { %v3494_v57 = vpop.eup %3493  ;;  %3507 = vpow2.f32 %v1700_v1  ;;  %v1973_v21 = vmul.f32 1.442695, %v1874_v50  ;;  %v728_v41 = vsel %vm4977_vm3, %v725_v2, %v722_v55  ;;  %v735_v46 = vand.u32 2147483647, %v4943_v48 }
 0x154   :  { %v3496_v34 = vpop.eup %3495  ;;  %v2077_v23 = vmul.f32 0.5, %v3494_v57  ;;  %3509 = vlog2.f32 %v2144_v3  ;;  %v1602_v32 = vmul.f32 -0.5, %v1534_v43  ;;  %3057 = vmatpush3.bf16.msra.mxu1 %v3056_v18  ;;  %v1060_v62 = vmul.f32 %v728_v41, %v244_v7  ;;  %v180_v3 = vld [vmem:[#allocation8 + $0x130] sm:$0xff] }
 0x155   :  { %v3498_v15 = vpop.eup %3497  ;;  %v1790_v28 = vmul.f32 0.5, %v3496_v34  ;;  %3511 = vpow2.f32 %v1973_v21  ;;  %v4988_v10 = vmul.f32 -0.5, %v1196_v14  ;;  %v352_v56 = vmul.f32 1.442695, %v179_v4  ;;  %3082 = vmatprep.subr.bf16.mxu1 %v4071_v0 }
 0x156   :  { %v3500_v12 = vpop.eup %3499  ;;  %v2145_v45 = vadd.f32 %v2077_v23, %v1804_v8  ;;  %v4991_v19 = vmul.f32 0.6931472, %v3498_v15  ;;  %v1702_v2 = vmul.f32 1.442695, %v1602_v32  ;;  %v1875_v63 = vmul.f32 250000.0, %v1602_v32 }
 0x157   :  { %v2063_v30 = vmul.f32 0.5, %v3500_v12  ;;  %v734_v25 = vmul.f32 %v4943_v48, %v733_v54  ;;  %v4994_v39 = vadd.f32 %v1060_v62, %v108_v5  ;;  %3513 = vlog2.f32 %v728_v41  ;;  %v5006_v54 = vld [vmem:[#allocation9 + $0x120] sm:$0xff]  ;;  %v181_v23 = vld [vmem:[#allocation8 + $0x138] sm:$0xff] }
 0x158   :  { %v3502_v7 = vpop.eup %3501  ;;  %3515 = vlog2.f32 %v2145_v45  ;;  %v1465_v14 = vsub.f32 %v4904_v13, %v4991_v19  ;;  %v1975_v60 = vmul.f32 1.442695, %v1875_v63  ;;  %vm4998_vm4 = vcmp.lt.f32.partialorder %v735_v46, 0.0004427343  ;;  %v5016_v46 = vld [vmem:[#allocation9 + $0x128] sm:$0xff]  ;;  %v109_v32 = vld [vmem:[#allocation6 + $0x118] sm:$0xff] }
 0x159   :  { %v3504_v50 = vpop.eup %3503  ;;  %v2131_v55 = vadd.f32 %v2063_v30, %v1790_v28  ;;  %v5002_v8 = vmul.f32 0.6931472, %v3502_v7  ;;  %3517 = vpow2.f32 %v1702_v2  ;;  %v1536_v48 = vmul.f32 %v4994_v39, %v4994_v39 }
 0x15a   :  { %v5008_v43 = vpop.eup %3505  ;;  %3519 = vpow2.f32 %v1975_v60  ;;  %v731_v18 = vmul.f32 0.6931472, %v3504_v50  ;;  %v5010_v4 = vmul.f32 -0.5, %v1197_v6  ;;  %v1198_v57 = vmul.f32 %v5006_v54, %v5006_v54 }
 0x15b   :  { %3521 = vlog2.f32 %v2131_v55  ;;  %v1466_v21 = vsub.f32 %v4908_v27, %v5002_v8  ;;  %v1604_v41 = vmul.f32 -0.5, %v1536_v48  ;;  %v738_v34 = vadd.f32 1.0, %v5008_v43 }
 0x15c   :  { %v737_v5 = vsel %vm4998_vm4, %v734_v25, %v731_v18  ;;  %3523 = vpow2.f32 %v352_v56  ;;  %v1199_v6 = vmul.f32 %v5016_v46, %v5016_v46  ;;  %v354_v62 = vmul.f32 1.442695, %v180_v3 }
 0x15d   :  { %v3508_v15 = vpop.eup %3507  ;;  %v1061_v28 = vmul.f32 %v737_v5, %v4981_v52  ;;  %3525 = vlog2.f32 %v737_v5  ;;  %v1706_v12 = vmul.f32 1.442695, %v1604_v41  ;;  %v1877_v45 = vmul.f32 250000.0, %v1604_v41  ;;  %v182_v52 = vld [vmem:[#allocation8 + $0x140] sm:$0xff] }
 0x15e   :  { %v3510_v2 = vpop.eup %3509  ;;  %v1805_v63 = vmul.f32 0.5, %v3508_v15  ;;  %3527 = vlog2.f32 %v738_v34  ;;  %v741_v30 = vmul.f32 -0.5, %v5008_v43  ;;  %v356_v7 = vmul.f32 1.442695, %v181_v23 }
 0x15f   :  { %v3512_v60 = vpop.eup %3511  ;;  %v2242_v1 = vmul.f32 0.6931472, %v3510_v2  ;;  %v1129_v25 = vadd.f32 %v1061_v28, %v109_v32  ;;  %3529 = vpow2.f32 %v1706_v12  ;;  %v1979_v56 = vmul.f32 1.442695, %v1877_v45  ;;  %v5036_v28 = vld [vmem:[#allocation9 + $0x130] sm:$0xff]  ;;  %v5038_v45 = vld [vmem:[#allocation9 + $0x138] sm:$0xff] }
 0x160   :  { %v2078_v50 = vmul.f32 0.5, %v3512_v60  ;;  %v744_v55 = vand.u32 2147483647, %v5008_v43  ;;  %v5026_v48 = vmul.f32 -0.5, %v1198_v57  ;;  %3531 = vpow2.f32 %v354_v62 }
 0x161   :  { %v3514_v3 = vpop.eup %3513  ;;  %v5031_v18 = vsub.f32 %v1463_v33, %v2242_v1  ;;  %v1537_v41 = vmul.f32 %v1129_v25, %v1129_v25  ;;  %3533 = vpow2.f32 %v1979_v56  ;;  %v3059_v34 = vpack.c.bf16 %v1129_v25, %v4994_v39 }
 0x162   :  { %v3516_v23 = vpop.eup %3515  ;;  %v2146_v32 = vadd.f32 %v2078_v50, %v1805_v63  ;;  %v5034_v5 = vmul.f32 0.6931472, %v3514_v3  ;;  %v742_v15 = vadd.f32 1.0, %v741_v30  ;;  %3535 = vpow2.f32 %v356_v7 }
 0x163   :  { %v3518_v57 = vpop.eup %3517  ;;  %v2244_v62 = vmul.f32 0.6931472, %v3516_v23  ;;  %v1605_v12 = vmul.f32 -0.5, %v1537_v41  ;;  %3060 = vmatpush3.bf16.msra.mxu0 %v3059_v34  ;;  %v1200_v9 = vmul.f32 %v5036_v28, %v5036_v28  ;;  %v358_v22 = vmul.f32 1.442695, %v182_v52 }
 0x164   :  { %v3520_v33 = vpop.eup %3519  ;;  %v1806_v39 = vmul.f32 0.5, %v3518_v57  ;;  %3537 = vlog2.f32 %v2146_v32  ;;  %v1468_v2 = vsub.f32 %v4988_v10, %v5034_v5  ;;  %3061 = vmatprep.subr.bf16.mxu0 %v4071_v0  ;;  %v1201_v63 = vmul.f32 %v5038_v45, %v5038_v45 }
 0x165   :  { %v3522_v30 = vpop.eup %3521  ;;  %v5050_v7 = vsub.f32 %v1464_v35, %v2244_v62  ;;  %v2079_v60 = vmul.f32 0.5, %v3520_v33  ;;  %v1708_v1 = vmul.f32 1.442695, %v1605_v12  ;;  %v1878_v25 = vmul.f32 250000.0, %v1605_v12 }
 0x166   :  { %v3524_v56 = vpop.eup %3523  ;;  %v2216_v50 = vmul.f32 0.6931472, %v3522_v30  ;;  %v743_v52 = vmul.f32 %v5008_v43, %v742_v15  ;;  %v5053_v3 = vmul.f32 -0.5, %v1199_v6  ;;  %3539 = vpow2.f32 %v358_v22 }
 0x167   :  { %v3526_v41 = vpop.eup %3525  ;;  %v2147_v34 = vadd.f32 %v2079_v60, %v1806_v39  ;;  %3541 = vpow2.f32 %v1708_v1  ;;  %v1981_v23 = vmul.f32 1.442695, %v1878_v25  ;;  %v747_v32 = vadd.f32 1.0, %v3524_v56 }
 0x168   :  { %v3528_v57 = vpop.eup %3527  ;;  %v2335_v17 = vsub.f32 %v1450_v51, %v2216_v50  ;;  %v5058_v53 = vmul.f32 0.6931472, %v3526_v41  ;;  %vm745_vm5 = vcmp.lt.f32.partialorder %v744_v55, 0.0004427343  ;;  %v750_v35 = vmul.f32 -0.5, %v3524_v56  ;;  %v110_v51 = vld [vmem:[#allocation6 + $0x120] sm:$0xff] }
 0x169   :  { %v3530_v62 = vpop.eup %3529  ;;  %3543 = vlog2.f32 %v2147_v34  ;;  %v740_v43 = vmul.f32 0.6931472, %v3528_v57  ;;  %v5060_v6 = vmul.f32 -0.5, %v1200_v9  ;;  %v5062_v15 = vmul.f32 -0.5, %v1201_v63 }
 0x16a   :  { %v3532_v12 = vpop.eup %3531  ;;  %v2402_v22 = vadd.f32 %v4680_v59, %v2335_v17  ;;  %v1469_v33 = vsub.f32 %v5010_v4, %v5058_v53  ;;  %v1808_v39 = vmul.f32 0.5, %v3530_v62  ;;  %3545 = vpow2.f32 %v1981_v23  ;;  %v185_v53 = vld [vmem:[#allocation8 + $0x158] sm:$0xff] }
 0x16b   :  { %v3534_v44 = vpop.eup %3533  ;;  %v746_v55 = vsel %vm745_vm5, %v743_v52, %v740_v43  ;;  %3547 = vlog2.f32 %v747_v32  ;;  %v751_v30 = vadd.f32 1.0, %v750_v35  ;;  %v753_v60 = vand.u32 2147483647, %v3524_v56 }
 0x16c   :  { %v3536_v1 = vpop.eup %3535  ;;  %v2403_v9 = vadd.f32 %v2402_v22, %v4686_v49  ;;  %v2081_v63 = vmul.f32 0.5, %v3534_v44  ;;  %v1062_v25 = vmul.f32 %v746_v55, %v5006_v54  ;;  %3549 = vlog2.f32 %v746_v55 }
 0x16d   :  { %v756_v59 = vadd.f32 1.0, %v3532_v12  ;;  %v759_v50 = vmul.f32 -0.5, %v3532_v12  ;;  %v762_v41 = vand.u32 2147483647, %v3532_v12  ;;  %v360_v34 = vmul.f32 1.442695, %v183_v11 }
 0x16e   :  { %v3538_v57 = vpop.eup %3537  ;;  %v2404_v23 = vadd.f32 %v2403_v9, %v4692_v58  ;;  %v2149_v17 = vadd.f32 %v2081_v63, %v1808_v39  ;;  %v5070_v62 = vadd.f32 %v1062_v25, %v110_v51  ;;  %v765_v52 = vadd.f32 1.0, %v3536_v1 }
 0x16f   :  { %v2246_v32 = vmul.f32 0.6931472, %v3538_v57  ;;  %v752_v35 = vmul.f32 %v3524_v56, %v751_v30  ;;  %vm5072_vm6 = vcmp.lt.f32.partialorder %v753_v60, 0.0004427343  ;;  %3551 = vlog2.f32 %v756_v59 }
 0x170   :  { %v3540_v49 = vpop.eup %3539  ;;  %v2405_v54 = vadd.f32 %v2404_v23, %v4720_v40  ;;  %3553 = vlog2.f32 %v2149_v17  ;;  %v1538_v22 = vmul.f32 %v5070_v62, %v5070_v62  ;;  %v768_v11 = vmul.f32 -0.5, %v3536_v1 }
 0x171   :  { %v3542_v58 = vpop.eup %3541  ;;  %v5082_v39 = vsub.f32 %v1465_v14, %v2246_v32  ;;  %v760_v56 = vadd.f32 1.0, %v759_v50  ;;  %vm5084_vm7 = vcmp.lt.f32.partialorder %v762_v41, 0.0004427343  ;;  %3555 = vlog2.f32 %v765_v52 }
 0x172   :  { %v2406_v51 = vadd.f32 %v2405_v54, %v4760_v47  ;;  %v1809_v40 = vmul.f32 0.5, %v3542_v58  ;;  %v1606_v55 = vmul.f32 -0.5, %v1538_v22  ;;  %v771_v30 = vand.u32 2147483647, %v3536_v1  ;;  %v184_v54 = vld [vmem:[#allocation8 + $0x150] sm:$0xff] }
 0x173   :  { %v3544_v60 = vpop.eup %3543  ;;  %v769_v9 = vadd.f32 1.0, %v768_v11  ;;  %3557 = vpow2.f32 %v360_v34  ;;  %v774_v63 = vadd.f32 1.0, %v3540_v49  ;;  %v777_v25 = vmul.f32 -0.5, %v3540_v49 }
 0x174   :  { %v3546_v59 = vpop.eup %3545  ;;  %v2407_v13 = vadd.f32 %v2406_v51, %v4819_v38  ;;  %v2248_v19 = vmul.f32 0.6931472, %v3544_v60  ;;  %v1710_v14 = vmul.f32 1.442695, %v1606_v55  ;;  %v1879_v50 = vmul.f32 250000.0, %v1606_v55 }
 0x175   :  { %v3548_v41 = vpop.eup %3547  ;;  %v2082_v57 = vmul.f32 0.5, %v3546_v59  ;;  %v761_v23 = vmul.f32 %v3532_v12, %v760_v56  ;;  %3559 = vlog2.f32 %v774_v63  ;;  %v778_v17 = vadd.f32 1.0, %v777_v25  ;;  %v111_v56 = vld [vmem:[#allocation6 + $0x128] sm:$0xff] }
 0x176   :  { %v3550_v47 = vpop.eup %3549  ;;  %v2408_v52 = vadd.f32 %v2407_v13, %v4826_v20  ;;  %v5094_v34 = vsub.f32 %v1466_v21, %v2248_v19  ;;  %v749_v32 = vmul.f32 0.6931472, %v3548_v41  ;;  %3561 = vpow2.f32 %v1710_v14 }
 0x177   :  { %v2150_v38 = vadd.f32 %v2082_v57, %v1809_v40  ;;  %v5096_v22 = vmul.f32 0.6931472, %v3550_v47  ;;  %v1983_v11 = vmul.f32 1.442695, %v1879_v50  ;;  %vm5098_vm8 = vcmp.lt.f32.partialorder %v771_v30, 0.0004427343 }
 0x178   :  { %v2409_v12 = vadd.f32 %v2408_v52, %v4831_v29  ;;  %v755_v20 = vsel %vm5072_vm6, %v752_v35, %v749_v32  ;;  %v770_v27 = vmul.f32 %v3536_v1, %v769_v9  ;;  %v780_v8 = vand.u32 2147483647, %v3540_v49  ;;  %v112_v35 = vld [vmem:[#allocation6 + $0x130] sm:$0xff]  ;;  %v250_v1 = vld [vmem:[#allocation9 + $0x140] sm:$0xff] }
 0x179   :  { %v3552_v21 = vpop.eup %3551  ;;  %3563 = vlog2.f32 %v2150_v38  ;;  %v1063_v51 = vmul.f32 %v755_v20, %v5016_v46  ;;  %v1470_v40 = vsub.f32 %v5026_v48, %v5096_v22  ;;  %v362_v55 = vmul.f32 1.442695, %v184_v54 }
 0x17a   :  { %v3554_v30 = vpop.eup %3553  ;;  %v2410_v60 = vadd.f32 %v2409_v12, %v4838_v37  ;;  %3565 = vlog2.f32 %v755_v20  ;;  %v758_v63 = vmul.f32 0.6931472, %v3552_v21  ;;  %v779_v29 = vmul.f32 %v3540_v49, %v778_v17 }
 0x17b   :  { %v3556_v25 = vpop.eup %3555  ;;  %v2252_v59 = vmul.f32 0.6931472, %v3554_v30  ;;  %v1131_v43 = vadd.f32 %v1063_v51, %v111_v56  ;;  %3567 = vpow2.f32 %v1983_v11  ;;  %vm5109_vm9 = vcmp.lt.f32.partialorder %v780_v8, 0.0004427343 }
 0x17c   :  { %v2411_v46 = vadd.f32 %v2410_v60, %v4932_v26  ;;  %v764_v9 = vsel %vm5084_vm7, %v761_v23, %v758_v63  ;;  %v767_v13 = vmul.f32 0.6931472, %v3556_v25  ;;  %3569 = vpow2.f32 %v362_v55  ;;  %v113_v26 = vld [vmem:[#allocation6 + $0x138] sm:$0xff] }
 0x17d   :  { %v3558_v37 = vpop.eup %3557  ;;  %v5119_v49 = vsub.f32 %v1468_v2, %v2252_v59  ;;  %v1539_v19 = vmul.f32 %v1131_v43, %v1131_v43  ;;  %v3062_v14 = vpack.c.bf16 %v1131_v43, %v5070_v62  ;;  %v1064_v50 = vmul.f32 %v764_v9, %v5036_v28 }
 0x17e   :  { %v2412_v41 = vadd.f32 %v2411_v46, %v4937_v61  ;;  %v773_v44 = vsel %vm5098_vm8, %v770_v27, %v767_v13  ;;  %3571 = vlog2.f32 %v764_v9  ;;  %v783_v57 = vadd.f32 1.0, %v3558_v37 }
 0x17f   :  { %v3560_v23 = vpop.eup %3559  ;;  %v1607_v17 = vmul.f32 -0.5, %v1539_v19  ;;  %3063 = vmatpush3.bf16.msra.mxu0 %v3062_v14  ;;  %v1065_v10 = vmul.f32 %v773_v44, %v5038_v45  ;;  %v1132_v5 = vadd.f32 %v1064_v50, %v112_v35  ;;  %3573 = vlog2.f32 %v773_v44  ;;  %v114_v14 = vld [vmem:[#allocation6 + $0x140] sm:$0xff] }
 0x180   :  { %v3562_v2 = vpop.eup %3561  ;;  %v2413_v62 = vadd.f32 %v2412_v41, %v4955_v36  ;;  %3064 = vmatprep.subr.bf16.mxu0 %v4071_v0  ;;  %v776_v28 = vmul.f32 0.6931472, %v3560_v23  ;;  %3575 = vlog2.f32 %v783_v57  ;;  %v786_v61 = vmul.f32 -0.5, %v3558_v37 }
 0x181   :  { %v1712_v47 = vmul.f32 1.442695, %v1607_v17  ;;  %v1810_v52 = vmul.f32 0.5, %v3562_v2  ;;  %v1880_v32 = vmul.f32 250000.0, %v1607_v17  ;;  %v1133_v54 = vadd.f32 %v1065_v10, %v113_v26  ;;  %v251_v10 = vld [vmem:[#allocation9 + $0x148] sm:$0xff] }
 0x182   :  { %v2414_v38 = vadd.f32 %v2413_v62, %v4962_v31  ;;  %v1540_v11 = vmul.f32 %v1132_v5, %v1132_v5  ;;  %v782_v45 = vsel %vm5109_vm9, %v779_v29, %v776_v28  ;;  %v787_v58 = vadd.f32 1.0, %v786_v61 }
 0x183   :  { %v3564_v12 = vpop.eup %3563  ;;  %3577 = vpow2.f32 %v1712_v47  ;;  %v1985_v56 = vmul.f32 1.442695, %v1880_v32  ;;  %v1541_v36 = vmul.f32 %v1133_v54, %v1133_v54  ;;  %v3065_v20 = vpack.c.bf16 %v1133_v54, %v1132_v5  ;;  %v115_v47 = vld [vmem:[#allocation6 + $0x148] sm:$0xff] }
 0x184   :  { %v3566_v27 = vpop.eup %3565  ;;  %v2415_v8 = vadd.f32 %v2414_v38, %v5031_v18  ;;  %v2254_v21 = vmul.f32 0.6931472, %v3564_v12  ;;  %v1608_v51 = vmul.f32 -0.5, %v1540_v11  ;;  %v788_v55 = vmul.f32 %v3558_v37, %v787_v58  ;;  %v186_v58 = vld [vmem:[#allocation8 + $0x160] sm:$0xff] }
 0x185   :  { %v3568_v30 = vpop.eup %3567  ;;  %v5133_v60 = vmul.f32 0.6931472, %v3566_v27  ;;  %3579 = vpow2.f32 %v1985_v56  ;;  %v1609_v31 = vmul.f32 -0.5, %v1541_v36  ;;  %3066 = vmatpush3.bf16.msra.mxu0 %v3065_v20  ;;  %v789_v63 = vand.u32 2147483647, %v3558_v37 }
 0x186   :  { %v5135_v29 = vpop.eup %3569  ;;  %v2416_v25 = vadd.f32 %v2415_v8, %v5050_v7  ;;  %v5141_v59 = vsub.f32 %v1469_v33, %v2254_v21  ;;  %v2083_v18 = vmul.f32 0.5, %v3568_v30  ;;  %v1714_v43 = vmul.f32 1.442695, %v1608_v51  ;;  %3067 = vmatprep.subr.bf16.mxu0 %v4071_v0  ;;  %v187_v8 = vld [vmem:[#allocation8 + $0x168] sm:$0xff] }
 0x187   :  { %v1471_v46 = vsub.f32 %v5053_v3, %v5133_v60  ;;  %v1716_v35 = vmul.f32 1.442695, %v1609_v31  ;;  %v1881_v9 = vmul.f32 250000.0, %v1608_v51  ;;  %v1882_v13 = vmul.f32 250000.0, %v1609_v31 }
 0x188   :  { %v3572_v37 = vpop.eup %3571  ;;  %v2417_v19 = vadd.f32 %v2416_v25, %v5082_v39  ;;  %v2151_v7 = vadd.f32 %v2083_v18, %v1810_v52  ;;  %3581 = vpow2.f32 %v1714_v43  ;;  %vm5147_vm10 = vcmp.lt.f32.partialorder %v789_v63, 0.0004427343 }
 0x189   :  { %v3574_v33 = vpop.eup %3573  ;;  %v5151_v50 = vmul.f32 0.6931472, %v3572_v37  ;;  %3583 = vpow2.f32 %v1716_v35  ;;  %v1987_v41 = vmul.f32 1.442695, %v1881_v9  ;;  %v1989_v26 = vmul.f32 1.442695, %v1882_v13 }
 0x18a   :  { %v3576_v44 = vpop.eup %3575  ;;  %v5154_v57 = vadd.f32 %v2417_v19, %v5094_v34  ;;  %3585 = vlog2.f32 %v2151_v7  ;;  %v5156_v39 = vmul.f32 0.6931472, %v3574_v33  ;;  %v1066_v23 = vmul.f32 %v782_v45, %v250_v1 }
 0x18b   :  { %v1472_v17 = vsub.f32 %v5060_v6, %v5151_v50  ;;  %3587 = vpow2.f32 %v1987_v41  ;;  %v785_v5 = vmul.f32 0.6931472, %v3576_v44  ;;  %v364_v2 = vmul.f32 1.442695, %v185_v53  ;;  %v117_v50 = vld [vmem:[#allocation6 + $0x158] sm:$0xff] }
 0x18c   :  { %v1473_v62 = vsub.f32 %v5062_v15, %v5156_v39  ;;  %3589 = vpow2.f32 %v1989_v26  ;;  %v1134_v28 = vadd.f32 %v1066_v23, %v114_v14  ;;  %v792_v61 = vadd.f32 1.0, %v5135_v29 }
 0x18d   :  { %v3578_v34 = vpop.eup %3577  ;;  %v791_v52 = vsel %vm5147_vm10, %v788_v55, %v785_v5  ;;  %v1202_v32 = vmul.f32 %v250_v1, %v250_v1  ;;  %3591 = vlog2.f32 %v782_v45  ;;  %v2467_v56 = vshrl.u32 %v2466_v24, 7 }
 0x18e   :  { %v1811_v54 = vmul.f32 0.5, %v3578_v34  ;;  %v1067_v38 = vmul.f32 %v791_v52, %v251_v10  ;;  %3593 = vlog2.f32 %v791_v52  ;;  %v1542_v11 = vmul.f32 %v1134_v28, %v1134_v28  ;;  %v188_v52 = vld [vmem:[#allocation8 + $0x170] sm:$0xff] }
 0x18f   :  { %v3580_v12 = vpop.eup %3579  ;;  %3595 = vpow2.f32 %v364_v2  ;;  %v1203_v21 = vmul.f32 %v251_v10, %v251_v10  ;;  %v5166_v51 = vmul.f32 -0.5, %v1202_v32  ;;  %v795_v55 = vmul.f32 -0.5, %v5135_v29 }
 0x190   :  { %v2084_v36 = vmul.f32 0.5, %v3580_v12  ;;  %v1135_v20 = vadd.f32 %v1067_v38, %v115_v47  ;;  %v1610_v27 = vmul.f32 -0.5, %v1542_v11  ;;  %3597 = vlog2.f32 %v792_v61  ;;  %v252_v12 = vld [vmem:[#allocation9 + $0x150] sm:$0xff] }
 0x191   :  { %v366_v45 = vmul.f32 1.442695, %v186_v58  ;;  %v798_v24 = vand.u32 2147483647, %v5135_v29  ;;  %v368_v35 = vmul.f32 1.442695, %v187_v8 }
 0x192   :  { %v3582_v30 = vpop.eup %3581  ;;  %v2152_v31 = vadd.f32 %v2084_v36, %v1811_v54  ;;  %v1543_v63 = vmul.f32 %v1135_v20, %v1135_v20  ;;  %v1718_v25 = vmul.f32 1.442695, %v1610_v27  ;;  %v1883_v18 = vmul.f32 250000.0, %v1610_v27  ;;  %v189_v8 = vld [vmem:[#allocation8 + $0x178] sm:$0xff] }
 0x193   :  { %v3584_v43 = vpop.eup %3583  ;;  %v3068_v1 = vpack.c.bf16 %v1135_v20, %v1134_v28  ;;  %3599 = vpow2.f32 %v366_v45  ;;  %v1812_v13 = vmul.f32 0.5, %v3582_v30  ;;  %v796_v53 = vadd.f32 1.0, %v795_v55 }
 0x194   :  { %v3586_v9 = vpop.eup %3585  ;;  %3601 = vlog2.f32 %v2152_v31  ;;  %v1611_v37 = vmul.f32 -0.5, %v1543_v63  ;;  %v1991_v19 = vmul.f32 1.442695, %v1883_v18  ;;  %v1813_v4 = vmul.f32 0.5, %v3584_v43 }
 0x195   :  { %v3588_v7 = vpop.eup %3587  ;;  %v2256_v14 = vmul.f32 0.6931472, %v3586_v9  ;;  %3603 = vpow2.f32 %v1718_v25  ;;  %3069 = vmatpush3.bf16.msra.mxu0 %v3068_v1  ;;  %v5176_v2 = vmul.f32 -0.5, %v1203_v21  ;;  %v797_v48 = vmul.f32 %v5135_v29, %v796_v53  ;;  %v116_v21 = vld [vmem:[#allocation6 + $0x150] sm:$0xff] }
 0x196   :  { %v3590_v33 = vpop.eup %3589  ;;  %v2085_v41 = vmul.f32 0.5, %v3588_v7  ;;  %v1720_v26 = vmul.f32 1.442695, %v1611_v37  ;;  %v1884_v44 = vmul.f32 250000.0, %v1611_v37  ;;  %3605 = vpow2.f32 %v1991_v19  ;;  %3070 = vmatprep.subr.bf16.mxu0 %v4071_v0 }
 0x197   :  { %v3592_v23 = vpop.eup %3591  ;;  %v5174_v10 = vsub.f32 %v1470_v40, %v2256_v14  ;;  %v2086_v5 = vmul.f32 0.5, %v3590_v33  ;;  %3607 = vpow2.f32 %v368_v35  ;;  %vm799_vm11 = vcmp.lt.f32.partialorder %v798_v24, 0.0004427343 }
 0x198   :  { %v3594_v28 = vpop.eup %3593  ;;  %v2153_v61 = vadd.f32 %v2085_v41, %v1812_v13  ;;  %v5178_v34 = vmul.f32 0.6931472, %v3592_v23  ;;  %3609 = vpow2.f32 %v1720_v26  ;;  %v1993_v47 = vmul.f32 1.442695, %v1884_v44  ;;  %v253_v13 = vld [vmem:[#allocation9 + $0x158] sm:$0xff] }
 0x199   :  { %v5180_v32 = vpop.eup %3595  ;;  %v2154_v54 = vadd.f32 %v2086_v5, %v1813_v4  ;;  %v5182_v38 = vmul.f32 0.6931472, %v3594_v28  ;;  %v370_v20 = vmul.f32 1.442695, %v188_v52  ;;  %v5190_v27 = vsub.s32 0, %v2467_v56 }
 0x19a   :  { %v3598_v22 = vpop.eup %3597  ;;  %3611 = vlog2.f32 %v2153_v61  ;;  %v1474_v40 = vsub.f32 %v5166_v51, %v5178_v34  ;;  %v801_v11 = vadd.f32 1.0, %v5180_v32  ;;  %v804_v45 = vmul.f32 -0.5, %v5180_v32 }
 0x19b   :  { %3613 = vlog2.f32 %v2154_v54  ;;  %v1475_v58 = vsub.f32 %v5176_v2, %v5182_v38  ;;  %v794_v36 = vmul.f32 0.6931472, %v3598_v22  ;;  %v1204_v30 = vmul.f32 %v252_v12, %v252_v12 }
 0x19c   :  { %3615 = vpow2.f32 %v1993_v47  ;;  %v807_v63 = vand.u32 2147483647, %v5180_v32  ;;  %v372_v56 = vmul.f32 1.442695, %v189_v8  ;;  %v2469_v14 = vrot.slane %v4922_v42, %v5190_v27 }
 0x19d   :  { %v3600_v29 = vpop.eup %3599  ;;  %v800_v55 = vsel %vm799_vm11, %v797_v48, %v794_v36  ;;  %3617 = vlog2.f32 %v801_v11  ;;  %v1205_v33 = vmul.f32 %v253_v13, %v253_v13  ;;  %v805_v26 = vadd.f32 1.0, %v804_v45 }
 0x19e   :  { %v3602_v31 = vpop.eup %3601  ;;  %v1068_v25 = vmul.f32 %v800_v55, %v252_v12  ;;  %3619 = vlog2.f32 %v800_v55  ;;  %v810_v18 = vadd.f32 1.0, %v3600_v29  ;;  %v813_v24 = vmul.f32 -0.5, %v3600_v29 }
 0x19f   :  { %v3604_v43 = vpop.eup %3603  ;;  %v2258_v1 = vmul.f32 0.6931472, %v3602_v31  ;;  %3621 = vpow2.f32 %v370_v20  ;;  %v816_v19 = vand.u32 2147483647, %v3600_v29  ;;  %vm5208_vm12 = vcmp.lt.f32.partialorder %v807_v63, 0.0004427343 }
 0x1a0   :  { %v3606_v35 = vpop.eup %3605  ;;  %v1814_v9 = vmul.f32 0.5, %v3604_v43  ;;  %v5194_v37 = vadd.f32 %v1068_v25, %v116_v21  ;;  %3623 = vlog2.f32 %v810_v18  ;;  %v814_v23 = vadd.f32 1.0, %v813_v24 }
 0x1a1   :  { %v5196_v7 = vpop.eup %3607  ;;  %v5203_v4 = vsub.f32 %v1471_v46, %v2258_v1  ;;  %v2087_v53 = vmul.f32 0.5, %v3606_v35  ;;  %v5212_v42 = vmul.f32 -0.5, %v1204_v30  ;;  %3625 = vpow2.f32 %v372_v56 }
 0x1a2   :  { %v3610_v41 = vpop.eup %3609  ;;  %v1544_v44 = vmul.f32 %v5194_v37, %v5194_v37  ;;  %v819_v5 = vadd.f32 1.0, %v5196_v7  ;;  %vm5214_vm13 = vcmp.lt.f32.partialorder %v816_v19, 0.0004427343  ;;  %v822_v47 = vmul.f32 -0.5, %v5196_v7 }
 0x1a3   :  { %v2155_v28 = vadd.f32 %v2087_v53, %v1814_v9  ;;  %v1815_v48 = vmul.f32 0.5, %v3610_v41  ;;  %v825_v22 = vand.u32 2147483647, %v5196_v7  ;;  %v806_v20 = vmul.f32 %v5180_v32, %v805_v26  ;;  %v254_v53 = vld [vmem:[#allocation9 + $0x160] sm:$0xff]  ;;  %v255_v26 = vld [vmem:[#allocation9 + $0x168] sm:$0xff] }
 0x1a4   :  { %v3612_v3 = vpop.eup %3611  ;;  %v1612_v60 = vmul.f32 -0.5, %v1544_v44  ;;  %3627 = vlog2.f32 %v819_v5  ;;  %v815_v21 = vmul.f32 %v3600_v29, %v814_v23  ;;  %v823_v32 = vadd.f32 1.0, %v822_v47  ;;  %v256_v47 = vld [vmem:[#allocation9 + $0x170] sm:$0xff] }
 0x1a5   :  { %v3614_v52 = vpop.eup %3613  ;;  %v2260_v54 = vmul.f32 0.6931472, %v3612_v3  ;;  %3629 = vlog2.f32 %v2155_v28  ;;  %v5237_v41 = vmul.f32 -0.5, %v1205_v33  ;;  %v1206_v23 = vmul.f32 %v254_v53, %v254_v53 }
 0x1a6   :  { %v3616_v11 = vpop.eup %3615  ;;  %v2536_v12 = vpop.f32.mrb[0].mxu0  ;;  %v2262_v36 = vmul.f32 0.6931472, %v3614_v52  ;;  %v1722_v8 = vmul.f32 1.442695, %v1612_v60  ;;  %v824_v61 = vmul.f32 %v5196_v7, %v823_v32  ;;  %v5242_v3 = vmul.f32 %v255_v26, %v255_v26 }
 0x1a7   :  { %v3618_v55 = vpop.eup %3617  ;;  %v2537_v45 = vadd.f32 %v2536_v12, %v2469_v14  ;;  %v2904_v30 = vpop.f32.mrb[1].mxu0  ;;  %v5224_v31 = vsub.f32 %v1472_v17, %v2260_v54  ;;  %v2088_v63 = vmul.f32 0.5, %v3616_v11  ;;  %v1885_v25 = vmul.f32 250000.0, %v1612_v60  ;;  %v118_v60 = vld [vmem:[#allocation6 + $0x160] sm:$0xff] }
 0x1a8   :  { %v3620_v18 = vpop.eup %3619  ;;  %v5229_v43 = vsub.f32 %v1473_v62, %v2262_v36  ;;  %v803_v1 = vmul.f32 0.6931472, %v3618_v55  ;;  %3631 = vpow2.f32 %v1722_v8  ;;  %vm5248_vm0 = vcmp.lt.f32.partialorder %v825_v22, 0.0004427343  ;;  %v175_v36 = vld [vmem:[#allocation8 + $0x108] sm:$0xff] }
 0x1a9   :  { %v3622_v29 = vpop.eup %3621  ;;  %v2541_v24 = vmul.f32 0.01, %v2537_v45  ;;  %vm2540_vm15 = vcmp.ge.f32.partialorder %v2537_v45, 0.0  ;;  %v2156_v56 = vadd.f32 %v2088_v63, %v1815_v48  ;;  %v5231_v35 = vmul.f32 0.6931472, %v3620_v18  ;;  %v119_v22 = vld [vmem:[#allocation6 + $0x168] sm:$0xff] }
 0x1aa   :  { %v3624_v6 = vpop.eup %3623  ;;  %v809_v17 = vsel %vm5208_vm12, %v806_v20, %v803_v1  ;;  %v1995_v9 = vmul.f32 1.442695, %v1885_v25  ;;  %v828_v19 = vadd.f32 1.0, %v3622_v29  ;;  %v831_v14 = vmul.f32 -0.5, %v3622_v29 }
 0x1ab   :  { %v2542_v15 = vsel %vm2540_vm15, %v2537_v45, %v2541_v24  ;;  %3633 = vlog2.f32 %v2156_v56  ;;  %v1069_v39 = vmul.f32 %v809_v17, %v253_v13  ;;  %v1476_v62 = vsub.f32 %v5212_v42, %v5231_v35  ;;  %v5239_v5 = vpop.eup %3625 }
 0x1ac   :  { %2938 = vmatmul.mubr.f32.vlgmr.msra.gmra.mrb[0].mxu1 %v2542_v15  ;;  %3635 = vlog2.f32 %v809_v17  ;;  %v812_v44 = vmul.f32 0.6931472, %v3624_v6  ;;  %v832_v52 = vadd.f32 1.0, %v831_v14  ;;  %v837_v8 = vadd.f32 1.0, %v5239_v5  ;;  %v121_v6 = vld [vmem:[#allocation6 + $0x178] sm:$0xff] }
 0x1ad   :  { %v1137_v28 = vadd.f32 %v1069_v39, %v117_v50  ;;  %3637 = vpow2.f32 %v1995_v9  ;;  %3007 = vmatprep.mubr.msk.f32.mxu1 %vm4072_vm14, %v4073_v16  ;;  %v834_v16 = vand.u32 2147483647, %v3622_v29  ;;  %v5256_v45 = vmul.f32 -0.5, %v1206_v23 }
 0x1ae   :  { %v3628_v13 = vpop.eup %3627  ;;  %v818_v33 = vsel %vm5214_vm13, %v815_v21, %v812_v44  ;;  %3639 = vlog2.f32 %v828_v19  ;;  %v344_v25 = vmul.f32 1.442695, %v175_v36  ;;  %v833_v24 = vmul.f32 %v3622_v29, %v832_v52 }
 0x1af   :  { %v3630_v54 = vpop.eup %3629  ;;  %v1545_v48 = vmul.f32 %v1137_v28, %v1137_v28  ;;  %v3071_v7 = vpack.c.bf16 %v1137_v28, %v5194_v37  ;;  %v821_v11 = vmul.f32 0.6931472, %v3628_v13  ;;  %v1070_v12 = vmul.f32 %v818_v33, %v254_v53 }
 0x1b0   :  { %v2264_v20 = vmul.f32 0.6931472, %v3630_v54  ;;  %3641 = vlog2.f32 %v818_v33  ;;  %vm5264_vm14 = vcmp.lt.f32.partialorder %v834_v16, 0.0004427343  ;;  %v840_v50 = vmul.f32 -0.5, %v5239_v5 }
 0x1b1   :  { %v1613_v46 = vmul.f32 -0.5, %v1545_v48  ;;  %3072 = vmatpush3.bf16.msra.mxu0 %v3071_v7  ;;  %v827_v21 = vsel %vm5248_vm0, %v824_v61, %v821_v11  ;;  %v1138_v55 = vadd.f32 %v1070_v12, %v118_v60  ;;  %v843_v2 = vand.u32 2147483647, %v5239_v5  ;;  %v120_v12 = vld [vmem:[#allocation6 + $0x170] sm:$0xff] }
 0x1b2   :  { %v3632_v30 = vpop.eup %3631  ;;  %v5261_v37 = vsub.f32 %v1474_v40, %v2264_v20  ;;  %3073 = vmatprep.subr.bf16.mxu0 %v4071_v0  ;;  %v1071_v63 = vmul.f32 %v827_v21, %v255_v26  ;;  %3643 = vlog2.f32 %v827_v21  ;;  %v841_v13 = vadd.f32 1.0, %v840_v50 }
 0x1b3   :  { %v1724_v18 = vmul.f32 1.442695, %v1613_v46  ;;  %v1886_v1 = vmul.f32 250000.0, %v1613_v46  ;;  %v1546_v32 = vmul.f32 %v1138_v55, %v1138_v55  ;;  %3645 = vlog2.f32 %v837_v8 }
 0x1b4   :  { %v1139_v56 = vadd.f32 %v1071_v63, %v119_v22  ;;  %v1816_v34 = vmul.f32 0.5, %v3632_v30  ;;  %v5281_v38 = vmul.f32 -0.5, %v5242_v3  ;;  %v842_v3 = vmul.f32 %v5239_v5, %v841_v13 }
 0x1b5   :  { %v3634_v51 = vpop.eup %3633  ;;  %3647 = vpow2.f32 %v1724_v18  ;;  %v1997_v40 = vmul.f32 1.442695, %v1886_v1  ;;  %v1614_v17 = vmul.f32 -0.5, %v1546_v32  ;;  %vm844_vm1 = vcmp.lt.f32.partialorder %v843_v2, 0.0004427343 }
 0x1b6   :  { %v3636_v9 = vpop.eup %3635  ;;  %v2266_v19 = vmul.f32 0.6931472, %v3634_v51  ;;  %v1547_v14 = vmul.f32 %v1139_v56, %v1139_v56  ;;  %v3074_v15 = vpack.c.bf16 %v1139_v56, %v1138_v55  ;;  %3649 = vpow2.f32 %v344_v25  ;;  %v257_v25 = vld [vmem:[#allocation9 + $0x178] sm:$0xff] }
 0x1b7   :  { %v3638_v39 = vpop.eup %3637  ;;  %v5269_v29 = vmul.f32 0.6931472, %v3636_v9  ;;  %3651 = vpow2.f32 %v1997_v40  ;;  %v1726_v53 = vmul.f32 1.442695, %v1614_v17  ;;  %v1887_v26 = vmul.f32 250000.0, %v1614_v17 }
 0x1b8   :  { %v3640_v44 = vpop.eup %3639  ;;  %v5274_v23 = vsub.f32 %v1475_v58, %v2266_v19  ;;  %v2089_v28 = vmul.f32 0.5, %v3638_v39  ;;  %v1615_v61 = vmul.f32 -0.5, %v1547_v14  ;;  %3075 = vmatpush3.bf16.msra.mxu0 %v3074_v15  ;;  %v1208_v9 = vmul.f32 %v256_v47, %v256_v47 }
 0x1b9   :  { %v1477_v60 = vsub.f32 %v5237_v41, %v5269_v29  ;;  %3653 = vpow2.f32 %v1726_v53  ;;  %v1999_v33 = vmul.f32 1.442695, %v1887_v26  ;;  %3076 = vmatprep.subr.bf16.mxu0 %v4071_v0  ;;  %v830_v52 = vmul.f32 0.6931472, %v3640_v44 }
 0x1ba   :  { %v3642_v54 = vpop.eup %3641  ;;  %v2157_v48 = vadd.f32 %v2089_v28, %v1816_v34  ;;  %v1728_v7 = vmul.f32 1.442695, %v1615_v61  ;;  %v1888_v11 = vmul.f32 250000.0, %v1615_v61  ;;  %v1209_v44 = vmul.f32 %v257_v25, %v257_v25 }
 0x1bb   :  { %v5283_v58 = vmul.f32 0.6931472, %v3642_v54  ;;  %3655 = vpow2.f32 %v1999_v33  ;;  %v836_v36 = vsel %vm5264_vm14, %v833_v24, %v830_v52 }
 0x1bc   :  { %v3644_v20 = vpop.eup %3643  ;;  %3657 = vlog2.f32 %v2157_v48  ;;  %v2001_v16 = vmul.f32 1.442695, %v1888_v11  ;;  %v1072_v8 = vmul.f32 %v836_v36, %v256_v47 }
 0x1bd   :  { %v5287_v46 = vmul.f32 0.6931472, %v3644_v20  ;;  %v1478_v22 = vsub.f32 %v5256_v45, %v5283_v58  ;;  %3659 = vpow2.f32 %v1728_v7  ;;  %v3646_v21 = vpop.eup %3645  ;;  %v5294_v7 = vmul.f32 -0.5, %v1208_v9  ;;  %v190_v45 = vld [vmem:[#allocation8 + $0x180] sm:$0xff]  ;;  %v191_v58 = vld [vmem:[#allocation8 + $0x188] sm:$0xff] }
 0x1be   :  { %3661 = vpow2.f32 %v2001_v16  ;;  %v1140_v55 = vadd.f32 %v1072_v8, %v120_v12  ;;  %v839_v18 = vmul.f32 0.6931472, %v3646_v21 }
 0x1bf   :  { %v3648_v30 = vpop.eup %3647  ;;  %v1479_v63 = vsub.f32 %v5281_v38, %v5287_v46  ;;  %3663 = vlog2.f32 %v836_v36 }
 0x1c0   :  { %v3650_v1 = vpop.eup %3649  ;;  %v1817_v32 = vmul.f32 0.5, %v3648_v30  ;;  %v1548_v24 = vmul.f32 %v1140_v55, %v1140_v55  ;;  %v845_v50 = vsel %vm844_vm1, %v842_v3, %v839_v18 }
 0x1c1   :  { %v3652_v56 = vpop.eup %3651  ;;  %v711_v51 = vadd.f32 1.0, %v3650_v1  ;;  %v1073_v5 = vmul.f32 %v845_v50, %v257_v25  ;;  %3665 = vlog2.f32 %v845_v50  ;;  %v714_v19 = vmul.f32 -0.5, %v3650_v1  ;;  %v243_v50 = vld [vmem:[#allocation9 + $0x108] sm:$0xff] }
 0x1c2   :  { %v2090_v34 = vmul.f32 0.5, %v3652_v56  ;;  %v1616_v40 = vmul.f32 -0.5, %v1548_v24  ;;  %v717_v21 = vand.u32 2147483647, %v3650_v1 }
 0x1c3   :  { %v3654_v17 = vpop.eup %3653  ;;  %3667 = vlog2.f32 %v711_v51  ;;  %v1141_v39 = vadd.f32 %v1073_v5, %v121_v6  ;;  %v715_v20 = vadd.f32 1.0, %v714_v19 }
 0x1c4   :  { %v2158_v14 = vadd.f32 %v2090_v34, %v1817_v32  ;;  %v1818_v15 = vmul.f32 0.5, %v3654_v17  ;;  %v1730_v53 = vmul.f32 1.442695, %v1616_v40  ;;  %v1889_v28 = vmul.f32 250000.0, %v1616_v40  ;;  %v107_v40 = vld [vmem:[#allocation6 + $0x108] sm:$0xff] }
 0x1c5   :  { %v3656_v26 = vpop.eup %3655  ;;  %v1549_v33 = vmul.f32 %v1141_v39, %v1141_v39  ;;  %v3077_v52 = vpack.c.bf16 %v1141_v39, %v1140_v55  ;;  %v5302_v32 = vmul.f32 -0.5, %v1209_v44  ;;  %v716_v42 = vmul.f32 %v3650_v1, %v715_v20 }
 0x1c6   :  { %v3658_v61 = vpop.eup %3657  ;;  %3669 = vlog2.f32 %v2158_v14  ;;  %v2091_v13 = vmul.f32 0.5, %v3656_v26  ;;  %v2003_v47 = vmul.f32 1.442695, %v1889_v28  ;;  %vm718_vm2 = vcmp.lt.f32.partialorder %v717_v21, 0.0004427343 }
 0x1c7   :  { %v3660_v54 = vpop.eup %3659  ;;  %v2268_v48 = vmul.f32 0.6931472, %v3658_v61  ;;  %3671 = vpow2.f32 %v1730_v53  ;;  %v1617_v36 = vmul.f32 -0.5, %v1549_v33  ;;  %3078 = vmatpush3.bf16.msra.mxu0 %v3077_v52  ;;  %v376_v20 = vmul.f32 1.442695, %v191_v58 }
 0x1c8   :  { %v3662_v11 = vpop.eup %3661  ;;  %v1819_v2 = vmul.f32 0.5, %v3660_v54  ;;  %v2159_v12 = vadd.f32 %v2091_v13, %v1818_v15  ;;  %3673 = vpow2.f32 %v2003_v47  ;;  %3079 = vmatprep.subr.bf16.mxu0 %v4071_v0 }
 0x1c9   :  { %v3664_v16 = vpop.eup %3663  ;;  %v5299_v8 = vsub.f32 %v1476_v62, %v2268_v48  ;;  %v2092_v3 = vmul.f32 0.5, %v3662_v11  ;;  %v1732_v30 = vmul.f32 1.442695, %v1617_v36  ;;  %v1890_v25 = vmul.f32 250000.0, %v1617_v36 }
 0x1ca   :  { %3675 = vlog2.f32 %v2159_v12  ;;  %v1391_v55 = vmul.f32 0.6931472, %v3664_v16 }
 0x1cb   :  { %v2160_v18 = vadd.f32 %v2092_v3, %v1819_v2  ;;  %v3666_v24 = vpop.eup %3665  ;;  %3677 = vpow2.f32 %v1732_v30  ;;  %v2005_v6 = vmul.f32 1.442695, %v1890_v25 }
 0x1cc   :  { %v1480_v56 = vsub.f32 %v5294_v7, %v1391_v55  ;;  %v1393_v62 = vmul.f32 0.6931472, %v3666_v24 }
 0x1cd   :  { %v3668_v35 = vpop.eup %3667  ;;  %3679 = vlog2.f32 %v2160_v18 }
 0x1ce   :  { %3681 = vpow2.f32 %v2005_v6  ;;  %v713_v51 = vmul.f32 0.6931472, %v3668_v35  ;;  %v1481_v34 = vsub.f32 %v5302_v32, %v1393_v62  ;;  %v1195_v62 = vmul.f32 %v243_v50, %v243_v50 }
 0x1d0   :  { %v3670_v5 = vpop.eup %3669  ;;  %v719_v17 = vsel %vm718_vm2, %v716_v42, %v713_v51 }
 0x1d1   :  { %v3672_v9 = vpop.eup %3671  ;;  %v2270_v19 = vmul.f32 0.6931472, %v3670_v5  ;;  %v1059_v14 = vmul.f32 %v719_v17, %v243_v50 }
 0x1d2   :  { %v1820_v15 = vmul.f32 0.5, %v3672_v9  ;;  %v3674_v39 = vpop.eup %3673 }
 0x1d3   :  { %v5309_v1 = vsub.f32 %v1477_v60, %v2270_v19  ;;  %v5311_v53 = vadd.f32 %v1059_v14, %v107_v40  ;;  %v2093_v44 = vmul.f32 0.5, %v3674_v39 }
 0x1d4   :  { %v3676_v26 = vpop.eup %3675 }
 0x1d5   :  { %v2272_v28 = vmul.f32 0.6931472, %v3676_v26  ;;  %v1535_v61 = vmul.f32 %v5311_v53, %v5311_v53  ;;  %v3678_v13 = vpop.eup %3677  ;;  %v2161_v33 = vadd.f32 %v2093_v44, %v1820_v15 }
 0x1d6   :  { %v1821_v48 = vmul.f32 0.5, %v3678_v13 }
 0x1d7   :  { %v3680_v52 = vpop.eup %3679  ;;  %v5318_v54 = vsub.f32 %v1478_v22, %v2272_v28  ;;  %v1603_v41 = vmul.f32 -0.5, %v1535_v61  ;;  %3683 = vlog2.f32 %v2161_v33  ;;  %v374_v22 = vmul.f32 1.442695, %v190_v45 }
 0x1d8   :  { %v3682_v29 = vpop.eup %3681  ;;  %v2274_v60 = vmul.f32 0.6931472, %v3680_v52 }
 0x1d9   :  { %v2094_v7 = vmul.f32 0.5, %v3682_v29  ;;  %v1704_v47 = vmul.f32 1.442695, %v1603_v41  ;;  %v1876_v11 = vmul.f32 250000.0, %v1603_v41  ;;  %v259_v41 = vld [vmem:[#allocation9 + $0x188] sm:$0xff] }
 0x1da   :  { %v5323_v2 = vsub.f32 %v1479_v63, %v2274_v60 }
 0x1db   :  { %v2162_v12 = vadd.f32 %v2094_v7, %v1821_v48  ;;  %3685 = vpow2.f32 %v1704_v47  ;;  %v1977_v36 = vmul.f32 1.442695, %v1876_v11  ;;  %v258_v48 = vld [vmem:[#allocation9 + $0x180] sm:$0xff] }
 0x1dc   :  { %v122_v11 = vld [vmem:[#allocation6 + $0x180] sm:$0xff] }
 0x1dd   :  { %3687 = vlog2.f32 %v2162_v12  ;;  %v123_v12 = vld [vmem:[#allocation6 + $0x188] sm:$0xff] }
 0x1de   :  { %3689 = vpow2.f32 %v1977_v36 }
 0x1df   :  { %3691 = vpow2.f32 %v374_v22 }
 0x1e0   :  { %3693 = vpow2.f32 %v376_v20 }
 0x1e1   :  { %v3684_v16 = vpop.eup %3683  ;;  %3695 = vlog2.f32 %v719_v17 }
 0x1e2   :  { %v2276_v3 = vmul.f32 0.6931472, %v3684_v16 }
 0x1e4   :  { %v5325_v55 = vsub.f32 %v1480_v56, %v2276_v3  ;;  %v1263_v56 = vmul.f32 -0.5, %v1195_v62 }
 0x1e5   :  { %v3686_v21 = vpop.eup %3685 }
 0x1e6   :  { %v1807_v46 = vmul.f32 0.5, %v3686_v21 }
 0x1e7   :  { %v3688_v38 = vpop.eup %3687 }
 0x1e8   :  { %v3690_v63 = vpop.eup %3689  ;;  %v2278_v30 = vmul.f32 0.6931472, %v3688_v38 }
 0x1e9   :  { %v2080_v25 = vmul.f32 0.5, %v3690_v63  ;;  %v3692_v32 = vpop.eup %3691 }
 0x1ea   :  { %v5327_v18 = vsub.f32 %v1481_v34, %v2278_v30  ;;  %v3694_v6 = vpop.eup %3693  ;;  %v846_v42 = vadd.f32 1.0, %v3692_v32  ;;  %v849_v40 = vmul.f32 -0.5, %v3692_v32  ;;  %v852_v26 = vand.u32 2147483647, %v3692_v32  ;;  %v193_v30 = vld [vmem:[#allocation8 + $0x198] sm:$0xff] }
 0x1eb   :  { %v2148_v24 = vadd.f32 %v2080_v25, %v1807_v46  ;;  %v855_v35 = vadd.f32 1.0, %v3694_v6  ;;  %v3696_v51 = vpop.eup %3695  ;;  %v858_v17 = vmul.f32 -0.5, %v3694_v6  ;;  %v861_v44 = vand.u32 2147483647, %v3694_v6 }
 0x1ec   :  { %v1365_v5 = vmul.f32 0.6931472, %v3696_v51  ;;  %v850_v14 = vadd.f32 1.0, %v849_v40  ;;  %vm853_vm3 = vcmp.lt.f32.partialorder %v852_v26, 0.0004427343 }
 0x1ed   :  { %3697 = vlog2.f32 %v2148_v24  ;;  %v859_v15 = vadd.f32 1.0, %v858_v17  ;;  %vm862_vm4 = vcmp.lt.f32.partialorder %v861_v44, 0.0004427343  ;;  %v1210_v24 = vmul.f32 %v258_v48, %v258_v48 }
 0x1ee   :  { %3699 = vlog2.f32 %v846_v42  ;;  %v1467_v9 = vsub.f32 %v1263_v56, %v1365_v5  ;;  %v851_v13 = vmul.f32 %v3692_v32, %v850_v14  ;;  %v380_v32 = vmul.f32 1.442695, %v193_v30  ;;  %v196_v5 = vld [vmem:[#allocation8 + $0x1b0] sm:$0xff]  ;;  %v197_v14 = vld [vmem:[#allocation8 + $0x1b8] sm:$0xff] }
 0x1ef   :  { %3701 = vlog2.f32 %v855_v35  ;;  %v860_v33 = vmul.f32 %v3694_v6, %v859_v15  ;;  %v1211_v35 = vmul.f32 %v259_v41, %v259_v41  ;;  %v198_v15 = vld [vmem:[#allocation8 + $0x1c0] sm:$0xff]  ;;  %v388_v26 = vmul.f32 1.442695, %v197_v14 }
 0x1f7   :  { %v3698_v19 = vpop.eup %3697 }
 0x1f8   :  { %v3700_v34 = vpop.eup %3699  ;;  %v2250_v39 = vmul.f32 0.6931472, %v3698_v19  ;;  %v386_v19 = vmul.f32 1.442695, %v196_v5 }
 0x1f9   :  { %v3702_v28 = vpop.eup %3701  ;;  %v848_v61 = vmul.f32 0.6931472, %v3700_v34 }
 0x1fa   :  { %v2352_v50 = vsub.f32 %v1467_v9, %v2250_v39  ;;  %v857_v52 = vmul.f32 0.6931472, %v3702_v28  ;;  %v5337_v9 = vmul.f32 -0.5, %v1210_v24  ;;  %v5342_v39 = vmul.f32 -0.5, %v1211_v35 }
 0x1fb   :  { %v854_v29 = vsel %vm853_vm3, %v851_v13, %v848_v61  ;;  %v5348_v13 = vld [vmem:[#allocation9 + $0x198] sm:$0xff] }
 0x1fc   :  { %v2419_v60 = vadd.f32 %v5154_v57, %v2352_v50  ;;  %v863_v7 = vsel %vm862_vm4, %v860_v33, %v857_v52  ;;  %v1074_v47 = vmul.f32 %v854_v29, %v258_v48  ;;  %3703 = vlog2.f32 %v854_v29  ;;  %v199_v33 = vld [vmem:[#allocation8 + $0x1c8] sm:$0xff]  ;;  %v200_v48 = vld [vmem:[#allocation8 + $0x1d0] sm:$0xff] }
 0x1fd   :  { %v1075_v36 = vmul.f32 %v863_v7, %v259_v41  ;;  %3705 = vlog2.f32 %v863_v7  ;;  %v1213_v52 = vmul.f32 %v5348_v13, %v5348_v13  ;;  %v392_v7 = vmul.f32 1.442695, %v199_v33 }
 0x1fe   :  { %v2420_v45 = vadd.f32 %v2419_v60, %v5119_v49  ;;  %v1142_v58 = vadd.f32 %v1074_v47, %v122_v11  ;;  %v194_v49 = vld [vmem:[#allocation8 + $0x1a0] sm:$0xff]  ;;  %3707 = vpow2.f32 %v380_v32  ;;  %v5360_v60 = vld [vmem:[#allocation9 + $0x1a8] sm:$0xff]  ;;  %v201_v47 = vld [vmem:[#allocation8 + $0x1d8] sm:$0xff] }
 0x1ff   :  { %v1143_v22 = vadd.f32 %v1075_v36, %v123_v12  ;;  %v382_v56 = vmul.f32 1.442695, %v194_v49  ;;  %v5362_v11 = vld [vmem:[#allocation9 + $0x1b0] sm:$0xff]  ;;  %v1215_v12 = vmul.f32 %v5360_v60, %v5360_v60 }
 0x200   :  { %v2421_v20 = vadd.f32 %v2420_v45, %v5141_v59  ;;  %v1550_v21 = vmul.f32 %v1142_v58, %v1142_v58  ;;  %v1216_v45 = vmul.f32 %v5362_v11, %v5362_v11 }
 0x201   :  { %v3080_v16 = vpack.c.bf16 %v1143_v22, %v1142_v58  ;;  %v1551_v38 = vmul.f32 %v1143_v22, %v1143_v22  ;;  %v5368_v58 = vld [vmem:[#allocation9 + $0x1b8] sm:$0xff]  ;;  %v394_v22 = vmul.f32 1.442695, %v200_v48  ;;  %v5376_v24 = vmul.f32 -0.5, %v1215_v12 }
 0x202   :  { %v2422_v3 = vadd.f32 %v2421_v20, %v5174_v10  ;;  %v1618_v46 = vmul.f32 -0.5, %v1550_v21  ;;  %v202_v20 = vld [vmem:[#allocation8 + $0x1e0] sm:$0xff]  ;;  %v5370_v21 = vmul.f32 -0.5, %v1213_v52  ;;  %v5380_v35 = vmul.f32 -0.5, %v1216_v45 }
 0x203   :  { %3081 = vmatpush3.bf16.msra.mxu0 %v3080_v16  ;;  %v1619_v63 = vmul.f32 -0.5, %v1551_v38  ;;  %v1217_v38 = vmul.f32 %v5368_v58, %v5368_v58 }
 0x204   :  { %v2423_v57 = vadd.f32 %v2422_v3, %v5203_v4  ;;  %v1734_v6 = vmul.f32 1.442695, %v1618_v46  ;;  %v1891_v42 = vmul.f32 250000.0, %v1618_v46  ;;  %v195_v4 = vld [vmem:[#allocation8 + $0x1a8] sm:$0xff] }
 0x205   :  { %v1736_v59 = vmul.f32 1.442695, %v1619_v63  ;;  %v1892_v62 = vmul.f32 250000.0, %v1619_v63  ;;  %v384_v17 = vmul.f32 1.442695, %v195_v4 }
 0x206   :  { %v2424_v25 = vadd.f32 %v2423_v57, %v5224_v31  ;;  %3709 = vpow2.f32 %v1734_v6  ;;  %v2007_v51 = vmul.f32 1.442695, %v1891_v42  ;;  %v396_v57 = vmul.f32 1.442695, %v201_v47  ;;  %v5378_v6 = vld [vmem:[#allocation9 + $0x1c0] sm:$0xff] }
 0x207   :  { %3711 = vpow2.f32 %v1736_v59  ;;  %v2009_v31 = vmul.f32 1.442695, %v1892_v62  ;;  %v398_v59 = vmul.f32 1.442695, %v202_v20  ;;  %v1218_v62 = vmul.f32 %v5378_v6, %v5378_v6 }
 0x208   :  { %v2425_v10 = vadd.f32 %v2424_v25, %v5229_v43  ;;  %3713 = vpow2.f32 %v2007_v51  ;;  %v3704_v43 = vpop.eup %3703  ;;  %v5384_v5 = vmul.f32 -0.5, %v1217_v38 }
 0x209   :  { %3715 = vpow2.f32 %v2009_v31  ;;  %v3706_v44 = vpop.eup %3705  ;;  %v5344_v28 = vmul.f32 0.6931472, %v3704_v43  ;;  %v5386_v48 = vmul.f32 -0.5, %v1218_v62 }
 0x20a   :  { %v2426_v40 = vadd.f32 %v2425_v10, %v5261_v37  ;;  %3717 = vpow2.f32 %v382_v56  ;;  %v390_v37 = vmul.f32 1.442695, %v198_v15  ;;  %v5346_v61 = vmul.f32 0.6931472, %v3706_v44  ;;  %v3708_v36 = vpop.eup %3707 }
 0x20b   :  { %3719 = vpow2.f32 %v384_v17  ;;  %v1482_v50 = vsub.f32 %v5337_v9, %v5344_v28  ;;  %v873_v3 = vadd.f32 1.0, %v3708_v36  ;;  %v876_v30 = vmul.f32 -0.5, %v3708_v36  ;;  %v126_v9 = vld [vmem:[#allocation6 + $0x1a0] sm:$0xff] }
 0x20c   :  { %v5340_v34 = vadd.f32 %v2426_v40, %v5274_v23  ;;  %v5352_v23 = vld [vmem:[#allocation9 + $0x1a0] sm:$0xff]  ;;  %3721 = vpow2.f32 %v386_v19  ;;  %v1483_v41 = vsub.f32 %v5342_v39, %v5346_v61  ;;  %v879_v4 = vand.u32 2147483647, %v3708_v36  ;;  %v127_v39 = vld [vmem:[#allocation6 + $0x1a8] sm:$0xff] }
 0x20d   :  { %v1214_v29 = vmul.f32 %v5352_v23, %v5352_v23  ;;  %3723 = vpow2.f32 %v388_v26  ;;  %v877_v17 = vadd.f32 1.0, %v876_v30 }
 0x20e   :  { %3725 = vpow2.f32 %v390_v37  ;;  %vm5388_vm5 = vcmp.lt.f32.partialorder %v879_v4, 0.0004427343 }
 0x20f   :  { %v5374_v25 = vmul.f32 -0.5, %v1214_v29  ;;  %3727 = vpow2.f32 %v392_v7  ;;  %v878_v45 = vmul.f32 %v3708_v36, %v877_v17 }
 0x210   :  { %v3710_v16 = vpop.eup %3709  ;;  %3729 = vlog2.f32 %v873_v3 }
 0x211   :  { %v3712_v46 = vpop.eup %3711  ;;  %v1822_v63 = vmul.f32 0.5, %v3710_v16  ;;  %3731 = vpow2.f32 %v394_v22 }
 0x212   :  { %v3714_v49 = vpop.eup %3713  ;;  %v1823_v32 = vmul.f32 0.5, %v3712_v46  ;;  %3733 = vpow2.f32 %v396_v57 }
 0x213   :  { %v3716_v42 = vpop.eup %3715  ;;  %v2095_v10 = vmul.f32 0.5, %v3714_v49  ;;  %3735 = vpow2.f32 %v398_v59 }
 0x214   :  { %v3718_v51 = vpop.eup %3717  ;;  %v2096_v56 = vmul.f32 0.5, %v3716_v42 }
 0x215   :  { %v3720_v40 = vpop.eup %3719  ;;  %v2163_v31 = vadd.f32 %v2095_v10, %v1822_v63  ;;  %v882_v19 = vadd.f32 1.0, %v3718_v51  ;;  %v885_v14 = vmul.f32 -0.5, %v3718_v51  ;;  %v888_v33 = vand.u32 2147483647, %v3718_v51 }
 0x216   :  { %v3722_v15 = vpop.eup %3721  ;;  %v2164_v43 = vadd.f32 %v2096_v56, %v1823_v32  ;;  %v891_v26 = vadd.f32 1.0, %v3720_v40  ;;  %v894_v44 = vmul.f32 -0.5, %v3720_v40  ;;  %v897_v47 = vand.u32 2147483647, %v3720_v40 }
 0x217   :  { %v3724_v37 = vpop.eup %3723  ;;  %3737 = vlog2.f32 %v2163_v31  ;;  %v900_v52 = vadd.f32 1.0, %v3722_v15  ;;  %v903_v12 = vmul.f32 -0.5, %v3722_v15  ;;  %v886_v22 = vadd.f32 1.0, %v885_v14 }
 0x218   :  { %v3726_v29 = vpop.eup %3725  ;;  %3739 = vlog2.f32 %v2164_v43  ;;  %v909_v20 = vadd.f32 1.0, %v3724_v37  ;;  %v895_v16 = vadd.f32 1.0, %v894_v44  ;;  %v906_v3 = vand.u32 2147483647, %v3722_v15 }
 0x219   :  { %3741 = vlog2.f32 %v882_v19  ;;  %v912_v38 = vmul.f32 -0.5, %v3724_v37  ;;  %v5392_v57 = vpop.eup %3727  ;;  %vm5394_vm6 = vcmp.lt.f32.partialorder %v888_v33, 0.0004427343  ;;  %v904_v63 = vadd.f32 1.0, %v903_v12 }
 0x21a   :  { %3743 = vlog2.f32 %v891_v26  ;;  %v915_v30 = vand.u32 2147483647, %v3724_v37  ;;  %v918_v49 = vadd.f32 1.0, %v3726_v29  ;;  %v3730_v32 = vpop.eup %3729  ;;  %vm5398_vm7 = vcmp.lt.f32.partialorder %v897_v47, 0.0004427343  ;;  %v125_v26 = vld [vmem:[#allocation6 + $0x198] sm:$0xff] }
 0x21b   :  { %3745 = vlog2.f32 %v900_v52  ;;  %v913_v59 = vadd.f32 1.0, %v912_v38  ;;  %v921_v42 = vmul.f32 -0.5, %v3726_v29  ;;  %v5402_v10 = vpop.eup %3731  ;;  %v875_v62 = vmul.f32 0.6931472, %v3730_v32 }
 0x21c   :  { %3747 = vlog2.f32 %v909_v20  ;;  %v887_v56 = vmul.f32 %v3718_v51, %v886_v22  ;;  %v924_v4 = vand.u32 2147483647, %v3726_v29  ;;  %v5404_v31 = vpop.eup %3733  ;;  %v896_v17 = vmul.f32 %v3720_v40, %v895_v16 }
 0x21d   :  { %3749 = vlog2.f32 %v918_v49  ;;  %v922_v19 = vadd.f32 1.0, %v921_v42  ;;  %v927_v14 = vadd.f32 1.0, %v5392_v57  ;;  %v930_v43 = vmul.f32 -0.5, %v5392_v57  ;;  %v5418_v47 = vpop.eup %3735 }
 0x21e   :  { %v881_v44 = vsel %vm5388_vm5, %v878_v45, %v875_v62  ;;  %v905_v33 = vmul.f32 %v3722_v15, %v904_v63  ;;  %vm5410_vm8 = vcmp.lt.f32.partialorder %v906_v3, 0.0004427343  ;;  %vm5414_vm9 = vcmp.lt.f32.partialorder %v915_v30, 0.0004427343 }
 0x21f   :  { %v1077_v40 = vmul.f32 %v881_v44, %v5348_v13  ;;  %3751 = vlog2.f32 %v881_v44  ;;  %v914_v12 = vmul.f32 %v3724_v37, %v913_v59  ;;  %v931_v22 = vadd.f32 1.0, %v930_v43 }
 0x220   :  { %vm5421_vm10 = vcmp.lt.f32.partialorder %v924_v4, 0.0004427343  ;;  %v933_v15 = vand.u32 2147483647, %v5392_v57  ;;  %v936_v45 = vadd.f32 1.0, %v5402_v10  ;;  %v939_v16 = vmul.f32 -0.5, %v5402_v10 }
 0x221   :  { %v3738_v20 = vpop.eup %3737  ;;  %v1145_v63 = vadd.f32 %v1077_v40, %v125_v26  ;;  %v923_v30 = vmul.f32 %v3726_v29, %v922_v19  ;;  %3753 = vlog2.f32 %v927_v14  ;;  %v942_v32 = vand.u32 2147483647, %v5402_v10 }
 0x222   :  { %v3740_v3 = vpop.eup %3739  ;;  %v2280_v38 = vmul.f32 0.6931472, %v3738_v20  ;;  %v940_v37 = vadd.f32 1.0, %v939_v16  ;;  %v945_v59 = vadd.f32 1.0, %v5404_v31  ;;  %v5436_v44 = vmul.f32 %v5392_v57, %v931_v22 }
 0x223   :  { %v3742_v13 = vpop.eup %3741  ;;  %v2282_v49 = vmul.f32 0.6931472, %v3740_v3  ;;  %v1553_v43 = vmul.f32 %v1145_v63, %v1145_v63  ;;  %3755 = vlog2.f32 %v936_v45  ;;  %v128_v3 = vld [vmem:[#allocation6 + $0x1b0] sm:$0xff]  ;;  %vm5462_vm11 = vcmp.lt.f32.partialorder %v933_v15, 0.0004427343 }
 0x224   :  { %v3744_v42 = vpop.eup %3743  ;;  %v5433_v62 = vsub.f32 %v1482_v50, %v2280_v38  ;;  %v884_v4 = vmul.f32 0.6931472, %v3742_v13  ;;  %v5444_v26 = vmul.f32 %v5402_v10, %v940_v37  ;;  %3757 = vlog2.f32 %v945_v59 }
 0x225   :  { %v3746_v29 = vpop.eup %3745  ;;  %v5441_v19 = vsub.f32 %v1483_v41, %v2282_v49  ;;  %v893_v14 = vmul.f32 0.6931472, %v3744_v42  ;;  %v1621_v50 = vmul.f32 -0.5, %v1553_v43  ;;  %vm5472_vm12 = vcmp.lt.f32.partialorder %v942_v32, 0.0004427343 }
 0x226   :  { %v3748_v40 = vpop.eup %3747  ;;  %v890_v28 = vsel %vm5394_vm6, %v887_v56, %v884_v4  ;;  %v902_v20 = vmul.f32 0.6931472, %v3746_v29 }
 0x227   :  { %v3750_v57 = vpop.eup %3749  ;;  %v1078_v22 = vmul.f32 %v890_v28, %v5352_v23  ;;  %3759 = vlog2.f32 %v890_v28  ;;  %v899_v61 = vsel %vm5398_vm7, %v896_v17, %v893_v14  ;;  %v911_v41 = vmul.f32 0.6931472, %v3748_v40  ;;  %v130_v40 = vld [vmem:[#allocation6 + $0x1c0] sm:$0xff] }
 0x228   :  { %v1740_v45 = vmul.f32 1.442695, %v1621_v50  ;;  %v1894_v16 = vmul.f32 250000.0, %v1621_v50  ;;  %v908_v38 = vsel %vm5410_vm8, %v905_v33, %v902_v20  ;;  %v1079_v46 = vmul.f32 %v899_v61, %v5360_v60  ;;  %v129_v33 = vld [vmem:[#allocation6 + $0x1b8] sm:$0xff] }
 0x229   :  { %v1146_v56 = vadd.f32 %v1078_v22, %v126_v9  ;;  %v1080_v13 = vmul.f32 %v908_v38, %v5362_v11  ;;  %3761 = vlog2.f32 %v899_v61  ;;  %v917_v23 = vsel %vm5414_vm9, %v914_v12, %v911_v41  ;;  %v3752_v49 = vpop.eup %3751 }
 0x22a   :  { %3763 = vpow2.f32 %v1740_v45  ;;  %v2013_v36 = vmul.f32 1.442695, %v1894_v16  ;;  %v1147_v17 = vadd.f32 %v1079_v46, %v127_v39  ;;  %v920_v37 = vmul.f32 0.6931472, %v3750_v57 }
 0x22b   :  { %v5457_v59 = vmul.f32 0.6931472, %v3752_v49  ;;  %v1554_v42 = vmul.f32 %v1146_v56, %v1146_v56  ;;  %v3083_v4 = vpack.c.bf16 %v1146_v56, %v1145_v63  ;;  %v1148_v52 = vadd.f32 %v1080_v13, %v128_v3  ;;  %v3754_v43 = vpop.eup %3753 }
 0x22c   :  { %3765 = vpow2.f32 %v2013_v36  ;;  %v1555_v60 = vmul.f32 %v1147_v17, %v1147_v17  ;;  %v926_v11 = vsel %vm5421_vm10, %v923_v30, %v920_v37  ;;  %v1081_v51 = vmul.f32 %v917_v23, %v5368_v58 }
 0x22d   :  { %v1485_v29 = vsub.f32 %v5370_v21, %v5457_v59  ;;  %v1622_v14 = vmul.f32 -0.5, %v1554_v42  ;;  %3084 = vmatpush3.bf16.msra.mxu1 %v3083_v4  ;;  %3767 = vlog2.f32 %v908_v38  ;;  %v1556_v63 = vmul.f32 %v1148_v52, %v1148_v52  ;;  %v3756_v58 = vpop.eup %3755  ;;  %v205_v59 = vld [vmem:[#allocation8 + $0x1f8] sm:$0xff] }
 0x22e   :  { %3085 = vmatprep.subr.bf16.mxu1 %v4071_v0  ;;  %v1623_v9 = vmul.f32 -0.5, %v1555_v60  ;;  %v3086_v28 = vpack.c.bf16 %v1148_v52, %v1147_v17  ;;  %v1082_v7 = vmul.f32 %v926_v11, %v5378_v6  ;;  %v1149_v30 = vadd.f32 %v1081_v51, %v129_v33  ;;  %v5476_v22 = vpop.eup %3757 }
 0x22f   :  { %v1742_v15 = vmul.f32 1.442695, %v1622_v14  ;;  %v1895_v50 = vmul.f32 250000.0, %v1622_v14  ;;  %v1624_v20 = vmul.f32 -0.5, %v1556_v63  ;;  %3769 = vlog2.f32 %v917_v23  ;;  %v131_v14 = vld [vmem:[#allocation6 + $0x1c8] sm:$0xff] }
 0x230   :  { %v1744_v39 = vmul.f32 1.442695, %v1623_v9  ;;  %v1896_v61 = vmul.f32 250000.0, %v1623_v9  ;;  %v1150_v41 = vadd.f32 %v1082_v7, %v130_v40  ;;  %3771 = vlog2.f32 %v926_v11  ;;  %v267_v63 = vld [vmem:[#allocation9 + $0x1c8] sm:$0xff] }
 0x231   :  { %v3760_v45 = vpop.eup %3759  ;;  %3773 = vpow2.f32 %v1742_v15  ;;  %v2015_v6 = vmul.f32 1.442695, %v1895_v50  ;;  %v1746_v16 = vmul.f32 1.442695, %v1624_v20  ;;  %v1897_v3 = vmul.f32 250000.0, %v1624_v20  ;;  %3087 = vmatpush3.bf16.msra.mxu1 %v3086_v28 }
 0x232   :  { %v5478_v38 = vmul.f32 0.6931472, %v3760_v45  ;;  %3775 = vpow2.f32 %v1744_v39  ;;  %v2017_v10 = vmul.f32 1.442695, %v1896_v61  ;;  %3088 = vmatprep.subr.bf16.mxu1 %v4071_v0  ;;  %v1557_v32 = vmul.f32 %v1149_v30, %v1149_v30 }
 0x233   :  { %v3762_v46 = vpop.eup %3761  ;;  %3777 = vpow2.f32 %v2015_v6  ;;  %v2019_v56 = vmul.f32 1.442695, %v1897_v3  ;;  %v1558_v13 = vmul.f32 %v1150_v41, %v1150_v41  ;;  %v3089_v23 = vpack.c.bf16 %v1150_v41, %v1149_v30  ;;  %v268_v30 = vld [vmem:[#allocation9 + $0x1d0] sm:$0xff] }
 0x234   :  { %v3764_v49 = vpop.eup %3763  ;;  %v1486_v36 = vsub.f32 %v5374_v25, %v5478_v38  ;;  %v5483_v17 = vmul.f32 0.6931472, %v3762_v46  ;;  %3779 = vpow2.f32 %v1746_v16  ;;  %v1625_v37 = vmul.f32 -0.5, %v1557_v32 }
 0x235   :  { %v1825_v42 = vmul.f32 0.5, %v3764_v49  ;;  %3781 = vpow2.f32 %v2017_v10  ;;  %v1626_v4 = vmul.f32 -0.5, %v1558_v13  ;;  %3090 = vmatpush3.bf16.msra.mxu1 %v3089_v23  ;;  %v929_v52 = vmul.f32 0.6931472, %v3754_v43  ;;  %v132_v10 = vld [vmem:[#allocation6 + $0x1d0] sm:$0xff] }
 0x236   :  { %v3766_v33 = vpop.eup %3765  ;;  %v1487_v60 = vsub.f32 %v5376_v24, %v5483_v17  ;;  %3783 = vpow2.f32 %v2019_v56  ;;  %v1748_v11 = vmul.f32 1.442695, %v1625_v37  ;;  %v1898_v51 = vmul.f32 250000.0, %v1625_v37  ;;  %3091 = vmatprep.subr.bf16.mxu1 %v4071_v0 }
 0x237   :  { %v3768_v40 = vpop.eup %3767  ;;  %v2098_v9 = vmul.f32 0.5, %v3766_v33  ;;  %v1750_v28 = vmul.f32 1.442695, %v1626_v4  ;;  %v1899_v7 = vmul.f32 250000.0, %v1626_v4  ;;  %v935_v43 = vsel %vm5462_vm11, %v5436_v44, %v929_v52 }
 0x238   :  { %v5491_v15 = vmul.f32 0.6931472, %v3768_v40  ;;  %3785 = vpow2.f32 %v1748_v11  ;;  %v2021_v50 = vmul.f32 1.442695, %v1898_v51  ;;  %v938_v20 = vmul.f32 0.6931472, %v3756_v58 }
 0x239   :  { %v3770_v39 = vpop.eup %3769  ;;  %v2166_v61 = vadd.f32 %v2098_v9, %v1825_v42  ;;  %3787 = vpow2.f32 %v1750_v28  ;;  %v2023_v41 = vmul.f32 1.442695, %v1899_v7  ;;  %v1083_v45 = vmul.f32 %v935_v43, %v267_v63 }
 0x23a   :  { %v3772_v6 = vpop.eup %3771  ;;  %v1488_v16 = vsub.f32 %v5380_v35, %v5491_v15  ;;  %v5495_v3 = vmul.f32 0.6931472, %v3770_v39  ;;  %3789 = vpow2.f32 %v2021_v50  ;;  %v944_v44 = vsel %vm5472_vm12, %v5444_v26, %v938_v20 }
 0x23b   :  { %v3774_v12 = vpop.eup %3773  ;;  %3791 = vlog2.f32 %v2166_v61  ;;  %v5500_v58 = vmul.f32 0.6931472, %v3772_v6  ;;  %v1084_v32 = vmul.f32 %v944_v44, %v268_v30  ;;  %v1151_v46 = vadd.f32 %v1083_v45, %v131_v14 }
 0x23c   :  { %v3776_v56 = vpop.eup %3775  ;;  %v1826_v13 = vmul.f32 0.5, %v3774_v12  ;;  %v1489_v23 = vsub.f32 %v5384_v5, %v5495_v3  ;;  %3793 = vpow2.f32 %v2023_v41  ;;  %v948_v26 = vmul.f32 -0.5, %v5404_v31  ;;  %v133_v3 = vld [vmem:[#allocation6 + $0x1d8] sm:$0xff] }
 0x23d   :  { %v3778_v49 = vpop.eup %3777  ;;  %v1490_v37 = vsub.f32 %v5386_v48, %v5500_v58  ;;  %v1152_v42 = vadd.f32 %v1084_v32, %v132_v10  ;;  %3795 = vlog2.f32 %v935_v43  ;;  %v1827_v52 = vmul.f32 0.5, %v3776_v56 }
 0x23e   :  { %v3780_v57 = vpop.eup %3779  ;;  %v2099_v4 = vmul.f32 0.5, %v3778_v49  ;;  %3797 = vlog2.f32 %v944_v44  ;;  %v1559_v33 = vmul.f32 %v1151_v46, %v1151_v46  ;;  %v1219_v14 = vmul.f32 %v267_v63, %v267_v63 }
 0x23f   :  { %v3782_v11 = vpop.eup %3781  ;;  %v1828_v51 = vmul.f32 0.5, %v3780_v57  ;;  %v1560_v40 = vmul.f32 %v1152_v42, %v1152_v42  ;;  %v3092_v9 = vpack.c.bf16 %v1152_v42, %v1151_v46  ;;  %v1220_v20 = vmul.f32 %v268_v30, %v268_v30 }
 0x240   :  { %v3784_v28 = vpop.eup %3783  ;;  %v2167_v7 = vadd.f32 %v2099_v4, %v1826_v13  ;;  %v2100_v50 = vmul.f32 0.5, %v3782_v11  ;;  %v1627_v39 = vmul.f32 -0.5, %v1559_v33  ;;  %v949_v43 = vadd.f32 1.0, %v948_v26 }
 0x241   :  { %v2101_v61 = vmul.f32 0.5, %v3784_v28  ;;  %v1628_v41 = vmul.f32 -0.5, %v1560_v40  ;;  %3093 = vmatpush3.bf16.msra.mxu1 %v3092_v9  ;;  %v5508_v30 = vmul.f32 -0.5, %v1219_v14  ;;  %v5510_v49 = vmul.f32 -0.5, %v1220_v20 }
 0x242   :  { %v3786_v45 = vpop.eup %3785  ;;  %3799 = vlog2.f32 %v2167_v7  ;;  %v2168_v6 = vadd.f32 %v2100_v50, %v1827_v52  ;;  %v1752_v10 = vmul.f32 1.442695, %v1627_v39  ;;  %v1900_v44 = vmul.f32 250000.0, %v1627_v39  ;;  %3094 = vmatprep.subr.bf16.mxu1 %v4071_v0  ;;  %v203_v50 = vld [vmem:[#allocation8 + $0x1e8] sm:$0xff] }
 0x243   :  { %v3788_v12 = vpop.eup %3787  ;;  %v2169_v63 = vadd.f32 %v2101_v61, %v1828_v51  ;;  %v1829_v32 = vmul.f32 0.5, %v3786_v45  ;;  %v1754_v46 = vmul.f32 1.442695, %v1628_v41  ;;  %v1901_v56 = vmul.f32 250000.0, %v1628_v41 }
 0x244   :  { %v3790_v13 = vpop.eup %3789  ;;  %3801 = vlog2.f32 %v2168_v6  ;;  %v2025_v42 = vmul.f32 1.442695, %v1900_v44  ;;  %v1830_v57 = vmul.f32 0.5, %v3788_v12  ;;  %v951_v52 = vand.u32 2147483647, %v5404_v31  ;;  %v204_v6 = vld [vmem:[#allocation8 + $0x1f0] sm:$0xff] }
 0x245   :  { %v3792_v26 = vpop.eup %3791  ;;  %3803 = vlog2.f32 %v2169_v63  ;;  %v2102_v4 = vmul.f32 0.5, %v3790_v13  ;;  %v2027_v51 = vmul.f32 1.442695, %v1901_v56  ;;  %v947_v40 = vmul.f32 0.6931472, %v5476_v22  ;;  %v269_v56 = vld [vmem:[#allocation9 + $0x1d8] sm:$0xff] }
 0x246   :  { %v3794_v33 = vpop.eup %3793  ;;  %v2286_v11 = vmul.f32 0.6931472, %v3792_v26  ;;  %3805 = vpow2.f32 %v1752_v10  ;;  %v950_v14 = vmul.f32 %v5404_v31, %v949_v43  ;;  %v954_v41 = vadd.f32 1.0, %v5418_v47 }
 0x247   :  { %v3796_v9 = vpop.eup %3795  ;;  %v2103_v28 = vmul.f32 0.5, %v3794_v33  ;;  %v2170_v7 = vadd.f32 %v2102_v4, %v1829_v32  ;;  %3807 = vpow2.f32 %v1754_v46  ;;  %vm952_vm13 = vcmp.lt.f32.partialorder %v951_v52, 0.0004427343  ;;  %v206_v32 = vld [vmem:[#allocation8 + $0x200] sm:$0xff] }
 0x248   :  { %v3798_v20 = vpop.eup %3797  ;;  %v5518_v39 = vsub.f32 %v1485_v29, %v2286_v11  ;;  %v5520_v61 = vmul.f32 0.6931472, %v3796_v9  ;;  %3809 = vpow2.f32 %v2025_v42  ;;  %v400_v43 = vmul.f32 1.442695, %v203_v50  ;;  %v192_v42 = vld [vmem:[#allocation8 + $0x190] sm:$0xff] }
 0x249   :  { %v2171_v45 = vadd.f32 %v2103_v28, %v1830_v57  ;;  %3811 = vlog2.f32 %v2170_v7  ;;  %v5523_v22 = vmul.f32 0.6931472, %v3798_v20  ;;  %v953_v10 = vsel %vm952_vm13, %v950_v14, %v947_v40 }
 0x24a   :  { %v1491_v31 = vsub.f32 %v5508_v30, %v5520_v61  ;;  %3813 = vpow2.f32 %v2027_v51  ;;  %v402_v44 = vmul.f32 1.442695, %v204_v6  ;;  %v957_v63 = vmul.f32 -0.5, %v5418_v47 }
 0x24b   :  { %3815 = vlog2.f32 %v2171_v45  ;;  %v1492_v21 = vsub.f32 %v5510_v49, %v5523_v22  ;;  %v404_v13 = vmul.f32 1.442695, %v205_v59  ;;  %v1221_v52 = vmul.f32 %v269_v56, %v269_v56 }
 0x24c   :  { %v3800_v29 = vpop.eup %3799  ;;  %3817 = vlog2.f32 %v954_v41  ;;  %v406_v51 = vmul.f32 1.442695, %v206_v32  ;;  %v2428_v40 = vadd.f32 %v5340_v34, %v5299_v8  ;;  %v958_v14 = vadd.f32 1.0, %v957_v63 }
 0x24d   :  { %v2288_v12 = vmul.f32 0.6931472, %v3800_v29  ;;  %3819 = vlog2.f32 %v953_v10  ;;  %v378_v25 = vmul.f32 1.442695, %v192_v42  ;;  %v960_v50 = vand.u32 2147483647, %v5418_v47 }
 0x24e   :  { %v3802_v46 = vpop.eup %3801  ;;  %3821 = vpow2.f32 %v400_v43  ;;  %v2429_v8 = vadd.f32 %v2428_v40, %v5309_v1  ;;  %v959_v15 = vmul.f32 %v5418_v47, %v958_v14 }
 0x24f   :  { %v3804_v26 = vpop.eup %3803  ;;  %v5533_v57 = vsub.f32 %v1486_v36, %v2288_v12  ;;  %v2290_v4 = vmul.f32 0.6931472, %v3802_v46  ;;  %3823 = vpow2.f32 %v402_v44  ;;  %vm961_vm15 = vcmp.lt.f32.partialorder %v960_v50, 0.0004427343 }
 0x250   :  { %v3806_v33 = vpop.eup %3805  ;;  %v2292_v11 = vmul.f32 0.6931472, %v3804_v26  ;;  %3825 = vpow2.f32 %v404_v13  ;;  %v2430_v45 = vadd.f32 %v2429_v8, %v5318_v54  ;;  %v5559_v54 = vld [vmem:[#allocation9 + $0x1e0] sm:$0xff]  ;;  %v1085_v46 = vmul.f32 %v953_v10, %v269_v56 }
 0x251   :  { %v3808_v9 = vpop.eup %3807  ;;  %v5540_v28 = vsub.f32 %v1487_v60, %v2290_v4  ;;  %v1831_v7 = vmul.f32 0.5, %v3806_v33  ;;  %v5549_v60 = vmul.f32 -0.5, %v1221_v52  ;;  %3827 = vpow2.f32 %v406_v51 }
 0x252   :  { %v3810_v38 = vpop.eup %3809  ;;  %v5545_v36 = vsub.f32 %v1488_v16, %v2292_v11  ;;  %v1832_v20 = vmul.f32 0.5, %v3808_v9  ;;  %3829 = vpow2.f32 %v378_v25  ;;  %v2431_v29 = vadd.f32 %v2430_v45, %v5323_v2  ;;  %v134_v2 = vld [vmem:[#allocation6 + $0x1e0] sm:$0xff] }
 0x253   :  { %v3812_v34 = vpop.eup %3811  ;;  %v2104_v41 = vmul.f32 0.5, %v3810_v38  ;;  %v5575_v10 = vadd.f32 %v1085_v46, %v133_v3 }
 0x254   :  { %v3814_v24 = vpop.eup %3813  ;;  %v2294_v17 = vmul.f32 0.6931472, %v3812_v34  ;;  %v2432_v5 = vadd.f32 %v2431_v29, %v5325_v55 }
 0x255   :  { %v3816_v6 = vpop.eup %3815  ;;  %v2105_v43 = vmul.f32 0.5, %v3814_v24  ;;  %v2172_v35 = vadd.f32 %v2104_v41, %v1831_v7 }
 0x256   :  { %v3818_v16 = vpop.eup %3817  ;;  %v2296_v59 = vmul.f32 0.6931472, %v3816_v6  ;;  %v5556_v1 = vsub.f32 %v1489_v23, %v2294_v17  ;;  %v2433_v61 = vadd.f32 %v2432_v5, %v5327_v18 }
 0x257   :  { %v3820_v44 = vpop.eup %3819  ;;  %v2173_v12 = vadd.f32 %v2105_v43, %v1832_v20  ;;  %3831 = vlog2.f32 %v2172_v35  ;;  %v956_v63 = vmul.f32 0.6931472, %v3818_v16  ;;  %v5592_v16 = vld [vmem:[#allocation9 + $0x1e8] sm:$0xff] }
 0x258   :  { %v3822_v32 = vpop.eup %3821  ;;  %v5564_v47 = vsub.f32 %v1490_v37, %v2296_v59  ;;  %v5566_v13 = vmul.f32 0.6931472, %v3820_v44 }
 0x259   :  { %3833 = vlog2.f32 %v2173_v12  ;;  %v5569_v23 = vsel %vm961_vm15, %v959_v15, %v956_v63  ;;  %v963_v42 = vadd.f32 1.0, %v3822_v32  ;;  %v3824_v26 = vpop.eup %3823  ;;  %v966_v55 = vmul.f32 -0.5, %v3822_v32 }
 0x25a   :  { %v1086_v4 = vmul.f32 %v5569_v23, %v5559_v54  ;;  %v1493_v48 = vsub.f32 %v5549_v60, %v5566_v13  ;;  %v972_v58 = vadd.f32 1.0, %v3824_v26  ;;  %v3826_v37 = vpop.eup %3825  ;;  %v975_v52 = vmul.f32 -0.5, %v3824_v26 }
 0x25b   :  { %3835 = vlog2.f32 %v963_v42  ;;  %v981_v33 = vadd.f32 1.0, %v3826_v37  ;;  %v3828_v11 = vpop.eup %3827  ;;  %v967_v9 = vadd.f32 1.0, %v966_v55  ;;  %v969_v25 = vand.u32 2147483647, %v3822_v32  ;;  %v136_v42 = vld [vmem:[#allocation6 + $0x1f0] sm:$0xff] }
 0x25c   :  { %v5577_v56 = vadd.f32 %v1086_v4, %v134_v2  ;;  %3837 = vlog2.f32 %v972_v58  ;;  %v3830_v40 = vpop.eup %3829  ;;  %v990_v7 = vadd.f32 1.0, %v3828_v11  ;;  %v976_v38 = vadd.f32 1.0, %v975_v52  ;;  %v135_v2 = vld [vmem:[#allocation6 + $0x1e8] sm:$0xff] }
 0x25d   :  { %3839 = vlog2.f32 %v981_v33  ;;  %v864_v50 = vadd.f32 1.0, %v3830_v40  ;;  %v984_v34 = vmul.f32 -0.5, %v3826_v37  ;;  %v978_v41 = vand.u32 2147483647, %v3824_v26 }
 0x25e   :  { %v3095_v51 = vpack.c.bf16 %v5577_v56, %v5575_v10  ;;  %3841 = vlog2.f32 %v990_v7  ;;  %v968_v45 = vmul.f32 %v3822_v32, %v967_v9  ;;  %v993_v6 = vmul.f32 -0.5, %v3828_v11  ;;  %v5613_v7 = vld [vmem:[#allocation9 + $0x1f8] sm:$0xff] }
 0x25f   :  { %vm970_vm0 = vcmp.lt.f32.partialorder %v969_v25, 0.0004427343  ;;  %v977_v35 = vmul.f32 %v3824_v26, %v976_v38  ;;  %3843 = vlog2.f32 %v864_v50  ;;  %v985_v29 = vadd.f32 1.0, %v984_v34 }
 0x260   :  { %3096 = vmatpush3.bf16.msra.mxu1 %v3095_v51  ;;  %v867_v44 = vmul.f32 -0.5, %v3830_v40  ;;  %vm979_vm14 = vcmp.lt.f32.partialorder %v978_v41, 0.0004427343  ;;  %v987_v30 = vand.u32 2147483647, %v3826_v37  ;;  %v994_v46 = vadd.f32 1.0, %v993_v6 }
 0x261   :  { %v3832_v14 = vpop.eup %3831  ;;  %3097 = vmatprep.subr.bf16.mxu1 %v4071_v0  ;;  %v996_v22 = vand.u32 2147483647, %v3828_v11  ;;  %v986_v58 = vmul.f32 %v3826_v37, %v985_v29  ;;  %v870_v55 = vand.u32 2147483647, %v3830_v40  ;;  %v138_v41 = vld [vmem:[#allocation6 + $0x200] sm:$0xff]  ;;  %v124_v6 = vld [vmem:[#allocation6 + $0x190] sm:$0xff] }
 0x262   :  { %v2298_v8 = vmul.f32 0.6931472, %v3832_v14  ;;  %v868_v18 = vadd.f32 1.0, %v867_v44  ;;  %vm988_vm1 = vcmp.lt.f32.partialorder %v987_v30, 0.0004427343  ;;  %v995_v33 = vmul.f32 %v3828_v11, %v994_v46 }
 0x263   :  { %v3834_v20 = vpop.eup %3833  ;;  %vm997_vm2 = vcmp.lt.f32.partialorder %v996_v22, 0.0004427343  ;;  %vm871_vm3 = vcmp.lt.f32.partialorder %v870_v55, 0.0004427343 }
 0x264   :  { %v2300_v24 = vmul.f32 0.6931472, %v3834_v20  ;;  %v5585_v17 = vsub.f32 %v1491_v31, %v2298_v8  ;;  %v5595_v31 = vld [vmem:[#allocation9 + $0x1f0] sm:$0xff]  ;;  %v869_v25 = vmul.f32 %v3830_v40, %v868_v18  ;;  %v5619_v8 = vld [vmem:[#allocation9 + $0x200] sm:$0xff]  ;;  %v137_v20 = vld [vmem:[#allocation6 + $0x1f8] sm:$0xff] }
 0x265   :  { %v3836_v43 = vpop.eup %3835 }
 0x266   :  { %v5590_v15 = vsub.f32 %v1492_v21, %v2300_v24  ;;  %v965_v59 = vmul.f32 0.6931472, %v3836_v43  ;;  %v3838_v12 = vpop.eup %3837  ;;  %v2434_v21 = vadd.f32 %v2433_v61, %v5433_v62  ;;  %v260_v24 = vld [vmem:[#allocation9 + $0x190] sm:$0xff] }
 0x267   :  { %v974_v32 = vmul.f32 0.6931472, %v3838_v12  ;;  %v3840_v3 = vpop.eup %3839  ;;  %v2546_v12 = vrot.slane %v5311_v53, %v5190_v27  ;;  %v1561_v53 = vmul.f32 %v5575_v10, %v5575_v10  ;;  %v1562_v10 = vmul.f32 %v5577_v56, %v5577_v56 }
 0x268   :  { %v5597_v63 = vsel %vm970_vm0, %v968_v45, %v965_v59  ;;  %v983_v4 = vmul.f32 0.6931472, %v3840_v3  ;;  %v5607_v52 = vadd.f32 %v2434_v21, %v5441_v19  ;;  %v3842_v51 = vpop.eup %3841 }
 0x269   :  { %v1087_v49 = vmul.f32 %v5597_v63, %v5592_v16  ;;  %v5602_v26 = vsel %vm979_vm14, %v977_v35, %v974_v32  ;;  %v992_v37 = vmul.f32 0.6931472, %v3842_v51  ;;  %v3844_v38 = vpop.eup %3843 }
 0x26a   :  { %v1088_v5 = vmul.f32 %v5602_v26, %v5595_v31  ;;  %v5615_v14 = vsel %vm988_vm1, %v986_v58, %v983_v4  ;;  %v866_v11 = vmul.f32 0.6931472, %v3844_v38  ;;  %v1629_v4 = vmul.f32 -0.5, %v1561_v53  ;;  %v207_v38 = vld [vmem:[#allocation8 + $0x208] sm:$0xff] }
 0x26b   :  { %v5609_v9 = vadd.f32 %v1087_v49, %v135_v2  ;;  %v5621_v19 = vsel %vm997_vm2, %v995_v33, %v992_v37  ;;  %v1089_v34 = vmul.f32 %v5615_v14, %v5613_v7 }
 0x26c   :  { %v5611_v62 = vadd.f32 %v1088_v5, %v136_v42  ;;  %v1090_v40 = vmul.f32 %v5621_v19, %v5619_v8  ;;  %v872_v45 = vsel %vm871_vm3, %v869_v25, %v866_v11  ;;  %v1902_v5 = vmul.f32 250000.0, %v1629_v4 }
 0x26d   :  { %v5628_v43 = vadd.f32 %v1089_v34, %v137_v20  ;;  %v1076_v59 = vmul.f32 %v872_v45, %v260_v24  ;;  %v1756_v33 = vmul.f32 1.442695, %v1629_v4  ;;  %v1212_v25 = vmul.f32 %v260_v24, %v260_v24  ;;  %v208_v34 = vld [vmem:[#allocation8 + $0x210] sm:$0xff] }
 0x26e   :  { %v3098_v50 = vpack.c.bf16 %v5611_v62, %v5609_v9  ;;  %v5630_v35 = vadd.f32 %v1090_v40, %v138_v41  ;;  %v2029_v37 = vmul.f32 1.442695, %v1902_v5  ;;  %v408_v11 = vmul.f32 1.442695, %v207_v38 }
 0x26f   :  { %v5634_v44 = vadd.f32 %v1076_v59, %v124_v6  ;;  %v410_v20 = vmul.f32 1.442695, %v208_v34  ;;  %v1280_v41 = vmul.f32 -0.5, %v1212_v25  ;;  %v1630_v59 = vmul.f32 -0.5, %v1562_v10 }
 0x270   :  { %3099 = vmatpush3.bf16.msra.mxu1 %v3098_v50  ;;  %v3101_v29 = vpack.c.bf16 %v5630_v35, %v5628_v43 }
 0x271   :  { %3100 = vmatprep.subr.bf16.mxu1 %v4071_v0  ;;  %v1552_v30 = vmul.f32 %v5634_v44, %v5634_v44 }
 0x273   :  { %v1620_v61 = vmul.f32 -0.5, %v1552_v30 }
 0x274   :  { %3102 = vmatpush3.bf16.msra.mxu1 %v3101_v29 }
 0x275   :  { %3103 = vmatprep.subr.bf16.mxu1 %v4071_v0  ;;  %v1738_v49 = vmul.f32 1.442695, %v1620_v61  ;;  %v1893_v22 = vmul.f32 250000.0, %v1620_v61  ;;  %v1903_v61 = vmul.f32 250000.0, %v1630_v59 }
 0x277   :  { %3845 = vpow2.f32 %v1738_v49  ;;  %v2011_v2 = vmul.f32 1.442695, %v1893_v22  ;;  %v1758_v49 = vmul.f32 1.442695, %v1630_v59  ;;  %v1564_v22 = vmul.f32 %v5611_v62, %v5611_v62 }
 0x278   :  { %v2031_v4 = vmul.f32 1.442695, %v1903_v61 }
 0x279   :  { %3847 = vpow2.f32 %v2011_v2 }
 0x27a   :  { %3849 = vlog2.f32 %v872_v45  ;;  %v209_v45 = vld [vmem:[#allocation8 + $0x218] sm:$0xff] }
 0x27b   :  { %v412_v6 = vmul.f32 1.442695, %v209_v45 }
 0x27f   :  { %v2613_v32 = vpop.f32.mrb[0].mxu1 }
 0x280   :  { %v2614_v46 = vadd.f32 %v2613_v32, %v2546_v12  ;;  %v2939_v3 = vpop.f32.mrb[1].mxu1 }
 0x281   :  { %v3846_v58 = vpop.eup %3845 }
 0x282   :  { %vm2617_vm4 = vcmp.ge.f32.partialorder %v2614_v46, 0.0  ;;  %v2618_v21 = vmul.f32 0.01, %v2614_v46  ;;  %v1824_v0 = vmul.f32 0.5, %v3846_v58 }
 0x283   :  { %v3848_v18 = vpop.eup %3847 }
 0x284   :  { %v2619_v42 = vsel %vm2617_vm4, %v2614_v46, %v2618_v21  ;;  %v2097_v55 = vmul.f32 0.5, %v3848_v18  ;;  %v3850_v50 = vpop.eup %3849  ;;  %v1563_v46 = vmul.f32 %v5609_v9, %v5609_v9  ;;  %v1632_v9 = vmul.f32 -0.5, %v1564_v22 }
 0x285   :  { %2973 = vmatmul.mubr.f32.vlgmr.msra.gmra.mrb[2].mxu0 %v2619_v42  ;;  %v1399_v40 = vmul.f32 0.6931472, %v3850_v50 }
 0x286   :  { %v2165_v51 = vadd.f32 %v2097_v55, %v1824_v0  ;;  %v1631_v0 = vmul.f32 -0.5, %v1563_v46  ;;  %v1762_v50 = vmul.f32 1.442695, %v1632_v9  ;;  %v5661_v46 = vld [vmem:[#allocation9 + $0x208] sm:$0xff] }
 0x287   :  { %v1484_v29 = vsub.f32 %v1280_v41, %v1399_v40 }
 0x288   :  { %3851 = vlog2.f32 %v2165_v51  ;;  %v1760_v38 = vmul.f32 1.442695, %v1631_v0 }
 0x289   :  { %3853 = vpow2.f32 %v1756_v33 }
 0x28a   :  { %3855 = vpow2.f32 %v2029_v37  ;;  %v1565_v37 = vmul.f32 %v5628_v43, %v5628_v43 }
 0x28b   :  { %3857 = vpow2.f32 %v408_v11  ;;  %v1566_v11 = vmul.f32 %v5630_v35, %v5630_v35 }
 0x28c   :  { %3859 = vpow2.f32 %v410_v20  ;;  %v1633_v20 = vmul.f32 -0.5, %v1565_v37 }
 0x28d   :  { %3861 = vpow2.f32 %v412_v6  ;;  %v1634_v45 = vmul.f32 -0.5, %v1566_v11 }
 0x28e   :  { %v1764_v6 = vmul.f32 1.442695, %v1633_v20 }
 0x292   :  { %v3852_v24 = vpop.eup %3851 }
 0x293   :  { %v2284_v12 = vmul.f32 0.6931472, %v3852_v24  ;;  %v3854_v30 = vpop.eup %3853 }
 0x294   :  { %v3856_v32 = vpop.eup %3855  ;;  %v1833_v53 = vmul.f32 0.5, %v3854_v30 }
 0x295   :  { %v2369_v3 = vsub.f32 %v1484_v29, %v2284_v12  ;;  %v3858_v56 = vpop.eup %3857  ;;  %v2106_v58 = vmul.f32 0.5, %v3856_v32 }
 0x296   :  { %v999_v2 = vadd.f32 1.0, %v3858_v56  ;;  %v3860_v42 = vpop.eup %3859  ;;  %v1005_v59 = vand.u32 2147483647, %v3858_v56 }
 0x297   :  { %v2436_v21 = vadd.f32 %v5607_v52, %v2369_v3  ;;  %v1008_v5 = vadd.f32 1.0, %v3860_v42  ;;  %v3862_v55 = vpop.eup %3861  ;;  %v2174_v62 = vadd.f32 %v2106_v58, %v1833_v53  ;;  %v1904_v52 = vmul.f32 250000.0, %v1631_v0  ;;  %v139_v58 = vld [vmem:[#allocation6 + $0x208] sm:$0xff]  ;;  %v5667_v0 = vld [vmem:[#allocation9 + $0x210] sm:$0xff] }
 0x298   :  { %3863 = vlog2.f32 %v999_v2  ;;  %v1017_v51 = vadd.f32 1.0, %v3862_v55  ;;  %v1020_v12 = vmul.f32 -0.5, %v3862_v55  ;;  %vm1006_vm5 = vcmp.lt.f32.partialorder %v1005_v59, 0.0004427343 }
 0x299   :  { %v2437_v18 = vadd.f32 %v2436_v21, %v5518_v39  ;;  %3865 = vpow2.f32 %v1758_v49  ;;  %v1905_v39 = vmul.f32 250000.0, %v1632_v9  ;;  %v2033_v10 = vmul.f32 1.442695, %v1904_v52 }
 0x29a   :  { %3867 = vlog2.f32 %v1008_v5  ;;  %v1014_v61 = vand.u32 2147483647, %v3860_v42  ;;  %v1021_v21 = vadd.f32 1.0, %v1020_v12  ;;  %v1907_v53 = vmul.f32 250000.0, %v1634_v45 }
 0x29b   :  { %v2438_v33 = vadd.f32 %v2437_v18, %v5533_v57  ;;  %3869 = vpow2.f32 %v2031_v4  ;;  %v1002_v57 = vmul.f32 -0.5, %v3858_v56  ;;  %v2035_v43 = vmul.f32 1.442695, %v1905_v39  ;;  %v5677_v39 = vld [vmem:[#allocation9 + $0x218] sm:$0xff] }
 0x29c   :  { %3871 = vlog2.f32 %v1017_v51  ;;  %vm1015_vm6 = vcmp.lt.f32.partialorder %v1014_v61, 0.0004427343  ;;  %v1023_v4 = vand.u32 2147483647, %v3862_v55  ;;  %v1022_v9 = vmul.f32 %v3862_v55, %v1021_v21 }
 0x29d   :  { %v2439_v25 = vadd.f32 %v2438_v33, %v5540_v28  ;;  %3873 = vlog2.f32 %v5569_v23  ;;  %v1003_v41 = vadd.f32 1.0, %v1002_v57  ;;  %v1011_v28 = vmul.f32 -0.5, %v3860_v42 }
 0x29e   :  { %3875 = vlog2.f32 %v2174_v62  ;;  %v1906_v23 = vmul.f32 250000.0, %v1633_v20  ;;  %vm1024_vm7 = vcmp.lt.f32.partialorder %v1023_v4, 0.0004427343  ;;  %v2039_v55 = vmul.f32 1.442695, %v1907_v53 }
 0x29f   :  { %v5658_v34 = vadd.f32 %v2439_v25, %v5545_v36  ;;  %3877 = vpow2.f32 %v1760_v38  ;;  %v1004_v24 = vmul.f32 %v3858_v56, %v1003_v41  ;;  %v1012_v36 = vadd.f32 1.0, %v1011_v28  ;;  %v140_v38 = vld [vmem:[#allocation6 + $0x210] sm:$0xff]  ;;  %v141_v41 = vld [vmem:[#allocation6 + $0x218] sm:$0xff] }
 0x2a0   :  { %3879 = vpow2.f32 %v1762_v50  ;;  %v2037_v33 = vmul.f32 1.442695, %v1906_v23  ;;  %v1766_v25 = vmul.f32 1.442695, %v1634_v45 }
 0x2a1   :  { %3881 = vpow2.f32 %v2033_v10  ;;  %v1013_v22 = vmul.f32 %v3860_v42, %v1012_v36 }
 0x2a2   :  { %v3864_v40 = vpop.eup %3863  ;;  %3883 = vpow2.f32 %v2035_v43 }
 0x2a3   :  { %v3866_v29 = vpop.eup %3865  ;;  %v1001_v35 = vmul.f32 0.6931472, %v3864_v40  ;;  %3885 = vpow2.f32 %v1764_v6 }
 0x2a4   :  { %v3868_v30 = vpop.eup %3867  ;;  %v1834_v52 = vmul.f32 0.5, %v3866_v29  ;;  %3887 = vpow2.f32 %v2037_v33 }
 0x2a5   :  { %v3870_v32 = vpop.eup %3869  ;;  %v5663_v3 = vsel %vm1006_vm5, %v1004_v24, %v1001_v35  ;;  %v1010_v49 = vmul.f32 0.6931472, %v3868_v30  ;;  %3889 = vpow2.f32 %v1766_v25 }
 0x2a6   :  { %v3872_v2 = vpop.eup %3871  ;;  %v1091_v56 = vmul.f32 %v5663_v3, %v5661_v46  ;;  %v2107_v37 = vmul.f32 0.5, %v3870_v32  ;;  %3891 = vpow2.f32 %v2039_v55 }
 0x2a7   :  { %v5669_v18 = vsel %vm1015_vm6, %v1013_v22, %v1010_v49  ;;  %v1019_v5 = vmul.f32 0.6931472, %v3872_v2  ;;  %v5675_v62 = vpop.eup %3873  ;;  %3893 = vlog2.f32 %v5597_v63 }
 0x2a8   :  { %v1092_v42 = vmul.f32 %v5669_v18, %v5667_v0  ;;  %v5673_v51 = vadd.f32 %v1091_v56, %v139_v58  ;;  %v5681_v11 = vpop.eup %3875  ;;  %v2175_v29 = vadd.f32 %v2107_v37, %v1834_v52  ;;  %3895 = vlog2.f32 %v5602_v26 }
 0x2a9   :  { %v5679_v50 = vsel %vm1024_vm7, %v1022_v9, %v1019_v5  ;;  %v3878_v43 = vpop.eup %3877  ;;  %v1222_v52 = vmul.f32 %v5559_v54, %v5559_v54 }
 0x2aa   :  { %v5683_v57 = vadd.f32 %v1092_v42, %v140_v38  ;;  %v1567_v10 = vmul.f32 %v5673_v51, %v5673_v51  ;;  %v1093_v20 = vmul.f32 %v5679_v50, %v5677_v39  ;;  %v3880_v28 = vpop.eup %3879  ;;  %3897 = vlog2.f32 %v2175_v29 }
 0x2ab   :  { %v3882_v35 = vpop.eup %3881  ;;  %v1835_v21 = vmul.f32 0.5, %v3878_v43  ;;  %v1836_v58 = vmul.f32 0.5, %v3880_v28  ;;  %v1224_v43 = vmul.f32 %v5595_v31, %v5595_v31  ;;  %v2441_v29 = vadd.f32 %v5658_v34, %v5556_v1 }
 0x2ac   :  { %v1568_v40 = vmul.f32 %v5683_v57, %v5683_v57  ;;  %v1635_v45 = vmul.f32 -0.5, %v1567_v10  ;;  %v5691_v59 = vadd.f32 %v1093_v20, %v141_v41  ;;  %v3884_v61 = vpop.eup %3883  ;;  %v2108_v2 = vmul.f32 0.5, %v3882_v35 }
 0x2ad   :  { %v3886_v4 = vpop.eup %3885  ;;  %v2109_v63 = vmul.f32 0.5, %v3884_v61  ;;  %v1223_v20 = vmul.f32 %v5592_v16, %v5592_v16 }
 0x2ae   :  { %v1636_v24 = vmul.f32 -0.5, %v1568_v40  ;;  %v1908_v36 = vmul.f32 250000.0, %v1635_v45  ;;  %v1569_v12 = vmul.f32 %v5691_v59, %v5691_v59  ;;  %v1768_v6 = vmul.f32 1.442695, %v1635_v45  ;;  %v3888_v5 = vpop.eup %3887 }
 0x2af   :  { %v3890_v9 = vpop.eup %3889  ;;  %v2176_v33 = vadd.f32 %v2108_v2, %v1835_v21  ;;  %v1837_v25 = vmul.f32 0.5, %v3886_v4  ;;  %v2110_v38 = vmul.f32 0.5, %v3888_v5  ;;  %v2177_v55 = vadd.f32 %v2109_v63, %v1836_v58 }
 0x2b0   :  { %v1909_v30 = vmul.f32 250000.0, %v1636_v24  ;;  %v2041_v23 = vmul.f32 1.442695, %v1908_v36  ;;  %v1637_v32 = vmul.f32 -0.5, %v1569_v12  ;;  %3899 = vpow2.f32 %v1768_v6  ;;  %v3892_v42 = vpop.eup %3891 }
 0x2b1   :  { %v1770_v49 = vmul.f32 1.442695, %v1636_v24  ;;  %v3894_v37 = vpop.eup %3893  ;;  %v1838_v28 = vmul.f32 0.5, %v3890_v9  ;;  %v2111_v40 = vmul.f32 0.5, %v3892_v42  ;;  %v2178_v54 = vadd.f32 %v2110_v38, %v1837_v25 }
 0x2b2   :  { %v2043_v22 = vmul.f32 1.442695, %v1909_v30  ;;  %3901 = vpow2.f32 %v2041_v23  ;;  %v1910_v53 = vmul.f32 250000.0, %v1637_v32  ;;  %v1772_v56 = vmul.f32 1.442695, %v1637_v32  ;;  %v3896_v10 = vpop.eup %3895 }
 0x2b3   :  { %3903 = vpow2.f32 %v1770_v49  ;;  %v1290_v45 = vmul.f32 -0.5, %v1222_v52  ;;  %v1419_v24 = vmul.f32 0.6931472, %v5675_v62  ;;  %v2179_v16 = vadd.f32 %v2111_v40, %v1838_v28 }
 0x2b4   :  { %3905 = vpow2.f32 %v2043_v22  ;;  %v2045_v26 = vmul.f32 1.442695, %v1910_v53  ;;  %v3898_v41 = vpop.eup %3897  ;;  %v1291_v31 = vmul.f32 -0.5, %v1223_v20  ;;  %v1292_v6 = vmul.f32 -0.5, %v1224_v43 }
 0x2b5   :  { %3907 = vpow2.f32 %v1772_v56  ;;  %v2442_v30 = vadd.f32 %v2441_v29, %v5564_v47  ;;  %v1421_v61 = vmul.f32 0.6931472, %v3894_v37  ;;  %v1225_v32 = vmul.f32 %v5613_v7, %v5613_v7 }
 0x2b6   :  { %3909 = vpow2.f32 %v2045_v26  ;;  %v2302_v22 = vmul.f32 0.6931472, %v5681_v11  ;;  %v1494_v2 = vsub.f32 %v1290_v45, %v1419_v24  ;;  %v2304_v7 = vmul.f32 0.6931472, %v3898_v41 }
 0x2b7   :  { %3911 = vlog2.f32 %v5615_v14  ;;  %v2443_v47 = vadd.f32 %v2442_v30, %v5585_v17  ;;  %v1423_v5 = vmul.f32 0.6931472, %v3896_v10  ;;  %v1226_v37 = vmul.f32 %v5619_v8, %v5619_v8 }
 0x2b8   :  { %3913 = vlog2.f32 %v2176_v33  ;;  %v2378_v11 = vsub.f32 %v1493_v48, %v2302_v22  ;;  %v2379_v42 = vsub.f32 %v1494_v2, %v2304_v7  ;;  %v1293_v25 = vmul.f32 -0.5, %v1225_v32 }
 0x2b9   :  { %3915 = vlog2.f32 %v5621_v19  ;;  %v2444_v63 = vadd.f32 %v2443_v47, %v5590_v15  ;;  %v1496_v38 = vsub.f32 %v1292_v6, %v1423_v5  ;;  %v1227_v15 = vmul.f32 %v5661_v46, %v5661_v46 }
 0x2ba   :  { %3917 = vlog2.f32 %v2177_v55  ;;  %v3900_v14 = vpop.eup %3899  ;;  %v1294_v10 = vmul.f32 -0.5, %v1226_v37  ;;  %v1228_v8 = vmul.f32 %v5667_v0, %v5667_v0  ;;  %v1229_v46 = vmul.f32 %v5677_v39, %v5677_v39 }
 0x2bb   :  { %v1839_v36 = vmul.f32 0.5, %v3900_v14  ;;  %3919 = vlog2.f32 %v2178_v54  ;;  %v2445_v52 = vadd.f32 %v2444_v63, %v2378_v11  ;;  %v1295_v45 = vmul.f32 -0.5, %v1227_v15 }
 0x2bc   :  { %v3902_v35 = vpop.eup %3901  ;;  %3921 = vlog2.f32 %v5663_v3  ;;  %v1296_v6 = vmul.f32 -0.5, %v1228_v8 }
 0x2bd   :  { %v3904_v12 = vpop.eup %3903  ;;  %v2112_v19 = vmul.f32 0.5, %v3902_v35  ;;  %3923 = vlog2.f32 %v2179_v16  ;;  %v2446_v48 = vadd.f32 %v2445_v52, %v2379_v42 }
 0x2be   :  { %v3906_v23 = vpop.eup %3905  ;;  %v1840_v1 = vmul.f32 0.5, %v3904_v12  ;;  %3925 = vlog2.f32 %v5669_v18  ;;  %v1495_v18 = vsub.f32 %v1291_v31, %v1421_v61  ;;  %v3104_v61 = vpack.c.bf16 %v5683_v57, %v5673_v51 }
 0x2bf   :  { %v3908_v34 = vpop.eup %3907  ;;  %v2113_v49 = vmul.f32 0.5, %v3906_v23  ;;  %v2180_v62 = vadd.f32 %v2112_v19, %v1839_v36  ;;  %v2623_v51 = vrot.slane %v5634_v44, %v5190_v27 }
 0x2c0   :  { %v3910_v21 = vpop.eup %3909  ;;  %v1841_v53 = vmul.f32 0.5, %v3908_v34  ;;  %v1297_v34 = vmul.f32 -0.5, %v1229_v46  ;;  %3105 = vmatpush3.bf16.msra.mxu1 %v3104_v61 }
 0x2c1   :  { %v3912_v56 = vpop.eup %3911  ;;  %v2114_v4 = vmul.f32 0.5, %v3910_v21  ;;  %v2181_v58 = vadd.f32 %v2113_v49, %v1840_v1  ;;  %3927 = vlog2.f32 %v2180_v62 }
 0x2c2   :  { %v3914_v3 = vpop.eup %3913  ;;  %3929 = vlog2.f32 %v5679_v50  ;;  %v1425_v50 = vmul.f32 0.6931472, %v3912_v56 }
 0x2c3   :  { %v3916_v26 = vpop.eup %3915  ;;  %v2182_v9 = vadd.f32 %v2114_v4, %v1841_v53  ;;  %v2306_v33 = vmul.f32 0.6931472, %v3914_v3  ;;  %3931 = vlog2.f32 %v2181_v58 }
 0x2c4   :  { %v3918_v17 = vpop.eup %3917  ;;  %v1427_v20 = vmul.f32 0.6931472, %v3916_v26  ;;  %v1497_v43 = vsub.f32 %v1293_v25, %v1425_v50 }
 0x2c5   :  { %v3920_v55 = vpop.eup %3919  ;;  %v2308_v60 = vmul.f32 0.6931472, %v3918_v17  ;;  %3933 = vlog2.f32 %v2182_v9  ;;  %v2380_v13 = vsub.f32 %v1495_v18, %v2306_v33 }
 0x2c6   :  { %v3922_v41 = vpop.eup %3921  ;;  %v2310_v28 = vmul.f32 0.6931472, %v3920_v55  ;;  %v1498_v35 = vsub.f32 %v1294_v10, %v1427_v20 }
 0x2c7   :  { %v2381_v40 = vsub.f32 %v1496_v38, %v2308_v60  ;;  %v2447_v54 = vadd.f32 %v2446_v48, %v2380_v13  ;;  %v3924_v14 = vpop.eup %3923  ;;  %v1429_v29 = vmul.f32 0.6931472, %v3922_v41 }
 0x2c8   :  { %v3926_v24 = vpop.eup %3925  ;;  %v2312_v36 = vmul.f32 0.6931472, %v3924_v14  ;;  %v2382_v16 = vsub.f32 %v1497_v43, %v2310_v28 }
 0x2c9   :  { %v2448_v12 = vadd.f32 %v2447_v54, %v2381_v40  ;;  %v1431_v19 = vmul.f32 0.6931472, %v3926_v24  ;;  %v1499_v30 = vsub.f32 %v1295_v45, %v1429_v29 }
 0x2ca   :  { %v2383_v0 = vsub.f32 %v1498_v35, %v2312_v36 }
 0x2cb   :  { %v3928_v31 = vpop.eup %3927  ;;  %v2449_v1 = vadd.f32 %v2448_v12, %v2382_v16  ;;  %v1500_v62 = vsub.f32 %v1296_v6, %v1431_v19 }
 0x2cc   :  { %v3930_v23 = vpop.eup %3929  ;;  %v2314_v32 = vmul.f32 0.6931472, %v3928_v31 }
 0x2cd   :  { %v1433_v49 = vmul.f32 0.6931472, %v3930_v23  ;;  %v3932_v22 = vpop.eup %3931  ;;  %v2450_v2 = vadd.f32 %v2449_v1, %v2383_v0 }
 0x2ce   :  { %v2384_v21 = vsub.f32 %v1499_v30, %v2314_v32  ;;  %v2316_v47 = vmul.f32 0.6931472, %v3932_v22 }
 0x2cf   :  { %v1501_v53 = vsub.f32 %v1297_v34, %v1433_v49  ;;  %v3934_v39 = vpop.eup %3933 }
 0x2d0   :  { %v2451_v56 = vadd.f32 %v2450_v2, %v2384_v21  ;;  %v2318_v4 = vmul.f32 0.6931472, %v3934_v39  ;;  %v2385_v58 = vsub.f32 %v1500_v62, %v2316_v47 }
 0x2d2   :  { %v2386_v7 = vsub.f32 %v1501_v53, %v2318_v4  ;;  %v2452_v3 = vadd.f32 %v2451_v56, %v2385_v58 }
 0x2d4   :  { %v2453_v11 = vadd.f32 %v2452_v3, %v2386_v7 }
 0x2d6   :  { %2454 = vadd.xlane.f32.xlu0 %v2453_v11 }
 0x358   :  { %v2690_v57 = vpop.f32.mrb[2].mxu0 }
 0x359   :  { %v2691_v63 = vadd.f32 %v2690_v57, %v2623_v51  ;;  %v2974_v26 = vpop.f32.mrb[3].mxu0 }
 0x35b   :  { %vm2694_vm8 = vcmp.ge.f32.partialorder %v2691_v63, 0.0  ;;  %v2695_v5 = vmul.f32 0.01, %v2691_v63 }
 0x35d   :  { %v2696_v18 = vsel %vm2694_vm8, %v2691_v63, %v2695_v5 }
 0x35e   :  { %3008 = vmatmul.mubr.f32.vlgmr.msra.gmra.mrb[2].mxu1 %v2696_v18 }
 0x363   :  { %v2455_v9 = vpop.xlane.xlu0 %2454 }
 0x364   :  { %v2456_v33 = vrot.slane %v2455_v9, 4 }
 0x366   :  { %v2457_v17 = vadd.f32 %v2456_v33, %v2455_v9 }
 0x368   :  { %v2458_v42 = vrot.slane %v2457_v17, 2 }
 0x36a   :  { %v2459_v52 = vadd.f32 %v2458_v42, %v2457_v17 }
 0x36c   :  { %v2460_v37 = vrot.slane %v2459_v52, 1 }
 0x36e   :  { %v2461_v25 = vadd.f32 %v2460_v37, %v2459_v52 }
 0x370   :  { %3106 = vpush %v2461_v25 }
 0x3a1   :  { %s3107_s3 = spop %3106 }
 0x3a2   :  { %2464 = sst [smem:[#allocation12]] %s3107_s3 }
 0x3a3   :  { %4032 = shalt.err (!%p4029_p6)
}
 0x3a4   :  { %s4074_s21 = smov [#allocation12]   ;;  %v2700_v44 = vrot.slane %v5691_v59, %v5190_v27  ;;  %s4075_s24 = smov [#allocation11]  }
 0x3a5   :  { %2789 = dma.smem_to_hbm %s4074_s21, 16, %s5763_s5, [#allocation5]  }
 0x3a6   :  { %s2778_s25 = sshll.u32 %s4075_s24, 4  ;;  %s2779_s25 = int_to_ptr.vmem [resolvable:$true] %s2778_s25 }
 0x3a7   :  { %s4033_s26 = scalar_lea.vmem %s2779_s25, 128  ;;  %p4038_p8 = scmp.lt.s32.totalorder %s2779_s25, %s2779_s25 }
 0x3a8   :  { %p4034_p7 = scmp.ne.s32.totalorder %s2779_s25, %s4033_s26  ;;  %p4039_p9 = scmp.lt.s32.totalorder %s4033_s26, %s4033_s26 }
 0x3aa   :  { %p4040_p10 = por %p4039_p9, %p4038_p8 }
 0x3ac   :  { %p4041_p11 = pnand %p4040_p10, %p4034_p7 }
 0x431   :  { %v2767_v50 = vpop.f32.mrb[2].mxu1 }
 0x432   :  { %v2768_v38 = vadd.f32 %v2767_v50, %v2700_v44  ;;  %v3009_v55 = vpop.f32.mrb[3].mxu1 }
 0x434   :  { %2771 = vst [vmem:[#allocation11] sm:$0xff] %v2768_v38 }
 0x435   :  { %4044 = shalt.err (!%p4041_p11)
}
 0x436   :  { %s4045_s5 = scalar_lea.hbm %s5762_s4, 128 }
 0x437   :  { %p4046_p12 = scmp.ne.s32.totalorder %s5762_s4, %s4045_s5  ;;  %p4049_p13 = scmp.lt.u32.totalorder %s4045_s5, %s5762_s4 }
 0x439   :  { %p4051_p0 = pnand %p4049_p13, %p4046_p12 }
 0x43b   :  { %4054 = shalt.err (!%p4051_p0)
}
 0x43c   :  { %2781 = dma.vmem_to_hbm [thread:$0]  %s2779_s25, 128, %s5762_s4, [#allocation4]  }
 0x43d   :  { %4061 = dma.done.wait [#allocation4], 128  }
 0x43e   :  { %4062 = vsyncadd [#allocation4], 4294967168 }
 0x43f   :  { %4063 = dma.done.wait [#allocation5], 16  }
 0x440   :  { %4064 = vsyncadd [#allocation5], 4294967280 }
 0x441   :  { %2796 = sfence }
 0x442   :  { %2797 = vsyncpa [#allocation3], 1 }
 0x443   :  { %2798 = vsyncpa [#allocation7], 1 }
 0x444   :  { %2799 = vsyncpa [#allocation10], 1 }
 0x445   :  { %2800 = vsyncpa [#allocation4], 1 }
 0x446   :  { %2801 = vsyncpa [#allocation5], 1 }

</bundles_post_ra>
